<compile_context>
chip_gen: v7x
topology: tpu7x:2x2x1
jax: 0.10.0
libtpu: 0.0.40
codegen_flags: <defaults>
</compile_context>

<pallas_src>
import math
import jax
import jax.numpy as jnp
from jax.experimental import pallas as pl
from jax.experimental.pallas import tpu as pltpu


def focuser_kernel(x_ref, g_ref, hx0_ref,
                   wc_ref, w1_ref, b1_ref, wg_ref, bg_ref,
                   wx_ref, bx_ref, wh_ref, bh_ref,
                   wa_ref, ba_ref,
                   probs_ref, act_ref, hxo_ref,
                   hs_scr):
    HW = x_ref.shape[0]            # spatial positions
    TB = g_ref.shape[0]            # T * B rows
    B, Hp = hx0_ref.shape          # batch, padded hidden (128)
    T = TB // B
    Ap = ba_ref.shape[1]           # padded action dim (128)

    # ---------- Phase 1: hx-independent encoder, batched over all T*B rows ----------
    # conv1x1 + ReLU + FC accumulated per spatial position:
    #   state[b, j] = relu( b1[j] + sum_hw relu(x[b, :, hw] @ wc) @ w1hw[hw] )
    # (avoids both the identity-kron conv weight and any in-kernel flatten/reshape;
    #  the channel-major flatten order is baked into w1hw on the wrapper side)
    acc = jnp.zeros((TB, Hp), jnp.float32)
    for hw in range(HW):                                           # static, unrolled
        h1 = jnp.maximum(
            jnp.dot(x_ref[hw], wc_ref[...],
                    preferred_element_type=jnp.float32), 0.0)      # (TB, 32)
        acc = acc + jnp.dot(h1, w1_ref[hw],
                            preferred_element_type=jnp.float32)    # (TB, Hp)
    s = jnp.maximum(acc + b1_ref[...], 0.0)

    # global-feature fusion
    gru_in = s + jnp.dot(g_ref[...], wg_ref[...],
                         preferred_element_type=jnp.float32) + bg_ref[...]

    # x-side GRU gate pre-activations are hx-independent -> batched over T*B too.
    gates_x = jnp.dot(gru_in, wx_ref[...],
                      preferred_element_type=jnp.float32) + bx_ref[...]   # (TB, 3*Hp)

    # ---------- Phase 2: serial GRU recurrence (only hx-dependent work) ----------
    hx = hx0_ref[...]                                              # (B, Hp)
    for t in range(T):                                             # static, unrolled
        gx = gates_x[t * B:(t + 1) * B, :]                         # (B, 3*Hp)
        gh = jnp.dot(hx, wh_ref[...],
                     preferred_element_type=jnp.float32) + bh_ref[...]
        r = jax.nn.sigmoid(gx[:, 0:Hp] + gh[:, 0:Hp])
        z = jax.nn.sigmoid(gx[:, Hp:2 * Hp] + gh[:, Hp:2 * Hp])
        n = jnp.tanh(gx[:, 2 * Hp:3 * Hp] + r * gh[:, 2 * Hp:3 * Hp])
        hx = (1.0 - z) * n + z * hx
        hs_scr[t * B:(t + 1) * B, :] = hx                          # collect for phase 3
    hxo_ref[...] = hx

    # ---------- Phase 3: actor head + softmax + argmax, batched over T*B ----------
    h_all = hs_scr[...]                                            # (TB, Hp)
    logits = jnp.dot(h_all, wa_ref[...],
                     preferred_element_type=jnp.float32) + ba_ref[...]   # (TB, Ap)
    m = jnp.max(logits, axis=-1, keepdims=True)
    e = jnp.exp(logits - m)
    probs_ref[...] = e / jnp.sum(e, axis=-1, keepdims=True)

    idx = jax.lax.broadcasted_iota(jnp.int32, logits.shape, 1)
    cand = jnp.where(logits == m, idx, Ap)                         # first-max index
    act_ref[...] = jnp.min(cand, axis=-1, keepdims=True).astype(jnp.int32)


def focuser_forward_seq(feature_seq, global_seq, hx0, params):
    """Runs T recurrent policy steps in one pallas_call (single grid point).

    feature_seq: (T, B, C, H, W) NCHW float32; global_seq: (T, B, C);
    hx0: (B, hidden).  Returns (actions (T,B) int32, hx_final (B,hidden),
    probs (T,B,A)).
    """
    T, B, C, Hs, Ws = feature_seq.shape
    HW = Hs * Ws
    TB = T * B
    H = hx0.shape[1]
    A = params['ba'].shape[0]
    Hp, Ap = 128, 128
    f32 = jnp.float32

    # -------- wrapper-side layout plumbing (no compute hoisted) --------
    # frames: (T,B,C,Hs,Ws) -> (HW, T*B, C); row index = t*B + b
    xhw = feature_seq.astype(f32).reshape(TB, C, HW).transpose(2, 0, 1)
    g_all = global_seq.astype(f32).reshape(TB, C)

    # 1x1 conv weight stays plain: (32, C, 1, 1) -> (C, 32)
    wc = params['wc'].reshape(32, C).T.astype(f32)

    # FC weight (hidden, 32*HW) with channel-major columns -> per-hw blocks
    # w1hw[hw, o, j] = w1[j, o*HW + hw]  (pure column permutation + reshape)
    w1hw = params['w1'].astype(f32).reshape(H, 32, HW).transpose(2, 1, 0)  # (HW,32,H)
    w1hw = jnp.pad(w1hw, ((0, 0), (0, 0), (0, Hp - H)))

    def padc(a, n):
        return jnp.pad(a, ((0, 0), (0, n - a.shape[1])))

    b1 = padc(params['b1'].reshape(1, H).astype(f32), Hp)
    wg = padc(params['wg'].T.astype(f32), Hp)                      # (C, Hp)
    bg = padc(params['bg'].reshape(1, H).astype(f32), Hp)

    # GRU: split x-side / h-side matrices, one 128-lane segment per gate (r,z,n).
    w_ih, w_hh = params['w_ih'].astype(f32), params['w_hh'].astype(f32)   # (3H, H)
    b_ih, b_hh = params['b_ih'].astype(f32), params['b_hh'].astype(f32)   # (3H,)
    wx = jnp.zeros((Hp, 3 * Hp), f32)
    wh = jnp.zeros((Hp, 3 * Hp), f32)
    bx = jnp.zeros((1, 3 * Hp), f32)
    bh = jnp.zeros((1, 3 * Hp), f32)
    for g in range(3):
        wx = wx.at[0:H, g * Hp:g * Hp + H].set(w_ih[g * H:(g + 1) * H, :].T)
        wh = wh.at[0:H, g * Hp:g * Hp + H].set(w_hh[g * H:(g + 1) * H, :].T)
        bx = bx.at[0, g * Hp:g * Hp + H].set(b_ih[g * H:(g + 1) * H])
        bh = bh.at[0, g * Hp:g * Hp + H].set(b_hh[g * H:(g + 1) * H])

    # Actor head padded to 128 lanes; padded classes get -1e30 bias (f32-safe).
    wa = jnp.zeros((Hp, Ap), f32).at[0:H, 0:A].set(params['wa'].astype(f32).T)
    ba = jnp.full((1, Ap), -1e30, f32).at[0, 0:A].set(params['ba'].astype(f32))

    hx0p = jnp.zeros((B, Hp), f32).at[:, 0:H].set(hx0.astype(f32))

    # Single grid point: every operand lives whole in VMEM, one DMA in, one
    # writeback out; the recurrence runs as an in-kernel unrolled loop.
    probs_p, act_p, hx_out = pl.pallas_call(
        focuser_kernel,
        out_shape=(jax.ShapeDtypeStruct((TB, Ap), f32),
                   jax.ShapeDtypeStruct((TB, 1), jnp.int32),
                   jax.ShapeDtypeStruct((B, Hp), f32)),
        scratch_shapes=[pltpu.VMEM((TB, Hp), f32)],
    )(xhw, g_all, hx0p, wc, w1hw, b1, wg, bg, wx, bx, wh, bh, wa, ba)

    actions = act_p[:, 0].reshape(T, B)
    probs = probs_p[:, :A].reshape(T, B, A)
    hx_final = hx_out[:, :H]
    return actions, hx_final, probs


def reference_forward_seq(feature_seq, global_seq, hx0, params):
    """Pure-JAX reference mirroring the PyTorch per-step semantics."""
    T, B, C, Hs, Ws = feature_seq.shape
    hidden = hx0.shape[1]
    wc2d = params['wc'].reshape(32, C)
    hx = hx0
    actions, probs_l = [], []
    for t in range(T):
        feat = feature_seq[t]
        h1 = jnp.maximum(jnp.einsum('bchw,oc->bohw', feat, wc2d), 0.0)
        flat = h1.reshape(B, -1)                              # channel-major flatten
        s = jnp.maximum(flat @ params['w1'].T + params['b1'], 0.0)
        gproj = global_seq[t] @ params['wg'].T + params['bg']
        x = s + gproj
        gi = x @ params['w_ih'].T + params['b_ih']
        gh = hx @ params['w_hh'].T + params['b_hh']
        r = jax.nn.sigmoid(gi[:, :hidden] + gh[:, :hidden])
        z = jax.nn.sigmoid(gi[:, hidden:2 * hidden] + gh[:, hidden:2 * hidden])
        n = jnp.tanh(gi[:, 2 * hidden:] + r * gh[:, 2 * hidden:])
        hx = (1.0 - z) * n + z * hx
        logits = hx @ params['wa'].T + params['ba']
        probs_l.append(jax.nn.softmax(logits, axis=-1))
        actions.append(jnp.argmax(logits, axis=-1).astype(jnp.int32))
    return jnp.stack(actions), hx, jnp.stack(probs_l)


def init_params(key, C, HW, hidden, action_dim):
    def u(k, shape, fan_in):
        b = 1.0 / math.sqrt(fan_in)
        return jax.random.uniform(k, shape, jnp.float32, -b, b)

    ks = jax.random.split(key, 12)
    return {
        'wc':   u(ks[0], (32, C, 1, 1), C),            # Conv2d(feature_dim, 32, 1), no bias
        'w1':   u(ks[1], (hidden, 32 * HW), 32 * HW),  # Linear(32*HW, hidden)
        'b1':   u(ks[2], (hidden,), 32 * HW),
        'wg':   u(ks[3], (hidden, C), C),              # global_fea projection
        'bg':   u(ks[4], (hidden,), C),
        'w_ih': u(ks[5], (3 * hidden, hidden), hidden),
        'w_hh': u(ks[6], (3 * hidden, hidden), hidden),
        'b_ih': u(ks[7], (3 * hidden,), hidden),
        'b_hh': u(ks[8], (3 * hidden,), hidden),
        'wa':   u(ks[9], (action_dim, hidden), hidden),
        'ba':   u(ks[10], (action_dim,), hidden),
    }


if __name__ == "__main__":
    T, B, C, Hs, Ws = 8, 2, 4, 4, 4     # seq=8 frames, feature_dim=4, state HW=16
    hidden = 32                          # policy_hidden_state_dim
    action_dim = 9                       # policy_action_dim
    HW = Hs * Ws

    key = jax.random.PRNGKey(0)
    k_feat, k_glob, k_hx, k_par = jax.random.split(key, 4)
    feature_seq = jax.random.normal(k_feat, (T, B, C, Hs, Ws), jnp.float32)
    global_seq = jax.random.normal(k_glob, (T, B, C), jnp.float32)
    hx0 = jax.random.normal(k_hx, (B, hidden), jnp.float32)
    params = init_params(k_par, C, HW, hidden, action_dim)

    act_k, hx_k, probs_k = focuser_forward_seq(feature_seq, global_seq, hx0, params)
    jax.block_until_ready((act_k, hx_k, probs_k))

    act_r, hx_r, probs_r = reference_forward_seq(feature_seq, global_seq, hx0, params)
    assert act_k.shape == (T, B) and probs_k.shape == (T, B, action_dim)
    assert jnp.array_equal(act_k, act_r), (act_k, act_r)
    assert jnp.allclose(hx_k, hx_r, atol=1e-5, rtol=1e-5)
    assert jnp.allclose(probs_k, probs_r, atol=1e-5, rtol=1e-5)

    print("KERNEL_OK")
</pallas_src>

<mosaic_0001>
module attributes {stable_mosaic.version = 11 : i64} {
  func.func @focuser_kernel(%arg0: memref<16x16x4xf32, #tpu.memory_space<vmem>>, %arg1: memref<16x4xf32, #tpu.memory_space<vmem>>, %arg2: memref<2x128xf32, #tpu.memory_space<vmem>>, %arg3: memref<4x32xf32, #tpu.memory_space<vmem>>, %arg4: memref<16x32x128xf32, #tpu.memory_space<vmem>>, %arg5: memref<1x128xf32, #tpu.memory_space<vmem>>, %arg6: memref<4x128xf32, #tpu.memory_space<vmem>>, %arg7: memref<1x128xf32, #tpu.memory_space<vmem>>, %arg8: memref<128x384xf32, #tpu.memory_space<vmem>>, %arg9: memref<1x384xf32, #tpu.memory_space<vmem>>, %arg10: memref<128x384xf32, #tpu.memory_space<vmem>>, %arg11: memref<1x384xf32, #tpu.memory_space<vmem>>, %arg12: memref<128x128xf32, #tpu.memory_space<vmem>>, %arg13: memref<1x128xf32, #tpu.memory_space<vmem>>, %arg14: memref<16x128xf32, #tpu.memory_space<vmem>>, %arg15: memref<16x1xi32, #tpu.memory_space<vmem>>, %arg16: memref<2x128xf32, #tpu.memory_space<vmem>>, %arg17: memref<16x128xf32, #tpu.memory_space<vmem>>) attributes {dimension_semantics = [], scalar_prefetch = 0 : i64, scratch_operands = 1 : i64, tpu.core_type = #tpu.core_type<tc>} {
    %cst = arith.constant 0.000000e+00 : f32
    %0 = vector.broadcast %cst : f32 to vector<16x128xf32>
    %c0 = arith.constant 0 : index
    %c0_0 = arith.constant 0 : index
    %c0_1 = arith.constant 0 : index
    %1 = vector.load %arg0[%c0, %c0_0, %c0_1] : memref<16x16x4xf32, #tpu.memory_space<vmem>>, vector<1x16x4xf32>
    %2 = vector.shape_cast %1 : vector<1x16x4xf32> to vector<16x4xf32>
    %c0_2 = arith.constant 0 : index
    %c0_3 = arith.constant 0 : index
    %3 = vector.load %arg3[%c0_2, %c0_3] : memref<4x32xf32, #tpu.memory_space<vmem>>, vector<4x32xf32>
    %cst_4 = arith.constant dense<0.000000e+00> : vector<16x32xf32>
    %4 = tpu.matmul %2, %3, %cst_4 {dimension_numbers = #tpu.dot_dimension_numbers<[1], [0], [0], [1], [0, 0, 1, 1], [], []>} : vector<16x4xf32>, vector<4x32xf32>, vector<16x32xf32> -> vector<16x32xf32>
    %cst_5 = arith.constant 0.000000e+00 : f32
    %5 = vector.broadcast %cst_5 : f32 to vector<16x32xf32>
    %6 = arith.maximumf %4, %5 : vector<16x32xf32>
    %c0_6 = arith.constant 0 : index
    %c0_7 = arith.constant 0 : index
    %c0_8 = arith.constant 0 : index
    %7 = vector.load %arg4[%c0_6, %c0_7, %c0_8] : memref<16x32x128xf32, #tpu.memory_space<vmem>>, vector<1x32x128xf32>
    %8 = vector.shape_cast %7 : vector<1x32x128xf32> to vector<32x128xf32>
    %cst_9 = arith.constant dense<0.000000e+00> : vector<16x128xf32>
    %9 = tpu.matmul %6, %8, %cst_9 {dimension_numbers = #tpu.dot_dimension_numbers<[1], [0], [0], [1], [0, 0, 1, 1], [], []>} : vector<16x32xf32>, vector<32x128xf32>, vector<16x128xf32> -> vector<16x128xf32>
    %10 = arith.addf %0, %9 : vector<16x128xf32>
    %c1 = arith.constant 1 : index
    %c0_10 = arith.constant 0 : index
    %c0_11 = arith.constant 0 : index
    %11 = vector.load %arg0[%c1, %c0_10, %c0_11] : memref<16x16x4xf32, #tpu.memory_space<vmem>>, vector<1x16x4xf32>
    %12 = vector.shape_cast %11 : vector<1x16x4xf32> to vector<16x4xf32>
    %c0_12 = arith.constant 0 : index
    %c0_13 = arith.constant 0 : index
    %13 = vector.load %arg3[%c0_12, %c0_13] : memref<4x32xf32, #tpu.memory_space<vmem>>, vector<4x32xf32>
    %cst_14 = arith.constant dense<0.000000e+00> : vector<16x32xf32>
    %14 = tpu.matmul %12, %13, %cst_14 {dimension_numbers = #tpu.dot_dimension_numbers<[1], [0], [0], [1], [0, 0, 1, 1], [], []>} : vector<16x4xf32>, vector<4x32xf32>, vector<16x32xf32> -> vector<16x32xf32>
    %cst_15 = arith.constant 0.000000e+00 : f32
    %15 = vector.broadcast %cst_15 : f32 to vector<16x32xf32>
    %16 = arith.maximumf %14, %15 : vector<16x32xf32>
    %c1_16 = arith.constant 1 : index
    %c0_17 = arith.constant 0 : index
    %c0_18 = arith.constant 0 : index
    %17 = vector.load %arg4[%c1_16, %c0_17, %c0_18] : memref<16x32x128xf32, #tpu.memory_space<vmem>>, vector<1x32x128xf32>
    %18 = vector.shape_cast %17 : vector<1x32x128xf32> to vector<32x128xf32>
    %cst_19 = arith.constant dense<0.000000e+00> : vector<16x128xf32>
    %19 = tpu.matmul %16, %18, %cst_19 {dimension_numbers = #tpu.dot_dimension_numbers<[1], [0], [0], [1], [0, 0, 1, 1], [], []>} : vector<16x32xf32>, vector<32x128xf32>, vector<16x128xf32> -> vector<16x128xf32>
    %20 = arith.addf %10, %19 : vector<16x128xf32>
    %c2 = arith.constant 2 : index
    %c0_20 = arith.constant 0 : index
    %c0_21 = arith.constant 0 : index
    %21 = vector.load %arg0[%c2, %c0_20, %c0_21] : memref<16x16x4xf32, #tpu.memory_space<vmem>>, vector<1x16x4xf32>
    %22 = vector.shape_cast %21 : vector<1x16x4xf32> to vector<16x4xf32>
    %c0_22 = arith.constant 0 : index
    %c0_23 = arith.constant 0 : index
    %23 = vector.load %arg3[%c0_22, %c0_23] : memref<4x32xf32, #tpu.memory_space<vmem>>, vector<4x32xf32>
    %cst_24 = arith.constant dense<0.000000e+00> : vector<16x32xf32>
    %24 = tpu.matmul %22, %23, %cst_24 {dimension_numbers = #tpu.dot_dimension_numbers<[1], [0], [0], [1], [0, 0, 1, 1], [], []>} : vector<16x4xf32>, vector<4x32xf32>, vector<16x32xf32> -> vector<16x32xf32>
    %cst_25 = arith.constant 0.000000e+00 : f32
    %25 = vector.broadcast %cst_25 : f32 to vector<16x32xf32>
    %26 = arith.maximumf %24, %25 : vector<16x32xf32>
    %c2_26 = arith.constant 2 : index
    %c0_27 = arith.constant 0 : index
    %c0_28 = arith.constant 0 : index
    %27 = vector.load %arg4[%c2_26, %c0_27, %c0_28] : memref<16x32x128xf32, #tpu.memory_space<vmem>>, vector<1x32x128xf32>
    %28 = vector.shape_cast %27 : vector<1x32x128xf32> to vector<32x128xf32>
    %cst_29 = arith.constant dense<0.000000e+00> : vector<16x128xf32>
    %29 = tpu.matmul %26, %28, %cst_29 {dimension_numbers = #tpu.dot_dimension_numbers<[1], [0], [0], [1], [0, 0, 1, 1], [], []>} : vector<16x32xf32>, vector<32x128xf32>, vector<16x128xf32> -> vector<16x128xf32>
    %30 = arith.addf %20, %29 : vector<16x128xf32>
    %c3 = arith.constant 3 : index
    %c0_30 = arith.constant 0 : index
    %c0_31 = arith.constant 0 : index
    %31 = vector.load %arg0[%c3, %c0_30, %c0_31] : memref<16x16x4xf32, #tpu.memory_space<vmem>>, vector<1x16x4xf32>
    %32 = vector.shape_cast %31 : vector<1x16x4xf32> to vector<16x4xf32>
    %c0_32 = arith.constant 0 : index
    %c0_33 = arith.constant 0 : index
    %33 = vector.load %arg3[%c0_32, %c0_33] : memref<4x32xf32, #tpu.memory_space<vmem>>, vector<4x32xf32>
    %cst_34 = arith.constant dense<0.000000e+00> : vector<16x32xf32>
    %34 = tpu.matmul %32, %33, %cst_34 {dimension_numbers = #tpu.dot_dimension_numbers<[1], [0], [0], [1], [0, 0, 1, 1], [], []>} : vector<16x4xf32>, vector<4x32xf32>, vector<16x32xf32> -> vector<16x32xf32>
    %cst_35 = arith.constant 0.000000e+00 : f32
    %35 = vector.broadcast %cst_35 : f32 to vector<16x32xf32>
    %36 = arith.maximumf %34, %35 : vector<16x32xf32>
    %c3_36 = arith.constant 3 : index
    %c0_37 = arith.constant 0 : index
    %c0_38 = arith.constant 0 : index
    %37 = vector.load %arg4[%c3_36, %c0_37, %c0_38] : memref<16x32x128xf32, #tpu.memory_space<vmem>>, vector<1x32x128xf32>
    %38 = vector.shape_cast %37 : vector<1x32x128xf32> to vector<32x128xf32>
    %cst_39 = arith.constant dense<0.000000e+00> : vector<16x128xf32>
    %39 = tpu.matmul %36, %38, %cst_39 {dimension_numbers = #tpu.dot_dimension_numbers<[1], [0], [0], [1], [0, 0, 1, 1], [], []>} : vector<16x32xf32>, vector<32x128xf32>, vector<16x128xf32> -> vector<16x128xf32>
    %40 = arith.addf %30, %39 : vector<16x128xf32>
    %c4 = arith.constant 4 : index
    %c0_40 = arith.constant 0 : index
    %c0_41 = arith.constant 0 : index
    %41 = vector.load %arg0[%c4, %c0_40, %c0_41] : memref<16x16x4xf32, #tpu.memory_space<vmem>>, vector<1x16x4xf32>
    %42 = vector.shape_cast %41 : vector<1x16x4xf32> to vector<16x4xf32>
    %c0_42 = arith.constant 0 : index
    %c0_43 = arith.constant 0 : index
    %43 = vector.load %arg3[%c0_42, %c0_43] : memref<4x32xf32, #tpu.memory_space<vmem>>, vector<4x32xf32>
    %cst_44 = arith.constant dense<0.000000e+00> : vector<16x32xf32>
    %44 = tpu.matmul %42, %43, %cst_44 {dimension_numbers = #tpu.dot_dimension_numbers<[1], [0], [0], [1], [0, 0, 1, 1], [], []>} : vector<16x4xf32>, vector<4x32xf32>, vector<16x32xf32> -> vector<16x32xf32>
    %cst_45 = arith.constant 0.000000e+00 : f32
    %45 = vector.broadcast %cst_45 : f32 to vector<16x32xf32>
    %46 = arith.maximumf %44, %45 : vector<16x32xf32>
    %c4_46 = arith.constant 4 : index
    %c0_47 = arith.constant 0 : index
    %c0_48 = arith.constant 0 : index
    %47 = vector.load %arg4[%c4_46, %c0_47, %c0_48] : memref<16x32x128xf32, #tpu.memory_space<vmem>>, vector<1x32x128xf32>
    %48 = vector.shape_cast %47 : vector<1x32x128xf32> to vector<32x128xf32>
    %cst_49 = arith.constant dense<0.000000e+00> : vector<16x128xf32>
    %49 = tpu.matmul %46, %48, %cst_49 {dimension_numbers = #tpu.dot_dimension_numbers<[1], [0], [0], [1], [0, 0, 1, 1], [], []>} : vector<16x32xf32>, vector<32x128xf32>, vector<16x128xf32> -> vector<16x128xf32>
    %50 = arith.addf %40, %49 : vector<16x128xf32>
    %c5 = arith.constant 5 : index
    %c0_50 = arith.constant 0 : index
    %c0_51 = arith.constant 0 : index
    %51 = vector.load %arg0[%c5, %c0_50, %c0_51] : memref<16x16x4xf32, #tpu.memory_space<vmem>>, vector<1x16x4xf32>
    %52 = vector.shape_cast %51 : vector<1x16x4xf32> to vector<16x4xf32>
    %c0_52 = arith.constant 0 : index
    %c0_53 = arith.constant 0 : index
    %53 = vector.load %arg3[%c0_52, %c0_53] : memref<4x32xf32, #tpu.memory_space<vmem>>, vector<4x32xf32>
    %cst_54 = arith.constant dense<0.000000e+00> : vector<16x32xf32>
    %54 = tpu.matmul %52, %53, %cst_54 {dimension_numbers = #tpu.dot_dimension_numbers<[1], [0], [0], [1], [0, 0, 1, 1], [], []>} : vector<16x4xf32>, vector<4x32xf32>, vector<16x32xf32> -> vector<16x32xf32>
    %cst_55 = arith.constant 0.000000e+00 : f32
    %55 = vector.broadcast %cst_55 : f32 to vector<16x32xf32>
    %56 = arith.maximumf %54, %55 : vector<16x32xf32>
    %c5_56 = arith.constant 5 : index
    %c0_57 = arith.constant 0 : index
    %c0_58 = arith.constant 0 : index
    %57 = vector.load %arg4[%c5_56, %c0_57, %c0_58] : memref<16x32x128xf32, #tpu.memory_space<vmem>>, vector<1x32x128xf32>
    %58 = vector.shape_cast %57 : vector<1x32x128xf32> to vector<32x128xf32>
    %cst_59 = arith.constant dense<0.000000e+00> : vector<16x128xf32>
    %59 = tpu.matmul %56, %58, %cst_59 {dimension_numbers = #tpu.dot_dimension_numbers<[1], [0], [0], [1], [0, 0, 1, 1], [], []>} : vector<16x32xf32>, vector<32x128xf32>, vector<16x128xf32> -> vector<16x128xf32>
    %60 = arith.addf %50, %59 : vector<16x128xf32>
    %c6 = arith.constant 6 : index
    %c0_60 = arith.constant 0 : index
    %c0_61 = arith.constant 0 : index
    %61 = vector.load %arg0[%c6, %c0_60, %c0_61] : memref<16x16x4xf32, #tpu.memory_space<vmem>>, vector<1x16x4xf32>
    %62 = vector.shape_cast %61 : vector<1x16x4xf32> to vector<16x4xf32>
    %c0_62 = arith.constant 0 : index
    %c0_63 = arith.constant 0 : index
    %63 = vector.load %arg3[%c0_62, %c0_63] : memref<4x32xf32, #tpu.memory_space<vmem>>, vector<4x32xf32>
    %cst_64 = arith.constant dense<0.000000e+00> : vector<16x32xf32>
    %64 = tpu.matmul %62, %63, %cst_64 {dimension_numbers = #tpu.dot_dimension_numbers<[1], [0], [0], [1], [0, 0, 1, 1], [], []>} : vector<16x4xf32>, vector<4x32xf32>, vector<16x32xf32> -> vector<16x32xf32>
    %cst_65 = arith.constant 0.000000e+00 : f32
    %65 = vector.broadcast %cst_65 : f32 to vector<16x32xf32>
    %66 = arith.maximumf %64, %65 : vector<16x32xf32>
    %c6_66 = arith.constant 6 : index
    %c0_67 = arith.constant 0 : index
    %c0_68 = arith.constant 0 : index
    %67 = vector.load %arg4[%c6_66, %c0_67, %c0_68] : memref<16x32x128xf32, #tpu.memory_space<vmem>>, vector<1x32x128xf32>
    %68 = vector.shape_cast %67 : vector<1x32x128xf32> to vector<32x128xf32>
    %cst_69 = arith.constant dense<0.000000e+00> : vector<16x128xf32>
    %69 = tpu.matmul %66, %68, %cst_69 {dimension_numbers = #tpu.dot_dimension_numbers<[1], [0], [0], [1], [0, 0, 1, 1], [], []>} : vector<16x32xf32>, vector<32x128xf32>, vector<16x128xf32> -> vector<16x128xf32>
    %70 = arith.addf %60, %69 : vector<16x128xf32>
    %c7 = arith.constant 7 : index
    %c0_70 = arith.constant 0 : index
    %c0_71 = arith.constant 0 : index
    %71 = vector.load %arg0[%c7, %c0_70, %c0_71] : memref<16x16x4xf32, #tpu.memory_space<vmem>>, vector<1x16x4xf32>
    %72 = vector.shape_cast %71 : vector<1x16x4xf32> to vector<16x4xf32>
    %c0_72 = arith.constant 0 : index
    %c0_73 = arith.constant 0 : index
    %73 = vector.load %arg3[%c0_72, %c0_73] : memref<4x32xf32, #tpu.memory_space<vmem>>, vector<4x32xf32>
    %cst_74 = arith.constant dense<0.000000e+00> : vector<16x32xf32>
    %74 = tpu.matmul %72, %73, %cst_74 {dimension_numbers = #tpu.dot_dimension_numbers<[1], [0], [0], [1], [0, 0, 1, 1], [], []>} : vector<16x4xf32>, vector<4x32xf32>, vector<16x32xf32> -> vector<16x32xf32>
    %cst_75 = arith.constant 0.000000e+00 : f32
    %75 = vector.broadcast %cst_75 : f32 to vector<16x32xf32>
    %76 = arith.maximumf %74, %75 : vector<16x32xf32>
    %c7_76 = arith.constant 7 : index
    %c0_77 = arith.constant 0 : index
    %c0_78 = arith.constant 0 : index
    %77 = vector.load %arg4[%c7_76, %c0_77, %c0_78] : memref<16x32x128xf32, #tpu.memory_space<vmem>>, vector<1x32x128xf32>
    %78 = vector.shape_cast %77 : vector<1x32x128xf32> to vector<32x128xf32>
    %cst_79 = arith.constant dense<0.000000e+00> : vector<16x128xf32>
    %79 = tpu.matmul %76, %78, %cst_79 {dimension_numbers = #tpu.dot_dimension_numbers<[1], [0], [0], [1], [0, 0, 1, 1], [], []>} : vector<16x32xf32>, vector<32x128xf32>, vector<16x128xf32> -> vector<16x128xf32>
    %80 = arith.addf %70, %79 : vector<16x128xf32>
    %c8 = arith.constant 8 : index
    %c0_80 = arith.constant 0 : index
    %c0_81 = arith.constant 0 : index
    %81 = vector.load %arg0[%c8, %c0_80, %c0_81] : memref<16x16x4xf32, #tpu.memory_space<vmem>>, vector<1x16x4xf32>
    %82 = vector.shape_cast %81 : vector<1x16x4xf32> to vector<16x4xf32>
    %c0_82 = arith.constant 0 : index
    %c0_83 = arith.constant 0 : index
    %83 = vector.load %arg3[%c0_82, %c0_83] : memref<4x32xf32, #tpu.memory_space<vmem>>, vector<4x32xf32>
    %cst_84 = arith.constant dense<0.000000e+00> : vector<16x32xf32>
    %84 = tpu.matmul %82, %83, %cst_84 {dimension_numbers = #tpu.dot_dimension_numbers<[1], [0], [0], [1], [0, 0, 1, 1], [], []>} : vector<16x4xf32>, vector<4x32xf32>, vector<16x32xf32> -> vector<16x32xf32>
    %cst_85 = arith.constant 0.000000e+00 : f32
    %85 = vector.broadcast %cst_85 : f32 to vector<16x32xf32>
    %86 = arith.maximumf %84, %85 : vector<16x32xf32>
    %c8_86 = arith.constant 8 : index
    %c0_87 = arith.constant 0 : index
    %c0_88 = arith.constant 0 : index
    %87 = vector.load %arg4[%c8_86, %c0_87, %c0_88] : memref<16x32x128xf32, #tpu.memory_space<vmem>>, vector<1x32x128xf32>
    %88 = vector.shape_cast %87 : vector<1x32x128xf32> to vector<32x128xf32>
    %cst_89 = arith.constant dense<0.000000e+00> : vector<16x128xf32>
    %89 = tpu.matmul %86, %88, %cst_89 {dimension_numbers = #tpu.dot_dimension_numbers<[1], [0], [0], [1], [0, 0, 1, 1], [], []>} : vector<16x32xf32>, vector<32x128xf32>, vector<16x128xf32> -> vector<16x128xf32>
    %90 = arith.addf %80, %89 : vector<16x128xf32>
    %c9 = arith.constant 9 : index
    %c0_90 = arith.constant 0 : index
    %c0_91 = arith.constant 0 : index
    %91 = vector.load %arg0[%c9, %c0_90, %c0_91] : memref<16x16x4xf32, #tpu.memory_space<vmem>>, vector<1x16x4xf32>
    %92 = vector.shape_cast %91 : vector<1x16x4xf32> to vector<16x4xf32>
    %c0_92 = arith.constant 0 : index
    %c0_93 = arith.constant 0 : index
    %93 = vector.load %arg3[%c0_92, %c0_93] : memref<4x32xf32, #tpu.memory_space<vmem>>, vector<4x32xf32>
    %cst_94 = arith.constant dense<0.000000e+00> : vector<16x32xf32>
    %94 = tpu.matmul %92, %93, %cst_94 {dimension_numbers = #tpu.dot_dimension_numbers<[1], [0], [0], [1], [0, 0, 1, 1], [], []>} : vector<16x4xf32>, vector<4x32xf32>, vector<16x32xf32> -> vector<16x32xf32>
    %cst_95 = arith.constant 0.000000e+00 : f32
    %95 = vector.broadcast %cst_95 : f32 to vector<16x32xf32>
    %96 = arith.maximumf %94, %95 : vector<16x32xf32>
    %c9_96 = arith.constant 9 : index
    %c0_97 = arith.constant 0 : index
    %c0_98 = arith.constant 0 : index
    %97 = vector.load %arg4[%c9_96, %c0_97, %c0_98] : memref<16x32x128xf32, #tpu.memory_space<vmem>>, vector<1x32x128xf32>
    %98 = vector.shape_cast %97 : vector<1x32x128xf32> to vector<32x128xf32>
    %cst_99 = arith.constant dense<0.000000e+00> : vector<16x128xf32>
    %99 = tpu.matmul %96, %98, %cst_99 {dimension_numbers = #tpu.dot_dimension_numbers<[1], [0], [0], [1], [0, 0, 1, 1], [], []>} : vector<16x32xf32>, vector<32x128xf32>, vector<16x128xf32> -> vector<16x128xf32>
    %100 = arith.addf %90, %99 : vector<16x128xf32>
    %c10 = arith.constant 10 : index
    %c0_100 = arith.constant 0 : index
    %c0_101 = arith.constant 0 : index
    %101 = vector.load %arg0[%c10, %c0_100, %c0_101] : memref<16x16x4xf32, #tpu.memory_space<vmem>>, vector<1x16x4xf32>
    %102 = vector.shape_cast %101 : vector<1x16x4xf32> to vector<16x4xf32>
    %c0_102 = arith.constant 0 : index
    %c0_103 = arith.constant 0 : index
    %103 = vector.load %arg3[%c0_102, %c0_103] : memref<4x32xf32, #tpu.memory_space<vmem>>, vector<4x32xf32>
    %cst_104 = arith.constant dense<0.000000e+00> : vector<16x32xf32>
    %104 = tpu.matmul %102, %103, %cst_104 {dimension_numbers = #tpu.dot_dimension_numbers<[1], [0], [0], [1], [0, 0, 1, 1], [], []>} : vector<16x4xf32>, vector<4x32xf32>, vector<16x32xf32> -> vector<16x32xf32>
    %cst_105 = arith.constant 0.000000e+00 : f32
    %105 = vector.broadcast %cst_105 : f32 to vector<16x32xf32>
    %106 = arith.maximumf %104, %105 : vector<16x32xf32>
    %c10_106 = arith.constant 10 : index
    %c0_107 = arith.constant 0 : index
    %c0_108 = arith.constant 0 : index
    %107 = vector.load %arg4[%c10_106, %c0_107, %c0_108] : memref<16x32x128xf32, #tpu.memory_space<vmem>>, vector<1x32x128xf32>
    %108 = vector.shape_cast %107 : vector<1x32x128xf32> to vector<32x128xf32>
    %cst_109 = arith.constant dense<0.000000e+00> : vector<16x128xf32>
    %109 = tpu.matmul %106, %108, %cst_109 {dimension_numbers = #tpu.dot_dimension_numbers<[1], [0], [0], [1], [0, 0, 1, 1], [], []>} : vector<16x32xf32>, vector<32x128xf32>, vector<16x128xf32> -> vector<16x128xf32>
    %110 = arith.addf %100, %109 : vector<16x128xf32>
    %c11 = arith.constant 11 : index
    %c0_110 = arith.constant 0 : index
    %c0_111 = arith.constant 0 : index
    %111 = vector.load %arg0[%c11, %c0_110, %c0_111] : memref<16x16x4xf32, #tpu.memory_space<vmem>>, vector<1x16x4xf32>
    %112 = vector.shape_cast %111 : vector<1x16x4xf32> to vector<16x4xf32>
    %c0_112 = arith.constant 0 : index
    %c0_113 = arith.constant 0 : index
    %113 = vector.load %arg3[%c0_112, %c0_113] : memref<4x32xf32, #tpu.memory_space<vmem>>, vector<4x32xf32>
    %cst_114 = arith.constant dense<0.000000e+00> : vector<16x32xf32>
    %114 = tpu.matmul %112, %113, %cst_114 {dimension_numbers = #tpu.dot_dimension_numbers<[1], [0], [0], [1], [0, 0, 1, 1], [], []>} : vector<16x4xf32>, vector<4x32xf32>, vector<16x32xf32> -> vector<16x32xf32>
    %cst_115 = arith.constant 0.000000e+00 : f32
    %115 = vector.broadcast %cst_115 : f32 to vector<16x32xf32>
    %116 = arith.maximumf %114, %115 : vector<16x32xf32>
    %c11_116 = arith.constant 11 : index
    %c0_117 = arith.constant 0 : index
    %c0_118 = arith.constant 0 : index
    %117 = vector.load %arg4[%c11_116, %c0_117, %c0_118] : memref<16x32x128xf32, #tpu.memory_space<vmem>>, vector<1x32x128xf32>
    %118 = vector.shape_cast %117 : vector<1x32x128xf32> to vector<32x128xf32>
    %cst_119 = arith.constant dense<0.000000e+00> : vector<16x128xf32>
    %119 = tpu.matmul %116, %118, %cst_119 {dimension_numbers = #tpu.dot_dimension_numbers<[1], [0], [0], [1], [0, 0, 1, 1], [], []>} : vector<16x32xf32>, vector<32x128xf32>, vector<16x128xf32> -> vector<16x128xf32>
    %120 = arith.addf %110, %119 : vector<16x128xf32>
    %c12 = arith.constant 12 : index
    %c0_120 = arith.constant 0 : index
    %c0_121 = arith.constant 0 : index
    %121 = vector.load %arg0[%c12, %c0_120, %c0_121] : memref<16x16x4xf32, #tpu.memory_space<vmem>>, vector<1x16x4xf32>
    %122 = vector.shape_cast %121 : vector<1x16x4xf32> to vector<16x4xf32>
    %c0_122 = arith.constant 0 : index
    %c0_123 = arith.constant 0 : index
    %123 = vector.load %arg3[%c0_122, %c0_123] : memref<4x32xf32, #tpu.memory_space<vmem>>, vector<4x32xf32>
    %cst_124 = arith.constant dense<0.000000e+00> : vector<16x32xf32>
    %124 = tpu.matmul %122, %123, %cst_124 {dimension_numbers = #tpu.dot_dimension_numbers<[1], [0], [0], [1], [0, 0, 1, 1], [], []>} : vector<16x4xf32>, vector<4x32xf32>, vector<16x32xf32> -> vector<16x32xf32>
    %cst_125 = arith.constant 0.000000e+00 : f32
    %125 = vector.broadcast %cst_125 : f32 to vector<16x32xf32>
    %126 = arith.maximumf %124, %125 : vector<16x32xf32>
    %c12_126 = arith.constant 12 : index
    %c0_127 = arith.constant 0 : index
    %c0_128 = arith.constant 0 : index
    %127 = vector.load %arg4[%c12_126, %c0_127, %c0_128] : memref<16x32x128xf32, #tpu.memory_space<vmem>>, vector<1x32x128xf32>
    %128 = vector.shape_cast %127 : vector<1x32x128xf32> to vector<32x128xf32>
    %cst_129 = arith.constant dense<0.000000e+00> : vector<16x128xf32>
    %129 = tpu.matmul %126, %128, %cst_129 {dimension_numbers = #tpu.dot_dimension_numbers<[1], [0], [0], [1], [0, 0, 1, 1], [], []>} : vector<16x32xf32>, vector<32x128xf32>, vector<16x128xf32> -> vector<16x128xf32>
    %130 = arith.addf %120, %129 : vector<16x128xf32>
    %c13 = arith.constant 13 : index
    %c0_130 = arith.constant 0 : index
    %c0_131 = arith.constant 0 : index
    %131 = vector.load %arg0[%c13, %c0_130, %c0_131] : memref<16x16x4xf32, #tpu.memory_space<vmem>>, vector<1x16x4xf32>
    %132 = vector.shape_cast %131 : vector<1x16x4xf32> to vector<16x4xf32>
    %c0_132 = arith.constant 0 : index
    %c0_133 = arith.constant 0 : index
    %133 = vector.load %arg3[%c0_132, %c0_133] : memref<4x32xf32, #tpu.memory_space<vmem>>, vector<4x32xf32>
    %cst_134 = arith.constant dense<0.000000e+00> : vector<16x32xf32>
    %134 = tpu.matmul %132, %133, %cst_134 {dimension_numbers = #tpu.dot_dimension_numbers<[1], [0], [0], [1], [0, 0, 1, 1], [], []>} : vector<16x4xf32>, vector<4x32xf32>, vector<16x32xf32> -> vector<16x32xf32>
    %cst_135 = arith.constant 0.000000e+00 : f32
    %135 = vector.broadcast %cst_135 : f32 to vector<16x32xf32>
    %136 = arith.maximumf %134, %135 : vector<16x32xf32>
    %c13_136 = arith.constant 13 : index
    %c0_137 = arith.constant 0 : index
    %c0_138 = arith.constant 0 : index
    %137 = vector.load %arg4[%c13_136, %c0_137, %c0_138] : memref<16x32x128xf32, #tpu.memory_space<vmem>>, vector<1x32x128xf32>
    %138 = vector.shape_cast %137 : vector<1x32x128xf32> to vector<32x128xf32>
    %cst_139 = arith.constant dense<0.000000e+00> : vector<16x128xf32>
    %139 = tpu.matmul %136, %138, %cst_139 {dimension_numbers = #tpu.dot_dimension_numbers<[1], [0], [0], [1], [0, 0, 1, 1], [], []>} : vector<16x32xf32>, vector<32x128xf32>, vector<16x128xf32> -> vector<16x128xf32>
    %140 = arith.addf %130, %139 : vector<16x128xf32>
    %c14 = arith.constant 14 : index
    %c0_140 = arith.constant 0 : index
    %c0_141 = arith.constant 0 : index
    %141 = vector.load %arg0[%c14, %c0_140, %c0_141] : memref<16x16x4xf32, #tpu.memory_space<vmem>>, vector<1x16x4xf32>
    %142 = vector.shape_cast %141 : vector<1x16x4xf32> to vector<16x4xf32>
    %c0_142 = arith.constant 0 : index
    %c0_143 = arith.constant 0 : index
    %143 = vector.load %arg3[%c0_142, %c0_143] : memref<4x32xf32, #tpu.memory_space<vmem>>, vector<4x32xf32>
    %cst_144 = arith.constant dense<0.000000e+00> : vector<16x32xf32>
    %144 = tpu.matmul %142, %143, %cst_144 {dimension_numbers = #tpu.dot_dimension_numbers<[1], [0], [0], [1], [0, 0, 1, 1], [], []>} : vector<16x4xf32>, vector<4x32xf32>, vector<16x32xf32> -> vector<16x32xf32>
    %cst_145 = arith.constant 0.000000e+00 : f32
    %145 = vector.broadcast %cst_145 : f32 to vector<16x32xf32>
    %146 = arith.maximumf %144, %145 : vector<16x32xf32>
    %c14_146 = arith.constant 14 : index
    %c0_147 = arith.constant 0 : index
    %c0_148 = arith.constant 0 : index
    %147 = vector.load %arg4[%c14_146, %c0_147, %c0_148] : memref<16x32x128xf32, #tpu.memory_space<vmem>>, vector<1x32x128xf32>
    %148 = vector.shape_cast %147 : vector<1x32x128xf32> to vector<32x128xf32>
    %cst_149 = arith.constant dense<0.000000e+00> : vector<16x128xf32>
    %149 = tpu.matmul %146, %148, %cst_149 {dimension_numbers = #tpu.dot_dimension_numbers<[1], [0], [0], [1], [0, 0, 1, 1], [], []>} : vector<16x32xf32>, vector<32x128xf32>, vector<16x128xf32> -> vector<16x128xf32>
    %150 = arith.addf %140, %149 : vector<16x128xf32>
    %c15 = arith.constant 15 : index
    %c0_150 = arith.constant 0 : index
    %c0_151 = arith.constant 0 : index
    %151 = vector.load %arg0[%c15, %c0_150, %c0_151] : memref<16x16x4xf32, #tpu.memory_space<vmem>>, vector<1x16x4xf32>
    %152 = vector.shape_cast %151 : vector<1x16x4xf32> to vector<16x4xf32>
    %c0_152 = arith.constant 0 : index
    %c0_153 = arith.constant 0 : index
    %153 = vector.load %arg3[%c0_152, %c0_153] : memref<4x32xf32, #tpu.memory_space<vmem>>, vector<4x32xf32>
    %cst_154 = arith.constant dense<0.000000e+00> : vector<16x32xf32>
    %154 = tpu.matmul %152, %153, %cst_154 {dimension_numbers = #tpu.dot_dimension_numbers<[1], [0], [0], [1], [0, 0, 1, 1], [], []>} : vector<16x4xf32>, vector<4x32xf32>, vector<16x32xf32> -> vector<16x32xf32>
    %cst_155 = arith.constant 0.000000e+00 : f32
    %155 = vector.broadcast %cst_155 : f32 to vector<16x32xf32>
    %156 = arith.maximumf %154, %155 : vector<16x32xf32>
    %c15_156 = arith.constant 15 : index
    %c0_157 = arith.constant 0 : index
    %c0_158 = arith.constant 0 : index
    %157 = vector.load %arg4[%c15_156, %c0_157, %c0_158] : memref<16x32x128xf32, #tpu.memory_space<vmem>>, vector<1x32x128xf32>
    %158 = vector.shape_cast %157 : vector<1x32x128xf32> to vector<32x128xf32>
    %cst_159 = arith.constant dense<0.000000e+00> : vector<16x128xf32>
    %159 = tpu.matmul %156, %158, %cst_159 {dimension_numbers = #tpu.dot_dimension_numbers<[1], [0], [0], [1], [0, 0, 1, 1], [], []>} : vector<16x32xf32>, vector<32x128xf32>, vector<16x128xf32> -> vector<16x128xf32>
    %160 = arith.addf %150, %159 : vector<16x128xf32>
    %c0_160 = arith.constant 0 : index
    %c0_161 = arith.constant 0 : index
    %161 = vector.load %arg5[%c0_160, %c0_161] : memref<1x128xf32, #tpu.memory_space<vmem>>, vector<1x128xf32>
    %162 = vector.broadcast %161 : vector<1x128xf32> to vector<16x128xf32>
    %163 = arith.addf %160, %162 : vector<16x128xf32>
    %cst_162 = arith.constant 0.000000e+00 : f32
    %164 = vector.broadcast %cst_162 : f32 to vector<16x128xf32>
    %165 = arith.maximumf %163, %164 : vector<16x128xf32>
    %c0_163 = arith.constant 0 : index
    %c0_164 = arith.constant 0 : index
    %166 = vector.load %arg1[%c0_163, %c0_164] : memref<16x4xf32, #tpu.memory_space<vmem>>, vector<16x4xf32>
    %c0_165 = arith.constant 0 : index
    %c0_166 = arith.constant 0 : index
    %167 = vector.load %arg6[%c0_165, %c0_166] : memref<4x128xf32, #tpu.memory_space<vmem>>, vector<4x128xf32>
    %cst_167 = arith.constant dense<0.000000e+00> : vector<16x128xf32>
    %168 = tpu.matmul %166, %167, %cst_167 {dimension_numbers = #tpu.dot_dimension_numbers<[1], [0], [0], [1], [0, 0, 1, 1], [], []>} : vector<16x4xf32>, vector<4x128xf32>, vector<16x128xf32> -> vector<16x128xf32>
    %169 = arith.addf %165, %168 : vector<16x128xf32>
    %c0_168 = arith.constant 0 : index
    %c0_169 = arith.constant 0 : index
    %170 = vector.load %arg7[%c0_168, %c0_169] : memref<1x128xf32, #tpu.memory_space<vmem>>, vector<1x128xf32>
    %171 = vector.broadcast %170 : vector<1x128xf32> to vector<16x128xf32>
    %172 = arith.addf %169, %171 : vector<16x128xf32>
    %c0_170 = arith.constant 0 : index
    %c0_171 = arith.constant 0 : index
    %173 = vector.load %arg8[%c0_170, %c0_171] : memref<128x384xf32, #tpu.memory_space<vmem>>, vector<128x384xf32>
    %cst_172 = arith.constant dense<0.000000e+00> : vector<16x384xf32>
    %174 = tpu.matmul %172, %173, %cst_172 {dimension_numbers = #tpu.dot_dimension_numbers<[1], [0], [0], [1], [0, 0, 1, 1], [], []>} : vector<16x128xf32>, vector<128x384xf32>, vector<16x384xf32> -> vector<16x384xf32>
    %c0_173 = arith.constant 0 : index
    %c0_174 = arith.constant 0 : index
    %175 = vector.load %arg9[%c0_173, %c0_174] : memref<1x384xf32, #tpu.memory_space<vmem>>, vector<1x384xf32>
    %176 = vector.broadcast %175 : vector<1x384xf32> to vector<16x384xf32>
    %177 = arith.addf %174, %176 : vector<16x384xf32>
    %c0_175 = arith.constant 0 : index
    %c0_176 = arith.constant 0 : index
    %178 = vector.load %arg2[%c0_175, %c0_176] : memref<2x128xf32, #tpu.memory_space<vmem>>, vector<2x128xf32>
    %179 = vector.extract_strided_slice %177 {offsets = [0, 0], sizes = [2, 384], strides = [1, 1]} : vector<16x384xf32> to vector<2x384xf32>
    %c0_177 = arith.constant 0 : index
    %c0_178 = arith.constant 0 : index
    %180 = vector.load %arg10[%c0_177, %c0_178] : memref<128x384xf32, #tpu.memory_space<vmem>>, vector<128x384xf32>
    %cst_179 = arith.constant dense<0.000000e+00> : vector<2x384xf32>
    %181 = tpu.matmul %178, %180, %cst_179 {dimension_numbers = #tpu.dot_dimension_numbers<[1], [0], [0], [1], [0, 0, 1, 1], [], []>} : vector<2x128xf32>, vector<128x384xf32>, vector<2x384xf32> -> vector<2x384xf32>
    %c0_180 = arith.constant 0 : index
    %c0_181 = arith.constant 0 : index
    %182 = vector.load %arg11[%c0_180, %c0_181] : memref<1x384xf32, #tpu.memory_space<vmem>>, vector<1x384xf32>
    %183 = vector.broadcast %182 : vector<1x384xf32> to vector<2x384xf32>
    %184 = arith.addf %181, %183 : vector<2x384xf32>
    %185 = vector.extract_strided_slice %179 {offsets = [0, 0], sizes = [2, 128], strides = [1, 1]} : vector<2x384xf32> to vector<2x128xf32>
    %186 = vector.extract_strided_slice %184 {offsets = [0, 0], sizes = [2, 128], strides = [1, 1]} : vector<2x384xf32> to vector<2x128xf32>
    %187 = arith.addf %185, %186 : vector<2x128xf32>
    %188 = arith.negf %187 : vector<2x128xf32>
    %189 = math.exp %188 : vector<2x128xf32>
    %cst_182 = arith.constant 1.000000e+00 : f32
    %190 = vector.broadcast %cst_182 : f32 to vector<2x128xf32>
    %191 = arith.addf %190, %189 : vector<2x128xf32>
    %192 = arith.divf %190, %191 : vector<2x128xf32>
    %193 = vector.extract_strided_slice %179 {offsets = [0, 128], sizes = [2, 128], strides = [1, 1]} : vector<2x384xf32> to vector<2x128xf32>
    %194 = vector.extract_strided_slice %184 {offsets = [0, 128], sizes = [2, 128], strides = [1, 1]} : vector<2x384xf32> to vector<2x128xf32>
    %195 = arith.addf %193, %194 : vector<2x128xf32>
    %196 = arith.negf %195 : vector<2x128xf32>
    %197 = math.exp %196 : vector<2x128xf32>
    %cst_183 = arith.constant 1.000000e+00 : f32
    %198 = vector.broadcast %cst_183 : f32 to vector<2x128xf32>
    %199 = arith.addf %198, %197 : vector<2x128xf32>
    %200 = arith.divf %198, %199 : vector<2x128xf32>
    %201 = vector.extract_strided_slice %179 {offsets = [0, 256], sizes = [2, 128], strides = [1, 1]} : vector<2x384xf32> to vector<2x128xf32>
    %202 = vector.extract_strided_slice %184 {offsets = [0, 256], sizes = [2, 128], strides = [1, 1]} : vector<2x384xf32> to vector<2x128xf32>
    %203 = arith.mulf %192, %202 : vector<2x128xf32>
    %204 = arith.addf %201, %203 : vector<2x128xf32>
    %205 = math.tanh %204 : vector<2x128xf32>
    %cst_184 = arith.constant 1.000000e+00 : f32
    %206 = vector.broadcast %cst_184 : f32 to vector<2x128xf32>
    %207 = arith.subf %206, %200 : vector<2x128xf32>
    %208 = arith.mulf %207, %205 : vector<2x128xf32>
    %209 = arith.mulf %200, %178 : vector<2x128xf32>
    %210 = arith.addf %208, %209 : vector<2x128xf32>
    %c0_185 = arith.constant 0 : index
    %c0_186 = arith.constant 0 : index
    %211 = vector.load %arg17[%c0_185, %c0_186] : memref<16x128xf32, #tpu.memory_space<vmem>>, vector<2x128xf32>
    tpu.vector_store %arg17[%c0_185, %c0_186], %210 {strides = array<i32>} : memref<16x128xf32, #tpu.memory_space<vmem>>, vector<2x128xf32>,
    %212 = vector.extract_strided_slice %177 {offsets = [2, 0], sizes = [2, 384], strides = [1, 1]} : vector<16x384xf32> to vector<2x384xf32>
    %c0_187 = arith.constant 0 : index
    %c0_188 = arith.constant 0 : index
    %213 = vector.load %arg10[%c0_187, %c0_188] : memref<128x384xf32, #tpu.memory_space<vmem>>, vector<128x384xf32>
    %cst_189 = arith.constant dense<0.000000e+00> : vector<2x384xf32>
    %214 = tpu.matmul %210, %213, %cst_189 {dimension_numbers = #tpu.dot_dimension_numbers<[1], [0], [0], [1], [0, 0, 1, 1], [], []>} : vector<2x128xf32>, vector<128x384xf32>, vector<2x384xf32> -> vector<2x384xf32>
    %c0_190 = arith.constant 0 : index
    %c0_191 = arith.constant 0 : index
    %215 = vector.load %arg11[%c0_190, %c0_191] : memref<1x384xf32, #tpu.memory_space<vmem>>, vector<1x384xf32>
    %216 = vector.broadcast %215 : vector<1x384xf32> to vector<2x384xf32>
    %217 = arith.addf %214, %216 : vector<2x384xf32>
    %218 = vector.extract_strided_slice %212 {offsets = [0, 0], sizes = [2, 128], strides = [1, 1]} : vector<2x384xf32> to vector<2x128xf32>
    %219 = vector.extract_strided_slice %217 {offsets = [0, 0], sizes = [2, 128], strides = [1, 1]} : vector<2x384xf32> to vector<2x128xf32>
    %220 = arith.addf %218, %219 : vector<2x128xf32>
    %221 = arith.negf %220 : vector<2x128xf32>
    %222 = math.exp %221 : vector<2x128xf32>
    %cst_192 = arith.constant 1.000000e+00 : f32
    %223 = vector.broadcast %cst_192 : f32 to vector<2x128xf32>
    %224 = arith.addf %223, %222 : vector<2x128xf32>
    %225 = arith.divf %223, %224 : vector<2x128xf32>
    %226 = vector.extract_strided_slice %212 {offsets = [0, 128], sizes = [2, 128], strides = [1, 1]} : vector<2x384xf32> to vector<2x128xf32>
    %227 = vector.extract_strided_slice %217 {offsets = [0, 128], sizes = [2, 128], strides = [1, 1]} : vector<2x384xf32> to vector<2x128xf32>
    %228 = arith.addf %226, %227 : vector<2x128xf32>
    %229 = arith.negf %228 : vector<2x128xf32>
    %230 = math.exp %229 : vector<2x128xf32>
    %cst_193 = arith.constant 1.000000e+00 : f32
    %231 = vector.broadcast %cst_193 : f32 to vector<2x128xf32>
    %232 = arith.addf %231, %230 : vector<2x128xf32>
    %233 = arith.divf %231, %232 : vector<2x128xf32>
    %234 = vector.extract_strided_slice %212 {offsets = [0, 256], sizes = [2, 128], strides = [1, 1]} : vector<2x384xf32> to vector<2x128xf32>
    %235 = vector.extract_strided_slice %217 {offsets = [0, 256], sizes = [2, 128], strides = [1, 1]} : vector<2x384xf32> to vector<2x128xf32>
    %236 = arith.mulf %225, %235 : vector<2x128xf32>
    %237 = arith.addf %234, %236 : vector<2x128xf32>
    %238 = math.tanh %237 : vector<2x128xf32>
    %cst_194 = arith.constant 1.000000e+00 : f32
    %239 = vector.broadcast %cst_194 : f32 to vector<2x128xf32>
    %240 = arith.subf %239, %233 : vector<2x128xf32>
    %241 = arith.mulf %240, %238 : vector<2x128xf32>
    %242 = arith.mulf %233, %210 : vector<2x128xf32>
    %243 = arith.addf %241, %242 : vector<2x128xf32>
    %c2_195 = arith.constant 2 : index
    %c0_196 = arith.constant 0 : index
    %244 = vector.load %arg17[%c2_195, %c0_196] : memref<16x128xf32, #tpu.memory_space<vmem>>, vector<2x128xf32>
    tpu.vector_store %arg17[%c2_195, %c0_196], %243 {strides = array<i32>} : memref<16x128xf32, #tpu.memory_space<vmem>>, vector<2x128xf32>,
    %245 = vector.extract_strided_slice %177 {offsets = [4, 0], sizes = [2, 384], strides = [1, 1]} : vector<16x384xf32> to vector<2x384xf32>
    %c0_197 = arith.constant 0 : index
    %c0_198 = arith.constant 0 : index
    %246 = vector.load %arg10[%c0_197, %c0_198] : memref<128x384xf32, #tpu.memory_space<vmem>>, vector<128x384xf32>
    %cst_199 = arith.constant dense<0.000000e+00> : vector<2x384xf32>
    %247 = tpu.matmul %243, %246, %cst_199 {dimension_numbers = #tpu.dot_dimension_numbers<[1], [0], [0], [1], [0, 0, 1, 1], [], []>} : vector<2x128xf32>, vector<128x384xf32>, vector<2x384xf32> -> vector<2x384xf32>
    %c0_200 = arith.constant 0 : index
    %c0_201 = arith.constant 0 : index
    %248 = vector.load %arg11[%c0_200, %c0_201] : memref<1x384xf32, #tpu.memory_space<vmem>>, vector<1x384xf32>
    %249 = vector.broadcast %248 : vector<1x384xf32> to vector<2x384xf32>
    %250 = arith.addf %247, %249 : vector<2x384xf32>
    %251 = vector.extract_strided_slice %245 {offsets = [0, 0], sizes = [2, 128], strides = [1, 1]} : vector<2x384xf32> to vector<2x128xf32>
    %252 = vector.extract_strided_slice %250 {offsets = [0, 0], sizes = [2, 128], strides = [1, 1]} : vector<2x384xf32> to vector<2x128xf32>
    %253 = arith.addf %251, %252 : vector<2x128xf32>
    %254 = arith.negf %253 : vector<2x128xf32>
    %255 = math.exp %254 : vector<2x128xf32>
    %cst_202 = arith.constant 1.000000e+00 : f32
    %256 = vector.broadcast %cst_202 : f32 to vector<2x128xf32>
    %257 = arith.addf %256, %255 : vector<2x128xf32>
    %258 = arith.divf %256, %257 : vector<2x128xf32>
    %259 = vector.extract_strided_slice %245 {offsets = [0, 128], sizes = [2, 128], strides = [1, 1]} : vector<2x384xf32> to vector<2x128xf32>
    %260 = vector.extract_strided_slice %250 {offsets = [0, 128], sizes = [2, 128], strides = [1, 1]} : vector<2x384xf32> to vector<2x128xf32>
    %261 = arith.addf %259, %260 : vector<2x128xf32>
    %262 = arith.negf %261 : vector<2x128xf32>
    %263 = math.exp %262 : vector<2x128xf32>
    %cst_203 = arith.constant 1.000000e+00 : f32
    %264 = vector.broadcast %cst_203 : f32 to vector<2x128xf32>
    %265 = arith.addf %264, %263 : vector<2x128xf32>
    %266 = arith.divf %264, %265 : vector<2x128xf32>
    %267 = vector.extract_strided_slice %245 {offsets = [0, 256], sizes = [2, 128], strides = [1, 1]} : vector<2x384xf32> to vector<2x128xf32>
    %268 = vector.extract_strided_slice %250 {offsets = [0, 256], sizes = [2, 128], strides = [1, 1]} : vector<2x384xf32> to vector<2x128xf32>
    %269 = arith.mulf %258, %268 : vector<2x128xf32>
    %270 = arith.addf %267, %269 : vector<2x128xf32>
    %271 = math.tanh %270 : vector<2x128xf32>
    %cst_204 = arith.constant 1.000000e+00 : f32
    %272 = vector.broadcast %cst_204 : f32 to vector<2x128xf32>
    %273 = arith.subf %272, %266 : vector<2x128xf32>
    %274 = arith.mulf %273, %271 : vector<2x128xf32>
    %275 = arith.mulf %266, %243 : vector<2x128xf32>
    %276 = arith.addf %274, %275 : vector<2x128xf32>
    %c4_205 = arith.constant 4 : index
    %c0_206 = arith.constant 0 : index
    %277 = vector.load %arg17[%c4_205, %c0_206] : memref<16x128xf32, #tpu.memory_space<vmem>>, vector<2x128xf32>
    tpu.vector_store %arg17[%c4_205, %c0_206], %276 {strides = array<i32>} : memref<16x128xf32, #tpu.memory_space<vmem>>, vector<2x128xf32>,
    %278 = vector.extract_strided_slice %177 {offsets = [6, 0], sizes = [2, 384], strides = [1, 1]} : vector<16x384xf32> to vector<2x384xf32>
    %c0_207 = arith.constant 0 : index
    %c0_208 = arith.constant 0 : index
    %279 = vector.load %arg10[%c0_207, %c0_208] : memref<128x384xf32, #tpu.memory_space<vmem>>, vector<128x384xf32>
    %cst_209 = arith.constant dense<0.000000e+00> : vector<2x384xf32>
    %280 = tpu.matmul %276, %279, %cst_209 {dimension_numbers = #tpu.dot_dimension_numbers<[1], [0], [0], [1], [0, 0, 1, 1], [], []>} : vector<2x128xf32>, vector<128x384xf32>, vector<2x384xf32> -> vector<2x384xf32>
    %c0_210 = arith.constant 0 : index
    %c0_211 = arith.constant 0 : index
    %281 = vector.load %arg11[%c0_210, %c0_211] : memref<1x384xf32, #tpu.memory_space<vmem>>, vector<1x384xf32>
    %282 = vector.broadcast %281 : vector<1x384xf32> to vector<2x384xf32>
    %283 = arith.addf %280, %282 : vector<2x384xf32>
    %284 = vector.extract_strided_slice %278 {offsets = [0, 0], sizes = [2, 128], strides = [1, 1]} : vector<2x384xf32> to vector<2x128xf32>
    %285 = vector.extract_strided_slice %283 {offsets = [0, 0], sizes = [2, 128], strides = [1, 1]} : vector<2x384xf32> to vector<2x128xf32>
    %286 = arith.addf %284, %285 : vector<2x128xf32>
    %287 = arith.negf %286 : vector<2x128xf32>
    %288 = math.exp %287 : vector<2x128xf32>
    %cst_212 = arith.constant 1.000000e+00 : f32
    %289 = vector.broadcast %cst_212 : f32 to vector<2x128xf32>
    %290 = arith.addf %289, %288 : vector<2x128xf32>
    %291 = arith.divf %289, %290 : vector<2x128xf32>
    %292 = vector.extract_strided_slice %278 {offsets = [0, 128], sizes = [2, 128], strides = [1, 1]} : vector<2x384xf32> to vector<2x128xf32>
    %293 = vector.extract_strided_slice %283 {offsets = [0, 128], sizes = [2, 128], strides = [1, 1]} : vector<2x384xf32> to vector<2x128xf32>
    %294 = arith.addf %292, %293 : vector<2x128xf32>
    %295 = arith.negf %294 : vector<2x128xf32>
    %296 = math.exp %295 : vector<2x128xf32>
    %cst_213 = arith.constant 1.000000e+00 : f32
    %297 = vector.broadcast %cst_213 : f32 to vector<2x128xf32>
    %298 = arith.addf %297, %296 : vector<2x128xf32>
    %299 = arith.divf %297, %298 : vector<2x128xf32>
    %300 = vector.extract_strided_slice %278 {offsets = [0, 256], sizes = [2, 128], strides = [1, 1]} : vector<2x384xf32> to vector<2x128xf32>
    %301 = vector.extract_strided_slice %283 {offsets = [0, 256], sizes = [2, 128], strides = [1, 1]} : vector<2x384xf32> to vector<2x128xf32>
    %302 = arith.mulf %291, %301 : vector<2x128xf32>
    %303 = arith.addf %300, %302 : vector<2x128xf32>
    %304 = math.tanh %303 : vector<2x128xf32>
    %cst_214 = arith.constant 1.000000e+00 : f32
    %305 = vector.broadcast %cst_214 : f32 to vector<2x128xf32>
    %306 = arith.subf %305, %299 : vector<2x128xf32>
    %307 = arith.mulf %306, %304 : vector<2x128xf32>
    %308 = arith.mulf %299, %276 : vector<2x128xf32>
    %309 = arith.addf %307, %308 : vector<2x128xf32>
    %c6_215 = arith.constant 6 : index
    %c0_216 = arith.constant 0 : index
    %310 = vector.load %arg17[%c6_215, %c0_216] : memref<16x128xf32, #tpu.memory_space<vmem>>, vector<2x128xf32>
    tpu.vector_store %arg17[%c6_215, %c0_216], %309 {strides = array<i32>} : memref<16x128xf32, #tpu.memory_space<vmem>>, vector<2x128xf32>,
    %311 = vector.extract_strided_slice %177 {offsets = [8, 0], sizes = [2, 384], strides = [1, 1]} : vector<16x384xf32> to vector<2x384xf32>
    %c0_217 = arith.constant 0 : index
    %c0_218 = arith.constant 0 : index
    %312 = vector.load %arg10[%c0_217, %c0_218] : memref<128x384xf32, #tpu.memory_space<vmem>>, vector<128x384xf32>
    %cst_219 = arith.constant dense<0.000000e+00> : vector<2x384xf32>
    %313 = tpu.matmul %309, %312, %cst_219 {dimension_numbers = #tpu.dot_dimension_numbers<[1], [0], [0], [1], [0, 0, 1, 1], [], []>} : vector<2x128xf32>, vector<128x384xf32>, vector<2x384xf32> -> vector<2x384xf32>
    %c0_220 = arith.constant 0 : index
    %c0_221 = arith.constant 0 : index
    %314 = vector.load %arg11[%c0_220, %c0_221] : memref<1x384xf32, #tpu.memory_space<vmem>>, vector<1x384xf32>
    %315 = vector.broadcast %314 : vector<1x384xf32> to vector<2x384xf32>
    %316 = arith.addf %313, %315 : vector<2x384xf32>
    %317 = vector.extract_strided_slice %311 {offsets = [0, 0], sizes = [2, 128], strides = [1, 1]} : vector<2x384xf32> to vector<2x128xf32>
    %318 = vector.extract_strided_slice %316 {offsets = [0, 0], sizes = [2, 128], strides = [1, 1]} : vector<2x384xf32> to vector<2x128xf32>
    %319 = arith.addf %317, %318 : vector<2x128xf32>
    %320 = arith.negf %319 : vector<2x128xf32>
    %321 = math.exp %320 : vector<2x128xf32>
    %cst_222 = arith.constant 1.000000e+00 : f32
    %322 = vector.broadcast %cst_222 : f32 to vector<2x128xf32>
    %323 = arith.addf %322, %321 : vector<2x128xf32>
    %324 = arith.divf %322, %323 : vector<2x128xf32>
    %325 = vector.extract_strided_slice %311 {offsets = [0, 128], sizes = [2, 128], strides = [1, 1]} : vector<2x384xf32> to vector<2x128xf32>
    %326 = vector.extract_strided_slice %316 {offsets = [0, 128], sizes = [2, 128], strides = [1, 1]} : vector<2x384xf32> to vector<2x128xf32>
    %327 = arith.addf %325, %326 : vector<2x128xf32>
    %328 = arith.negf %327 : vector<2x128xf32>
    %329 = math.exp %328 : vector<2x128xf32>
    %cst_223 = arith.constant 1.000000e+00 : f32
    %330 = vector.broadcast %cst_223 : f32 to vector<2x128xf32>
    %331 = arith.addf %330, %329 : vector<2x128xf32>
    %332 = arith.divf %330, %331 : vector<2x128xf32>
    %333 = vector.extract_strided_slice %311 {offsets = [0, 256], sizes = [2, 128], strides = [1, 1]} : vector<2x384xf32> to vector<2x128xf32>
    %334 = vector.extract_strided_slice %316 {offsets = [0, 256], sizes = [2, 128], strides = [1, 1]} : vector<2x384xf32> to vector<2x128xf32>
    %335 = arith.mulf %324, %334 : vector<2x128xf32>
    %336 = arith.addf %333, %335 : vector<2x128xf32>
    %337 = math.tanh %336 : vector<2x128xf32>
    %cst_224 = arith.constant 1.000000e+00 : f32
    %338 = vector.broadcast %cst_224 : f32 to vector<2x128xf32>
    %339 = arith.subf %338, %332 : vector<2x128xf32>
    %340 = arith.mulf %339, %337 : vector<2x128xf32>
    %341 = arith.mulf %332, %309 : vector<2x128xf32>
    %342 = arith.addf %340, %341 : vector<2x128xf32>
    %c8_225 = arith.constant 8 : index
    %c0_226 = arith.constant 0 : index
    %343 = vector.load %arg17[%c8_225, %c0_226] : memref<16x128xf32, #tpu.memory_space<vmem>>, vector<2x128xf32>
    tpu.vector_store %arg17[%c8_225, %c0_226], %342 {strides = array<i32>} : memref<16x128xf32, #tpu.memory_space<vmem>>, vector<2x128xf32>,
    %344 = vector.extract_strided_slice %177 {offsets = [10, 0], sizes = [2, 384], strides = [1, 1]} : vector<16x384xf32> to vector<2x384xf32>
    %c0_227 = arith.constant 0 : index
    %c0_228 = arith.constant 0 : index
    %345 = vector.load %arg10[%c0_227, %c0_228] : memref<128x384xf32, #tpu.memory_space<vmem>>, vector<128x384xf32>
    %cst_229 = arith.constant dense<0.000000e+00> : vector<2x384xf32>
    %346 = tpu.matmul %342, %345, %cst_229 {dimension_numbers = #tpu.dot_dimension_numbers<[1], [0], [0], [1], [0, 0, 1, 1], [], []>} : vector<2x128xf32>, vector<128x384xf32>, vector<2x384xf32> -> vector<2x384xf32>
    %c0_230 = arith.constant 0 : index
    %c0_231 = arith.constant 0 : index
    %347 = vector.load %arg11[%c0_230, %c0_231] : memref<1x384xf32, #tpu.memory_space<vmem>>, vector<1x384xf32>
    %348 = vector.broadcast %347 : vector<1x384xf32> to vector<2x384xf32>
    %349 = arith.addf %346, %348 : vector<2x384xf32>
    %350 = vector.extract_strided_slice %344 {offsets = [0, 0], sizes = [2, 128], strides = [1, 1]} : vector<2x384xf32> to vector<2x128xf32>
    %351 = vector.extract_strided_slice %349 {offsets = [0, 0], sizes = [2, 128], strides = [1, 1]} : vector<2x384xf32> to vector<2x128xf32>
    %352 = arith.addf %350, %351 : vector<2x128xf32>
    %353 = arith.negf %352 : vector<2x128xf32>
    %354 = math.exp %353 : vector<2x128xf32>
    %cst_232 = arith.constant 1.000000e+00 : f32
    %355 = vector.broadcast %cst_232 : f32 to vector<2x128xf32>
    %356 = arith.addf %355, %354 : vector<2x128xf32>
    %357 = arith.divf %355, %356 : vector<2x128xf32>
    %358 = vector.extract_strided_slice %344 {offsets = [0, 128], sizes = [2, 128], strides = [1, 1]} : vector<2x384xf32> to vector<2x128xf32>
    %359 = vector.extract_strided_slice %349 {offsets = [0, 128], sizes = [2, 128], strides = [1, 1]} : vector<2x384xf32> to vector<2x128xf32>
    %360 = arith.addf %358, %359 : vector<2x128xf32>
    %361 = arith.negf %360 : vector<2x128xf32>
    %362 = math.exp %361 : vector<2x128xf32>
    %cst_233 = arith.constant 1.000000e+00 : f32
    %363 = vector.broadcast %cst_233 : f32 to vector<2x128xf32>
    %364 = arith.addf %363, %362 : vector<2x128xf32>
    %365 = arith.divf %363, %364 : vector<2x128xf32>
    %366 = vector.extract_strided_slice %344 {offsets = [0, 256], sizes = [2, 128], strides = [1, 1]} : vector<2x384xf32> to vector<2x128xf32>
    %367 = vector.extract_strided_slice %349 {offsets = [0, 256], sizes = [2, 128], strides = [1, 1]} : vector<2x384xf32> to vector<2x128xf32>
    %368 = arith.mulf %357, %367 : vector<2x128xf32>
    %369 = arith.addf %366, %368 : vector<2x128xf32>
    %370 = math.tanh %369 : vector<2x128xf32>
    %cst_234 = arith.constant 1.000000e+00 : f32
    %371 = vector.broadcast %cst_234 : f32 to vector<2x128xf32>
    %372 = arith.subf %371, %365 : vector<2x128xf32>
    %373 = arith.mulf %372, %370 : vector<2x128xf32>
    %374 = arith.mulf %365, %342 : vector<2x128xf32>
    %375 = arith.addf %373, %374 : vector<2x128xf32>
    %c10_235 = arith.constant 10 : index
    %c0_236 = arith.constant 0 : index
    %376 = vector.load %arg17[%c10_235, %c0_236] : memref<16x128xf32, #tpu.memory_space<vmem>>, vector<2x128xf32>
    tpu.vector_store %arg17[%c10_235, %c0_236], %375 {strides = array<i32>} : memref<16x128xf32, #tpu.memory_space<vmem>>, vector<2x128xf32>,
    %377 = vector.extract_strided_slice %177 {offsets = [12, 0], sizes = [2, 384], strides = [1, 1]} : vector<16x384xf32> to vector<2x384xf32>
    %c0_237 = arith.constant 0 : index
    %c0_238 = arith.constant 0 : index
    %378 = vector.load %arg10[%c0_237, %c0_238] : memref<128x384xf32, #tpu.memory_space<vmem>>, vector<128x384xf32>
    %cst_239 = arith.constant dense<0.000000e+00> : vector<2x384xf32>
    %379 = tpu.matmul %375, %378, %cst_239 {dimension_numbers = #tpu.dot_dimension_numbers<[1], [0], [0], [1], [0, 0, 1, 1], [], []>} : vector<2x128xf32>, vector<128x384xf32>, vector<2x384xf32> -> vector<2x384xf32>
    %c0_240 = arith.constant 0 : index
    %c0_241 = arith.constant 0 : index
    %380 = vector.load %arg11[%c0_240, %c0_241] : memref<1x384xf32, #tpu.memory_space<vmem>>, vector<1x384xf32>
    %381 = vector.broadcast %380 : vector<1x384xf32> to vector<2x384xf32>
    %382 = arith.addf %379, %381 : vector<2x384xf32>
    %383 = vector.extract_strided_slice %377 {offsets = [0, 0], sizes = [2, 128], strides = [1, 1]} : vector<2x384xf32> to vector<2x128xf32>
    %384 = vector.extract_strided_slice %382 {offsets = [0, 0], sizes = [2, 128], strides = [1, 1]} : vector<2x384xf32> to vector<2x128xf32>
    %385 = arith.addf %383, %384 : vector<2x128xf32>
    %386 = arith.negf %385 : vector<2x128xf32>
    %387 = math.exp %386 : vector<2x128xf32>
    %cst_242 = arith.constant 1.000000e+00 : f32
    %388 = vector.broadcast %cst_242 : f32 to vector<2x128xf32>
    %389 = arith.addf %388, %387 : vector<2x128xf32>
    %390 = arith.divf %388, %389 : vector<2x128xf32>
    %391 = vector.extract_strided_slice %377 {offsets = [0, 128], sizes = [2, 128], strides = [1, 1]} : vector<2x384xf32> to vector<2x128xf32>
    %392 = vector.extract_strided_slice %382 {offsets = [0, 128], sizes = [2, 128], strides = [1, 1]} : vector<2x384xf32> to vector<2x128xf32>
    %393 = arith.addf %391, %392 : vector<2x128xf32>
    %394 = arith.negf %393 : vector<2x128xf32>
    %395 = math.exp %394 : vector<2x128xf32>
    %cst_243 = arith.constant 1.000000e+00 : f32
    %396 = vector.broadcast %cst_243 : f32 to vector<2x128xf32>
    %397 = arith.addf %396, %395 : vector<2x128xf32>
    %398 = arith.divf %396, %397 : vector<2x128xf32>
    %399 = vector.extract_strided_slice %377 {offsets = [0, 256], sizes = [2, 128], strides = [1, 1]} : vector<2x384xf32> to vector<2x128xf32>
    %400 = vector.extract_strided_slice %382 {offsets = [0, 256], sizes = [2, 128], strides = [1, 1]} : vector<2x384xf32> to vector<2x128xf32>
    %401 = arith.mulf %390, %400 : vector<2x128xf32>
    %402 = arith.addf %399, %401 : vector<2x128xf32>
    %403 = math.tanh %402 : vector<2x128xf32>
    %cst_244 = arith.constant 1.000000e+00 : f32
    %404 = vector.broadcast %cst_244 : f32 to vector<2x128xf32>
    %405 = arith.subf %404, %398 : vector<2x128xf32>
    %406 = arith.mulf %405, %403 : vector<2x128xf32>
    %407 = arith.mulf %398, %375 : vector<2x128xf32>
    %408 = arith.addf %406, %407 : vector<2x128xf32>
    %c12_245 = arith.constant 12 : index
    %c0_246 = arith.constant 0 : index
    %409 = vector.load %arg17[%c12_245, %c0_246] : memref<16x128xf32, #tpu.memory_space<vmem>>, vector<2x128xf32>
    tpu.vector_store %arg17[%c12_245, %c0_246], %408 {strides = array<i32>} : memref<16x128xf32, #tpu.memory_space<vmem>>, vector<2x128xf32>,
    %410 = vector.extract_strided_slice %177 {offsets = [14, 0], sizes = [2, 384], strides = [1, 1]} : vector<16x384xf32> to vector<2x384xf32>
    %c0_247 = arith.constant 0 : index
    %c0_248 = arith.constant 0 : index
    %411 = vector.load %arg10[%c0_247, %c0_248] : memref<128x384xf32, #tpu.memory_space<vmem>>, vector<128x384xf32>
    %cst_249 = arith.constant dense<0.000000e+00> : vector<2x384xf32>
    %412 = tpu.matmul %408, %411, %cst_249 {dimension_numbers = #tpu.dot_dimension_numbers<[1], [0], [0], [1], [0, 0, 1, 1], [], []>} : vector<2x128xf32>, vector<128x384xf32>, vector<2x384xf32> -> vector<2x384xf32>
    %c0_250 = arith.constant 0 : index
    %c0_251 = arith.constant 0 : index
    %413 = vector.load %arg11[%c0_250, %c0_251] : memref<1x384xf32, #tpu.memory_space<vmem>>, vector<1x384xf32>
    %414 = vector.broadcast %413 : vector<1x384xf32> to vector<2x384xf32>
    %415 = arith.addf %412, %414 : vector<2x384xf32>
    %416 = vector.extract_strided_slice %410 {offsets = [0, 0], sizes = [2, 128], strides = [1, 1]} : vector<2x384xf32> to vector<2x128xf32>
    %417 = vector.extract_strided_slice %415 {offsets = [0, 0], sizes = [2, 128], strides = [1, 1]} : vector<2x384xf32> to vector<2x128xf32>
    %418 = arith.addf %416, %417 : vector<2x128xf32>
    %419 = arith.negf %418 : vector<2x128xf32>
    %420 = math.exp %419 : vector<2x128xf32>
    %cst_252 = arith.constant 1.000000e+00 : f32
    %421 = vector.broadcast %cst_252 : f32 to vector<2x128xf32>
    %422 = arith.addf %421, %420 : vector<2x128xf32>
    %423 = arith.divf %421, %422 : vector<2x128xf32>
    %424 = vector.extract_strided_slice %410 {offsets = [0, 128], sizes = [2, 128], strides = [1, 1]} : vector<2x384xf32> to vector<2x128xf32>
    %425 = vector.extract_strided_slice %415 {offsets = [0, 128], sizes = [2, 128], strides = [1, 1]} : vector<2x384xf32> to vector<2x128xf32>
    %426 = arith.addf %424, %425 : vector<2x128xf32>
    %427 = arith.negf %426 : vector<2x128xf32>
    %428 = math.exp %427 : vector<2x128xf32>
    %cst_253 = arith.constant 1.000000e+00 : f32
    %429 = vector.broadcast %cst_253 : f32 to vector<2x128xf32>
    %430 = arith.addf %429, %428 : vector<2x128xf32>
    %431 = arith.divf %429, %430 : vector<2x128xf32>
    %432 = vector.extract_strided_slice %410 {offsets = [0, 256], sizes = [2, 128], strides = [1, 1]} : vector<2x384xf32> to vector<2x128xf32>
    %433 = vector.extract_strided_slice %415 {offsets = [0, 256], sizes = [2, 128], strides = [1, 1]} : vector<2x384xf32> to vector<2x128xf32>
    %434 = arith.mulf %423, %433 : vector<2x128xf32>
    %435 = arith.addf %432, %434 : vector<2x128xf32>
    %436 = math.tanh %435 : vector<2x128xf32>
    %cst_254 = arith.constant 1.000000e+00 : f32
    %437 = vector.broadcast %cst_254 : f32 to vector<2x128xf32>
    %438 = arith.subf %437, %431 : vector<2x128xf32>
    %439 = arith.mulf %438, %436 : vector<2x128xf32>
    %440 = arith.mulf %431, %408 : vector<2x128xf32>
    %441 = arith.addf %439, %440 : vector<2x128xf32>
    %c14_255 = arith.constant 14 : index
    %c0_256 = arith.constant 0 : index
    %442 = vector.load %arg17[%c14_255, %c0_256] : memref<16x128xf32, #tpu.memory_space<vmem>>, vector<2x128xf32>
    tpu.vector_store %arg17[%c14_255, %c0_256], %441 {strides = array<i32>} : memref<16x128xf32, #tpu.memory_space<vmem>>, vector<2x128xf32>,
    %c0_257 = arith.constant 0 : index
    %c0_258 = arith.constant 0 : index
    %443 = vector.load %arg16[%c0_257, %c0_258] : memref<2x128xf32, #tpu.memory_space<vmem>>, vector<2x128xf32>
    tpu.vector_store %arg16[%c0_257, %c0_258], %441 {strides = array<i32>} : memref<2x128xf32, #tpu.memory_space<vmem>>, vector<2x128xf32>,
    %c0_259 = arith.constant 0 : index
    %c0_260 = arith.constant 0 : index
    %444 = vector.load %arg17[%c0_259, %c0_260] : memref<16x128xf32, #tpu.memory_space<vmem>>, vector<16x128xf32>
    %c0_261 = arith.constant 0 : index
    %c0_262 = arith.constant 0 : index
    %445 = vector.load %arg12[%c0_261, %c0_262] : memref<128x128xf32, #tpu.memory_space<vmem>>, vector<128x128xf32>
    %cst_263 = arith.constant dense<0.000000e+00> : vector<16x128xf32>
    %446 = tpu.matmul %444, %445, %cst_263 {dimension_numbers = #tpu.dot_dimension_numbers<[1], [0], [0], [1], [0, 0, 1, 1], [], []>} : vector<16x128xf32>, vector<128x128xf32>, vector<16x128xf32> -> vector<16x128xf32>
    %c0_264 = arith.constant 0 : index
    %c0_265 = arith.constant 0 : index
    %447 = vector.load %arg13[%c0_264, %c0_265] : memref<1x128xf32, #tpu.memory_space<vmem>>, vector<1x128xf32>
    %448 = vector.broadcast %447 : vector<1x128xf32> to vector<16x128xf32>
    %449 = arith.addf %446, %448 : vector<16x128xf32>
    %cst_266 = arith.constant dense<0xFF800000> : vector<16xf32>
    %450 = vector.multi_reduction <maximumf>, %449, %cst_266 [1] : vector<16x128xf32> to vector<16xf32>
    %451 = vector.shape_cast %450 : vector<16xf32> to vector<16x1xf32>
    %452 = vector.broadcast %451 : vector<16x1xf32> to vector<16x128xf32>
    %453 = arith.subf %449, %452 : vector<16x128xf32>
    %454 = math.exp %453 : vector<16x128xf32>
    %cst_267 = arith.constant dense<0.000000e+00> : vector<16xf32>
    %455 = vector.multi_reduction <add>, %454, %cst_267 [1] : vector<16x128xf32> to vector<16xf32>
    %456 = vector.shape_cast %455 : vector<16xf32> to vector<16x1xf32>
    %457 = vector.broadcast %456 : vector<16x1xf32> to vector<16x128xf32>
    %458 = arith.divf %454, %457 : vector<16x128xf32>
    %c0_268 = arith.constant 0 : index
    %c0_269 = arith.constant 0 : index
    %459 = vector.load %arg14[%c0_268, %c0_269] : memref<16x128xf32, #tpu.memory_space<vmem>>, vector<16x128xf32>
    tpu.vector_store %arg14[%c0_268, %c0_269], %458 {strides = array<i32>} : memref<16x128xf32, #tpu.memory_space<vmem>>, vector<16x128xf32>,
    %460 = tpu.iota {dimensions = array<i32: 1>} : vector<16x128xi32>
    %461 = vector.broadcast %451 : vector<16x1xf32> to vector<16x128xf32>
    %462 = arith.cmpf oeq, %449, %461 : vector<16x128xf32>
    %c128_i32 = arith.constant 128 : i32
    %463 = vector.broadcast %c128_i32 : i32 to vector<16x128xi32>
    %464 = arith.select %462, %460, %463 : vector<16x128xi1>, vector<16x128xi32>
    %cst_270 = arith.constant dense<2147483647> : vector<16xi32>
    %465 = vector.multi_reduction <minsi>, %464, %cst_270 [1] : vector<16x128xi32> to vector<16xi32>
    %466 = vector.shape_cast %465 : vector<16xi32> to vector<16x1xi32>
    %c0_271 = arith.constant 0 : index
    %c0_272 = arith.constant 0 : index
    %467 = vector.load %arg15[%c0_271, %c0_272] : memref<16x1xi32, #tpu.memory_space<vmem>>, vector<16x1xi32>
    tpu.vector_store %arg15[%c0_271, %c0_272], %466 {strides = array<i32>} : memref<16x1xi32, #tpu.memory_space<vmem>>, vector<16x1xi32>,
    return
  }
}

</mosaic_0001>

<bundles_post_ra>
// kernel: tpu_custom_call.1
= control target key start
LH: loop header
LB: loop body
LE: loop exit
PB: predicated region body
PF: predicated region fallthrough
CT: control target
= control target key end

     0   :  { %s8376_s0 = inlined_call_operand.vmem [shape: f32[16,16,4], index: 0, kind: input, shape index: {}]   ;;  %s8377_s1 = inlined_call_operand.vmem [shape: f32[16,4], index: 1, kind: input, shape index: {}]   ;;  %s8378_s2 = inlined_call_operand.vmem [shape: f32[2,128], index: 2, kind: input, shape index: {}]   ;;  %s8379_s3 = inlined_call_operand.vmem [shape: f32[4,32], index: 3, kind: input, shape index: {}]   ;;  %s8380_s4 = inlined_call_operand.hbm [shape: f32[16,32,128], index: 4, kind: input, shape index: {}]   ;;  %s8381_s5 = inlined_call_operand.vmem [shape: f32[1,128], index: 5, kind: input, shape index: {}]   ;;  %s8382_s6 = inlined_call_operand.vmem [shape: f32[4,128], index: 6, kind: input, shape index: {}]   ;;  %s8383_s7 = inlined_call_operand.vmem [shape: f32[1,128], index: 7, kind: input, shape index: {}]   ;;  %s8384_s8 = inlined_call_operand.hbm [shape: f32[128,384], index: 8, kind: input, shape index: {}]   ;;  %s8385_s9 = inlined_call_operand.vmem [shape: f32[1,384], index: 9, kind: input, shape index: {}]   ;;  %s8386_s10 = inlined_call_operand.hbm [shape: f32[128,384], index: 10, kind: input, shape index: {}]   ;;  %s8387_s11 = inlined_call_operand.vmem [shape: f32[1,384], index: 11, kind: input, shape index: {}]   ;;  %s8388_s12 = inlined_call_operand.vmem [shape: f32[128,128], index: 12, kind: input, shape index: {}]   ;;  %s8389_s13 = inlined_call_operand.vmem [shape: f32[1,128], index: 13, kind: input, shape index: {}]   ;;  %s8390_s14 = inlined_call_operand.hbm [shape: f32[16,128], index: 14, kind: output, shape index: {0}]   ;;  %s8391_s15 = inlined_call_operand.vmem [shape: s32[16,1], index: 15, kind: output, shape index: {1}]   ;;  %s8392_s16 = inlined_call_operand.hbm [shape: f32[2,128], index: 16, kind: output, shape index: {2}]  }
   0x1   :  { %8395 = sst [smem:[#allocation16_spill]] %s8376_s0 }
   0x2   :  { %22 = vsyncpa [#allocation4], 0 }
   0x3   :  { %23 = vsyncpa [#allocation7], 0 }
   0x4   :  { %24 = vsyncpa [#allocation5], 0 }
   0x5   :  { %25 = vsyncpa [#allocation11], 0  ;;  %s7288_s21 = smov [#allocation6]   ;;  %s7170_s25 = scalar_lea.hbm %s8384_s8, 6144 }
   0x6   :  { %s57_s22 = sshll.u32 %s7288_s21, 4  ;;  %p7171_p0 = scmp.ne.s32.totalorder %s8384_s8, %s7170_s25  ;;  %s58_s22 = int_to_ptr.vmem [resolvable:$true] %s57_s22 }
   0x7   :  { %p7174_p1 = scmp.lt.u32.totalorder %s7170_s25, %s8384_s8 }
   0x9   :  { %p7176_p2 = pnand %p7174_p1, %p7171_p0 }
   0xb   :  { %7179 = shalt.err (!%p7176_p2)
}
   0xc   :  { %s7180_s30 = scalar_lea.vmem %s58_s22, 6144  ;;  %p7185_p4 = scmp.lt.s32.totalorder %s58_s22, %s58_s22 }
   0xd   :  { %p7181_p3 = scmp.ne.s32.totalorder %s58_s22, %s7180_s30  ;;  %p7186_p5 = scmp.lt.s32.totalorder %s7180_s30, %s7180_s30 }
   0xf   :  { %p7187_p6 = por %p7186_p5, %p7185_p4 }
  0x11   :  { %p7188_p7 = pnand %p7187_p6, %p7181_p3 }
  0x13   :  { %7191 = shalt.err (!%p7188_p7)
}
  0x14   :  { %s8394_s0 = smov 384   ;;  %s7290_s17 = smov 24  }
  0x15   :  { %63 = dma.hbm_to_vmem [thread:$0]  %s8384_s8, 6144, %s58_s22, [#allocation7], %s8394_s0, %s8394_s0, %s7290_s17  }
  0x16   :  { %s7291_s20 = smov [#allocation3]   ;;  %s7192_s25 = scalar_lea.hbm %s8380_s4, 8192 }
  0x17   :  { %s39_s21 = sshll.u32 %s7291_s20, 4  ;;  %p7193_p8 = scmp.ne.s32.totalorder %s8380_s4, %s7192_s25  ;;  %s40_s21 = int_to_ptr.vmem [resolvable:$true] %s39_s21 }
  0x18   :  { %p7196_p9 = scmp.lt.u32.totalorder %s7192_s25, %s8380_s4 }
  0x1a   :  { %p7198_p10 = pnand %p7196_p9, %p7193_p8 }
  0x1c   :  { %7201 = shalt.err (!%p7198_p10)
}
  0x1d   :  { %s7202_s30 = scalar_lea.vmem %s40_s21, 8192  ;;  %p7207_p12 = scmp.lt.s32.totalorder %s40_s21, %s40_s21 }
  0x1e   :  { %p7203_p11 = scmp.ne.s32.totalorder %s40_s21, %s7202_s30  ;;  %p7208_p13 = scmp.lt.s32.totalorder %s7202_s30, %s7202_s30 }
  0x20   :  { %p7209_p0 = por %p7208_p13, %p7207_p12 }
  0x22   :  { %p7210_p1 = pnand %p7209_p0, %p7203_p11 }
  0x24   :  { %7213 = shalt.err (!%p7210_p1)
}
  0x25   :  { %s7292_s8 = smov 128   ;;  %s7293_s22 = smov 8  }
  0x26   :  { %45 = dma.hbm_to_vmem [thread:$0]  %s8380_s4, 8192, %s40_s21, [#allocation4], %s7292_s8, %s7292_s8, %s7293_s22  }
  0x27   :  { %s7294_s20 = smov [#allocation8]   ;;  %s7214_s26 = scalar_lea.hbm %s8386_s10, 6144 }
  0x28   :  { %s71_s23 = sshll.u32 %s7294_s20, 4  ;;  %p7215_p2 = scmp.ne.s32.totalorder %s8386_s10, %s7214_s26  ;;  %s72_s23 = int_to_ptr.vmem [resolvable:$true] %s71_s23 }
  0x29   :  { %p7218_p3 = scmp.lt.u32.totalorder %s7214_s26, %s8386_s10 }
  0x2b   :  { %p7220_p4 = pnand %p7218_p3, %p7215_p2 }
  0x2d   :  { %7223 = shalt.err (!%p7220_p4)
}
  0x2e   :  { %s7224_s0 = scalar_lea.vmem %s72_s23, 6144  ;;  %p7229_p6 = scmp.lt.s32.totalorder %s72_s23, %s72_s23 }
  0x2f   :  { %p7225_p5 = scmp.ne.s32.totalorder %s72_s23, %s7224_s0  ;;  %p7230_p7 = scmp.lt.s32.totalorder %s7224_s0, %s7224_s0 }
  0x31   :  { %p7231_p8 = por %p7230_p7, %p7229_p6 }
  0x33   :  { %p7232_p9 = pnand %p7231_p8, %p7225_p5 }
  0x35   :  { %7235 = shalt.err (!%p7232_p9)
}
  0x36   :  { %s8396_s4 = smov 384  }
  0x37   :  { %77 = dma.hbm_to_vmem [thread:$0]  %s8386_s10, 6144, %s72_s23, [#allocation7], %s8396_s4, %s8396_s4, %s7290_s17  }
  0x38   :  { %7280 = dma.done.wait [#allocation4], 8192  }
  0x39   :  { %7281 = vsyncadd [#allocation4], 4294959104 }
  0x3a   :  { %7282 = dma.done.wait [#allocation7], 12288  }
  0x3b   :  { %7283 = vsyncadd [#allocation7], 4294955008  ;;  %vm103_vm0 = vcmask 1043456   ;;  %vm96_vm1 = vcmask 31744   ;;  %v7433_v0 = vld [vmem:[%s8379_s3] sm:$0xf] }
  0x3c   :  { %s8397_s25 = sld [smem:[#allocation16_spill]]  ;;  %5757 = vmatprep.subr.msk.mxu0 %vm103_vm0, %v7433_v0  ;;  %5821 = vmatprep.subr.msk.mxu1 %vm103_vm0, %v7433_v0  ;;  %v275_v5 = vld [vmem:[#allocation3 + $0x20] sm:$0xff]  ;;  %v276_v6 = vld [vmem:[#allocation3 + $0x28] sm:$0xff]  ;;  %v277_v8 = vld [vmem:[#allocation3 + $0x30] sm:$0xff]  ;;  %vm279_vm2 = vcmask 261120   ;;  %vm7297_vm3 = vmmov 0  }
  0x3d   :  { %5758 = vmatpush3.msk.msra.mxu0 %vm103_vm0, %v7433_v0  ;;  %5822 = vmatpush3.msk.msra.mxu1 %vm103_vm0, %v7433_v0  ;;  %v6368_v7 = vpack.c.bf16 %v276_v6, %v275_v5  ;;  %v278_v9 = vld [vmem:[#allocation3 + $0x38] sm:$0xff]  ;;  %v184_v11 = vld [vmem:[#allocation3] sm:$0xff]  ;;  %v185_v12 = vld [vmem:[#allocation3 + $0x8] sm:$0xff]  ;;  %s7299_s30 = smov [#allocation10]  }
  0x3e   :  { %5762 = vmatprep.subr.msk.mxu0 %vm103_vm0, %v7433_v0  ;;  %5837 = vmatprep.subr.msk.mxu1 %vm103_vm0, %v7433_v0  ;;  %v6372_v10 = vpack.c.bf16 %v278_v9, %v277_v8  ;;  %v6376_v13 = vpack.c.bf16 %v185_v12, %v184_v11  ;;  %v186_v17 = vld [vmem:[#allocation3 + $0x10] sm:$0xff]  ;;  %v187_v18 = vld [vmem:[#allocation3 + $0x18] sm:$0xff]  ;;  %v529_v24 = vld [vmem:[#allocation3 + $0x40] sm:$0xff]  ;;  %s5290_s4 = sshll.u32 %s7299_s30, 4  ;;  %s5291_s4 = int_to_ptr.vmem [resolvable:$true] %s5290_s4 }
  0x3f   :  { %v6380_v22 = vpack.c.bf16 %v187_v18, %v186_v17  ;;  %v530_v25 = vld [vmem:[#allocation3 + $0x48] sm:$0xff]  ;;  %v531_v30 = vld [vmem:[#allocation3 + $0x50] sm:$0xff]  ;;  %v532_v31 = vld [vmem:[#allocation3 + $0x58] sm:$0xff]  ;;  %s7236_s21 = scalar_lea.vmem %s5291_s4, 32  ;;  %p7241_p11 = scmp.lt.s32.totalorder %s5291_s4, %s5291_s4 }
  0x40   :  { %v6384_v28 = vpack.c.bf16 %v530_v25, %v529_v24  ;;  %v6388_v32 = vpack.c.bf16 %v532_v31, %v531_v30  ;;  %v703_v58 = vld [vmem:[#allocation3 + $0x60] sm:$0xff]  ;;  %v704_v59 = vld [vmem:[#allocation3 + $0x68] sm:$0xff]  ;;  %p7237_p10 = scmp.ne.s32.totalorder %s5291_s4, %s7236_s21  ;;  %p7242_p12 = scmp.lt.s32.totalorder %s7236_s21, %s7236_s21 }
  0x41   :  { %v877_v6 = vld [vmem:[#allocation3 + $0x80] sm:$0xff] }
  0x42   :  { %v93_v1 = vld [vmem:[%s8397_s25] sm:$0xff]  ;;  %v94_v2 = vld [vmem:[%s8397_s25 + $0x8] sm:$0xff]  ;;  %v5309_v3 = vld [vmem:[%s8397_s25 + $0x10] sm:$0xff]  ;;  %p7243_p13 = por %p7242_p12, %p7241_p11 }
  0x43   :  { %5759 = vmatprep.mubr.msk.f32.mxu0 %vm96_vm1, %v93_v1  ;;  %v5310_v4 = vld [vmem:[%s8397_s25 + $0x18] sm:$0xff]  ;;  %v5318_v27 = vld [vmem:[%s8397_s25 + $0x20] sm:$0xff]  ;;  %v5319_v29 = vld [vmem:[%s8397_s25 + $0x28] sm:$0xff]  ;;  %v6392_v1 = vpack.c.bf16 %v704_v59, %v703_v58 }
  0x44   :  { %5760 = vmatmul.mubr.msk.f32.vlgmr.msra.gmra.mrb[0].mxu0 %vm96_vm1, %v94_v2  ;;  %v5332_v33 = vld [vmem:[%s8397_s25 + $0x40] sm:$0xff]  ;;  %v5333_v34 = vld [vmem:[%s8397_s25 + $0x48] sm:$0xff]  ;;  %v5339_v35 = vld [vmem:[%s8397_s25 + $0x50] sm:$0xff]  ;;  %p7244_p0 = pnand %p7243_p13, %p7237_p10 }
  0x45   :  { %5763 = vmatpush3.msk.msra.mxu0 %vm103_vm0, %v7433_v0  ;;  %5764 = vmatprep.mubr.msk.f32.mxu0 %vm96_vm1, %v5309_v3  ;;  %v5340_v36 = vld [vmem:[%s8397_s25 + $0x58] sm:$0xff]  ;;  %v5346_v37 = vld [vmem:[%s8397_s25 + $0x60] sm:$0xff]  ;;  %v5347_v38 = vld [vmem:[%s8397_s25 + $0x68] sm:$0xff] }
  0x46   :  { %6369 = vmatprep.subr.bf16.mxu0 %v6368_v7  ;;  %5823 = vmatprep.mubr.msk.f32.mxu1 %vm96_vm1, %v5332_v33  ;;  %v5353_v39 = vld [vmem:[%s8397_s25 + $0x70] sm:$0xff]  ;;  %v5354_v40 = vld [vmem:[%s8397_s25 + $0x78] sm:$0xff]  ;;  %v5360_v41 = vld [vmem:[%s8397_s25 + $0x80] sm:$0xff] }
  0x47   :  { %5824 = vmatmul.mubr.msk.f32.vlgmr.msra.gmra.mrb[0].mxu1 %vm96_vm1, %v5333_v34  ;;  %v5361_v42 = vld [vmem:[%s8397_s25 + $0x88] sm:$0xff]  ;;  %v5367_v43 = vld [vmem:[%s8397_s25 + $0x90] sm:$0xff]  ;;  %v5368_v44 = vld [vmem:[%s8397_s25 + $0x98] sm:$0xff] }
  0x48   :  { %5765 = vmatmul.mubr.msk.f32.vlgmr.msra.gmra.mrb[2].mxu0 %vm96_vm1, %v5310_v4  ;;  %5838 = vmatpush3.msk.msra.mxu1 %vm103_vm0, %v7433_v0  ;;  %v5374_v45 = vld [vmem:[%s8397_s25 + $0xa0] sm:$0xff]  ;;  %v5375_v46 = vld [vmem:[%s8397_s25 + $0xa8] sm:$0xff]  ;;  %v5381_v47 = vld [vmem:[%s8397_s25 + $0xb0] sm:$0xff] }
  0x49   :  { %6371 = vmatpush3.bf16.msra.mxu0 %v6368_v7  ;;  %5839 = vmatprep.mubr.msk.f32.mxu1 %vm96_vm1, %v5339_v35  ;;  %v5382_v48 = vld [vmem:[%s8397_s25 + $0xb8] sm:$0xff]  ;;  %v5388_v49 = vld [vmem:[%s8397_s25 + $0xc0] sm:$0xff]  ;;  %v5389_v50 = vld [vmem:[%s8397_s25 + $0xc8] sm:$0xff] }
  0x4a   :  { %6373 = vmatprep.subr.bf16.mxu0 %v6372_v10  ;;  %5853 = vmatprep.subr.msk.mxu1 %vm103_vm0, %v7433_v0  ;;  %v5395_v51 = vld [vmem:[%s8397_s25 + $0xd0] sm:$0xff]  ;;  %v5396_v52 = vld [vmem:[%s8397_s25 + $0xd8] sm:$0xff]  ;;  %v5402_v53 = vld [vmem:[%s8397_s25 + $0xe0] sm:$0xff] }
  0x4b   :  { %5840 = vmatmul.mubr.msk.f32.vlgmr.msra.gmra.mrb[2].mxu1 %vm96_vm1, %v5340_v36  ;;  %v5403_v54 = vld [vmem:[%s8397_s25 + $0xe8] sm:$0xff]  ;;  %v5409_v55 = vld [vmem:[%s8397_s25 + $0xf0] sm:$0xff]  ;;  %v5410_v56 = vld [vmem:[%s8397_s25 + $0xf8] sm:$0xff] }
  0x4c   :  { %5854 = vmatpush3.msk.msra.mxu1 %vm103_vm0, %v7433_v0  ;;  %5855 = vmatprep.mubr.msk.f32.mxu1 %vm96_vm1, %v5346_v37  ;;  %v5325_v63 = vld [vmem:[%s8397_s25 + $0x30] sm:$0xff]  ;;  %v5326_v2 = vld [vmem:[%s8397_s25 + $0x38] sm:$0xff]  ;;  %v705_v3 = vld [vmem:[#allocation3 + $0x70] sm:$0xff] }
  0x4d   :  { %6375 = vmatpush3.bf16.msra.mxu0 %v6372_v10  ;;  %5869 = vmatprep.subr.msk.mxu1 %vm103_vm0, %v7433_v0  ;;  %v706_v4 = vld [vmem:[#allocation3 + $0x78] sm:$0xff]  ;;  %v878_v7 = vld [vmem:[#allocation3 + $0x88] sm:$0xff]  ;;  %v2889_v33 = vld [vmem:[%s8377_s1] sm:$0xff] }
  0x4e   :  { %6377 = vmatprep.subr.bf16.mxu0 %v6376_v13  ;;  %v6396_v5 = vpack.c.bf16 %v706_v4, %v705_v3  ;;  %v7633_v8 = vpack.c.bf16 %v878_v7, %v877_v6  ;;  %v2890_v34 = vld [vmem:[%s8377_s1 + $0x8] sm:$0xff]  ;;  %v2988_v35 = vld [vmem:[#allocation6 + $0x8] sm:$0xff]  ;;  %v2991_v36 = vld [vmem:[#allocation6 + $0x20] sm:$0xff] }
  0x4f   :  { %5856 = vmatmul.mubr.msk.f32.vlgmr.msra.gmra.mrb[4].mxu1 %vm96_vm1, %v5347_v38  ;;  %v2987_v37 = vld [vmem:[#allocation6] sm:$0xff]  ;;  %v6496_v38 = vpack.c.bf16 %v2991_v36, %v2988_v35  ;;  %v3012_v58 = vld [vmem:[#allocation6 + $0xc8] sm:$0xff] }
  0x50   :  { %5870 = vmatpush3.msk.msra.mxu1 %vm103_vm0, %v7433_v0  ;;  %5871 = vmatprep.mubr.msk.f32.mxu1 %vm96_vm1, %v5353_v39  ;;  %v2990_v39 = vld [vmem:[#allocation6 + $0x18] sm:$0xff]  ;;  %v3015_v59 = vld [vmem:[#allocation6 + $0xe0] sm:$0xff]  ;;  %v3020_v6 = vld [vmem:[#allocation6 + $0x108] sm:$0xff] }
  0x51   :  { %5885 = vmatprep.subr.msk.mxu1 %vm103_vm0, %v7433_v0 }
  0x53   :  { %5872 = vmatmul.mubr.msk.f32.vlgmr.msra.gmra.mrb[6].mxu1 %vm96_vm1, %v5354_v40  ;;  %v2994_v40 = vld [vmem:[#allocation6 + $0x38] sm:$0xff] }
  0x54   :  { %5886 = vmatpush3.msk.msra.mxu1 %vm103_vm0, %v7433_v0  ;;  %5887 = vmatprep.mubr.msk.f32.mxu1 %vm96_vm1, %v5360_v41  ;;  %v2997_v41 = vld [vmem:[#allocation6 + $0x50] sm:$0xff] }
  0x55   :  { %5901 = vmatprep.subr.msk.mxu1 %vm103_vm0, %v7433_v0 }
  0x57   :  { %5888 = vmatmul.mubr.msk.f32.vlgmr.msra.gmra.mrb[8].mxu1 %vm96_vm1, %v5361_v42  ;;  %v6498_v42 = vpack.c.bf16 %v2990_v39, %v2987_v37 }
  0x58   :  { %5902 = vmatpush3.msk.msra.mxu1 %vm103_vm0, %v7433_v0  ;;  %5903 = vmatprep.mubr.msk.f32.mxu1 %vm96_vm1, %v5367_v43  ;;  %v6500_v43 = vpack.c.bf16 %v2997_v41, %v2994_v40  ;;  %v1051_v40 = vld [vmem:[#allocation3 + $0xa0] sm:$0xff]  ;;  %v1052_v41 = vld [vmem:[#allocation3 + $0xa8] sm:$0xff] }
  0x59   :  { %5917 = vmatprep.subr.msk.mxu1 %vm103_vm0, %v7433_v0 }
  0x5b   :  { %5904 = vmatmul.mubr.msk.f32.vlgmr.msra.gmra.mrb[10].mxu1 %vm96_vm1, %v5368_v44  ;;  %v2993_v44 = vld [vmem:[#allocation6 + $0x30] sm:$0xff] }
  0x5c   :  { %5918 = vmatpush3.msk.msra.mxu1 %vm103_vm0, %v7433_v0  ;;  %5919 = vmatprep.mubr.msk.f32.mxu1 %vm96_vm1, %v5374_v45  ;;  %v2996_v45 = vld [vmem:[#allocation6 + $0x48] sm:$0xff] }
  0x5d   :  { %5933 = vmatprep.subr.msk.mxu1 %vm103_vm0, %v7433_v0 }
  0x5f   :  { %5920 = vmatmul.mubr.msk.f32.vlgmr.msra.gmra.mrb[12].mxu1 %vm96_vm1, %v5375_v46  ;;  %v3000_v46 = vld [vmem:[#allocation6 + $0x68] sm:$0xff] }
  0x60   :  { %5934 = vmatpush3.msk.msra.mxu1 %vm103_vm0, %v7433_v0  ;;  %5935 = vmatprep.mubr.msk.f32.mxu1 %vm96_vm1, %v5381_v47  ;;  %v3003_v47 = vld [vmem:[#allocation6 + $0x80] sm:$0xff] }
  0x61   :  { %5949 = vmatprep.subr.msk.mxu1 %vm103_vm0, %v7433_v0 }
  0x63   :  { %5936 = vmatmul.mubr.msk.f32.vlgmr.msra.gmra.mrb[14].mxu1 %vm96_vm1, %v5382_v48  ;;  %v6502_v48 = vpack.c.bf16 %v2996_v45, %v2993_v44  ;;  %v1054_v44 = vld [vmem:[#allocation3 + $0xb8] sm:$0xff] }
  0x64   :  { %5950 = vmatpush3.msk.msra.mxu1 %vm103_vm0, %v7433_v0  ;;  %5951 = vmatprep.mubr.msk.f32.mxu1 %vm96_vm1, %v5388_v49  ;;  %v6504_v49 = vpack.c.bf16 %v3003_v47, %v3000_v46  ;;  %v1225_v47 = vld [vmem:[#allocation3 + $0xc0] sm:$0xff] }
  0x65   :  { %5965 = vmatprep.subr.msk.mxu1 %vm103_vm0, %v7433_v0 }
  0x67   :  { %5952 = vmatmul.mubr.msk.f32.vlgmr.msra.gmra.mrb[16].mxu1 %vm96_vm1, %v5389_v50  ;;  %v2999_v50 = vld [vmem:[#allocation6 + $0x60] sm:$0xff] }
  0x68   :  { %5966 = vmatpush3.msk.msra.mxu1 %vm103_vm0, %v7433_v0  ;;  %5967 = vmatprep.mubr.msk.f32.mxu1 %vm96_vm1, %v5395_v51  ;;  %v3002_v51 = vld [vmem:[#allocation6 + $0x78] sm:$0xff] }
  0x69   :  { %5981 = vmatprep.subr.msk.mxu1 %vm103_vm0, %v7433_v0 }
  0x6b   :  { %5968 = vmatmul.mubr.msk.f32.vlgmr.msra.gmra.mrb[18].mxu1 %vm96_vm1, %v5396_v52  ;;  %v3006_v52 = vld [vmem:[#allocation6 + $0x98] sm:$0xff] }
  0x6c   :  { %5982 = vmatpush3.msk.msra.mxu1 %vm103_vm0, %v7433_v0  ;;  %5983 = vmatprep.mubr.msk.f32.mxu1 %vm96_vm1, %v5402_v53  ;;  %v3009_v53 = vld [vmem:[#allocation6 + $0xb0] sm:$0xff] }
  0x6d   :  { %5997 = vmatprep.subr.msk.mxu1 %vm103_vm0, %v7433_v0 }
  0x6f   :  { %5984 = vmatmul.mubr.msk.f32.vlgmr.msra.gmra.mrb[20].mxu1 %vm96_vm1, %v5403_v54  ;;  %v6506_v54 = vpack.c.bf16 %v3002_v51, %v2999_v50  ;;  %v1228_v50 = vld [vmem:[#allocation3 + $0xd8] sm:$0xff] }
  0x70   :  { %5998 = vmatpush3.msk.msra.mxu1 %vm103_vm0, %v7433_v0  ;;  %5999 = vmatprep.mubr.msk.f32.mxu1 %vm96_vm1, %v5409_v55  ;;  %v6508_v55 = vpack.c.bf16 %v3009_v53, %v3006_v52  ;;  %v1399_v52 = vld [vmem:[#allocation3 + $0xe0] sm:$0xff]  ;;  %v1400_v53 = vld [vmem:[#allocation3 + $0xe8] sm:$0xff] }
  0x73   :  { %6000 = vmatmul.mubr.msk.f32.vlgmr.msra.gmra.mrb[22].mxu1 %vm96_vm1, %v5410_v56  ;;  %v3005_v56 = vld [vmem:[#allocation6 + $0x90] sm:$0xff] }
  0x74   :  { %6015 = vmatprep.mubr.msk.f32.mxu1 %vm96_vm1, %v2889_v33  ;;  %v879_v33 = vld [vmem:[#allocation3 + $0x90] sm:$0xff] }
 0x117   :  { %v5761_v14 = vpop.f32.mrb[0].mxu0 }
 0x118   :  { %v173_v15 = vpop.f32.mrb[1].mxu0  ;;  %v183_v26 = vmax.f32 %v5761_v14, 0.0 }
 0x119   :  { %v182_v23 = vmax.f32 %v173_v15, 0.0 }
 0x11b   :  { %v5766_v16 = vpop.f32.mrb[2].mxu0 }
 0x11c   :  { %v263_v19 = vpop.f32.mrb[3].mxu0  ;;  %v273_v21 = vmax.f32 %v5766_v16, 0.0 }
 0x11d   :  { %v272_v20 = vmax.f32 %v263_v19, 0.0 }
 0x11f   :  { %5775 = vmatprep.mubr.msk.f32.mxu0 %vm279_vm2, %v272_v20 }
 0x120   :  { %5776 = vmatmul.mubr.msk.f32.vlgmr.msra.gmra.mrb[4].mxu0 %vm279_vm2, %v273_v21 }
 0x121   :  { %6379 = vmatpush3.bf16.msra.mxu0 %v6376_v13  ;;  %5786 = vmatprep.mubr.msk.f32.mxu0 %vm279_vm2, %v182_v23 }
 0x122   :  { %6381 = vmatprep.subr.bf16.mxu0 %v6380_v22 }
 0x125   :  { %6383 = vmatpush3.bf16.msra.mxu0 %v6380_v22 }
 0x126   :  { %5789 = vmatprep.subr.msk.mxu0 %vm103_vm0, %v7433_v0 }
 0x128   :  { %5787 = vmatmul.mubr.msk.f32.vlgmr.msra.gmra.mrb[4].mxu0 %vm279_vm2, %v183_v26 }
 0x129   :  { %5790 = vmatpush3.msk.msra.mxu0 %vm103_vm0, %v7433_v0  ;;  %5791 = vmatprep.mubr.msk.f32.mxu0 %vm96_vm1, %v5318_v27 }
 0x12a   :  { %6385 = vmatprep.subr.bf16.mxu0 %v6384_v28 }
 0x12c   :  { %5792 = vmatmul.mubr.msk.f32.vlgmr.msra.gmra.mrb[6].mxu0 %vm96_vm1, %v5319_v29 }
 0x12d   :  { %6387 = vmatpush3.bf16.msra.mxu0 %v6384_v28 }
 0x12e   :  { %6389 = vmatprep.subr.bf16.mxu0 %v6388_v32 }
 0x131   :  { %6391 = vmatpush3.bf16.msra.mxu0 %v6388_v32  ;;  %v2891_v32 = vld [vmem:[%s8382_s6] sm:$0xf] }
 0x132   :  { %5805 = vmatprep.subr.msk.mxu0 %vm103_vm0, %v7433_v0  ;;  %6013 = vmatprep.subr.msk.mxu1 %vm103_vm0, %v2891_v32 }
 0x133   :  { %6014 = vmatpush3.msk.msra.mxu1 %vm103_vm0, %v2891_v32 }
 0x134   :  { %6016 = vmatmul.mubr.msk.f32.vlgmr.msra.gmra.mrb[24].mxu1 %vm96_vm1, %v2890_v34  ;;  %6497 = vmatprep.subr.bf16.mxu1 %v6496_v38  ;;  %v880_v34 = vld [vmem:[#allocation3 + $0x98] sm:$0xff] }
 0x135   :  { %6499 = vmatpush1.bf16.msra.mxu1 %v6498_v42  ;;  %v6404_v39 = vpack.c.bf16 %v880_v34, %v879_v33  ;;  %v6408_v42 = vpack.c.bf16 %v1052_v41, %v1051_v40  ;;  %v1923_v34 = vld [vmem:[#allocation3 + $0x150] sm:$0xff]  ;;  %v2098_v41 = vld [vmem:[#allocation3 + $0x178] sm:$0xff] }
 0x136   :  { %6501 = vmatprep.subr.bf16.mxu1 %v6500_v43  ;;  %v1053_v43 = vld [vmem:[#allocation3 + $0xb0] sm:$0xff] }
 0x137   :  { %v6412_v46 = vpack.c.bf16 %v1054_v44, %v1053_v43  ;;  %v2097_v40 = vld [vmem:[#allocation3 + $0x170] sm:$0xff]  ;;  %v2269_v43 = vld [vmem:[#allocation3 + $0x180] sm:$0xff]  ;;  %v2270_v44 = vld [vmem:[#allocation3 + $0x188] sm:$0xff] }
 0x139   :  { %6503 = vmatpush1.bf16.msra.mxu1 %v6502_v48  ;;  %v1226_v48 = vld [vmem:[#allocation3 + $0xc8] sm:$0xff] }
 0x13a   :  { %6505 = vmatprep.subr.bf16.mxu1 %v6504_v49  ;;  %v1227_v49 = vld [vmem:[#allocation3 + $0xd0] sm:$0xff] }
 0x13d   :  { %6507 = vmatpush1.bf16.msra.mxu1 %v6506_v54  ;;  %v6424_v54 = vpack.c.bf16 %v1400_v53, %v1399_v52  ;;  %v2618_v52 = vld [vmem:[#allocation3 + $0x1c8] sm:$0xff] }
 0x13e   :  { %6509 = vmatprep.subr.bf16.mxu1 %v6508_v55  ;;  %v1401_v55 = vld [vmem:[#allocation3 + $0xf0] sm:$0xff] }
 0x1ff   :  { %v5793_v57 = vpop.f32.mrb[6].mxu0 }
 0x200   :  { %v517_v60 = vpop.f32.mrb[7].mxu0  ;;  %v527_v62 = vmax.f32 %v5793_v57, 0.0  ;;  %v3008_v57 = vld [vmem:[#allocation6 + $0xa8] sm:$0xff] }
 0x201   :  { %v526_v61 = vmax.f32 %v517_v60, 0.0  ;;  %v6510_v60 = vpack.c.bf16 %v3008_v57, %v3005_v56  ;;  %v1402_v56 = vld [vmem:[#allocation3 + $0xf8] sm:$0xff] }
 0x203   :  { %5802 = vmatprep.mubr.msk.f32.mxu0 %vm279_vm2, %v526_v61  ;;  %v6512_v61 = vpack.c.bf16 %v3015_v59, %v3012_v58  ;;  %6511 = vmatpush1.bf16.msra.mxu1 %v6510_v60  ;;  %v1573_v58 = vld [vmem:[#allocation3 + $0x100] sm:$0xff]  ;;  %v1574_v59 = vld [vmem:[#allocation3 + $0x108] sm:$0xff] }
 0x204   :  { %5803 = vmatmul.mubr.msk.f32.vlgmr.msra.gmra.mrb[4].mxu0 %vm279_vm2, %v527_v62  ;;  %v3011_v62 = vld [vmem:[#allocation6 + $0xc0] sm:$0xff]  ;;  %v6432_v60 = vpack.c.bf16 %v1574_v59, %v1573_v58  ;;  %v2793_v58 = vld [vmem:[#allocation3 + $0x1f0] sm:$0xff]  ;;  %v2794_v59 = vld [vmem:[#allocation3 + $0x1f8] sm:$0xff] }
 0x205   :  { %5806 = vmatpush3.msk.msra.mxu0 %vm103_vm0, %v7433_v0  ;;  %5807 = vmatprep.mubr.msk.f32.mxu0 %vm96_vm1, %v5325_v63  ;;  %v7636_v0 = vpop.f32.mrb[0].mxu1  ;;  %v3014_v63 = vld [vmem:[#allocation6 + $0xd8] sm:$0xff] }
 0x206   :  { %6393 = vmatprep.subr.bf16.mxu0 %v6392_v1  ;;  %v7638_v9 = vpop.f32.mrb[1].mxu1  ;;  %v6514_v3 = vpack.c.bf16 %v3014_v63, %v3011_v62  ;;  %6513 = vmatprep.subr.bf16.mxu1 %v6512_v61  ;;  %v1575_v61 = vld [vmem:[#allocation3 + $0x110] sm:$0xff]  ;;  %v1576_v62 = vld [vmem:[#allocation3 + $0x118] sm:$0xff] }
 0x207   :  { %v7640_v10 = vpop.f32.mrb[2].mxu1  ;;  %v874_v37 = vmax.f32 %v7638_v9, 0.0  ;;  %v875_v9 = vmax.f32 %v7636_v0, 0.0  ;;  %v6420_v0 = vpack.c.bf16 %v1228_v50, %v1227_v49  ;;  %v2445_v50 = vld [vmem:[#allocation3 + $0x1b0] sm:$0xff] }
 0x208   :  { %5808 = vmatmul.mubr.msk.f32.vlgmr.msra.gmra.mrb[8].mxu0 %vm96_vm1, %v5326_v2  ;;  %v7642_v11 = vpop.f32.mrb[3].mxu1  ;;  %v3021_v2 = vld [vmem:[#allocation6 + $0x110] sm:$0xff]  ;;  %6515 = vmatpush1.bf16.msra.mxu1 %v6514_v3 }
 0x209   :  { %6395 = vmatpush3.bf16.msra.mxu0 %v6392_v1  ;;  %v7644_v12 = vpop.f32.mrb[4].mxu1  ;;  %v3018_v1 = vld [vmem:[#allocation6 + $0xf8] sm:$0xff]  ;;  %v1048_v45 = vmax.f32 %v7642_v11, 0.0  ;;  %v1049_v11 = vmax.f32 %v7640_v10, 0.0  ;;  %v6428_v10 = vpack.c.bf16 %v1402_v56, %v1401_v55 }
 0x20a   :  { %6397 = vmatprep.subr.bf16.mxu0 %v6396_v5  ;;  %v7646_v13 = vpop.f32.mrb[5].mxu1  ;;  %v6516_v4 = vpack.c.bf16 %v3021_v2, %v3018_v1  ;;  %v1747_v1 = vld [vmem:[#allocation3 + $0x120] sm:$0xff]  ;;  %v1748_v2 = vld [vmem:[#allocation3 + $0x128] sm:$0xff]  ;;  %v2620_v55 = vld [vmem:[#allocation3 + $0x1d8] sm:$0xff] }
 0x20b   :  { %v7648_v14 = vpop.f32.mrb[6].mxu1  ;;  %v1222_v51 = vmax.f32 %v7646_v13, 0.0  ;;  %v1223_v13 = vmax.f32 %v7644_v12, 0.0  ;;  %v6436_v12 = vpack.c.bf16 %v1576_v62, %v1575_v61  ;;  %v6440_v3 = vpack.c.bf16 %v1748_v2, %v1747_v1  ;;  %v3024_v62 = vld [vmem:[#allocation6 + $0x128] sm:$0xff]  ;;  %v3033_v2 = vld [vmem:[#allocation6 + $0x170] sm:$0xff] }
 0x20c   :  { %v7650_v15 = vpop.f32.mrb[7].mxu1  ;;  %6517 = vmatprep.subr.bf16.mxu1 %v6516_v4  ;;  %v1749_v4 = vld [vmem:[#allocation3 + $0x130] sm:$0xff] }
 0x20d   :  { %6399 = vmatpush3.bf16.msra.mxu0 %v6396_v5  ;;  %v7652_v16 = vpop.f32.mrb[8].mxu1  ;;  %v3017_v5 = vld [vmem:[#allocation6 + $0xf0] sm:$0xff]  ;;  %v1396_v57 = vmax.f32 %v7650_v15, 0.0  ;;  %v1397_v15 = vmax.f32 %v7648_v14, 0.0 }
 0x20e   :  { %6401 = vmatprep.subr.bf16.mxu0 %v7633_v8  ;;  %v7654_v17 = vpop.f32.mrb[9].mxu1  ;;  %v6518_v7 = vpack.c.bf16 %v3020_v6, %v3017_v5  ;;  %v1750_v5 = vld [vmem:[#allocation3 + $0x138] sm:$0xff] }
 0x20f   :  { %v7656_v18 = vpop.f32.mrb[10].mxu1  ;;  %v1570_v63 = vmax.f32 %v7654_v17, 0.0  ;;  %v1571_v17 = vmax.f32 %v7652_v16, 0.0  ;;  %v6444_v14 = vpack.c.bf16 %v1750_v5, %v1749_v4  ;;  %v3029_v5 = vld [vmem:[#allocation6 + $0x150] sm:$0xff] }
 0x210   :  { %v7658_v19 = vpop.f32.mrb[11].mxu1  ;;  %6519 = vmatpush1.bf16.msra.mxu1 %v6518_v7  ;;  %v1921_v7 = vld [vmem:[#allocation3 + $0x140] sm:$0xff] }
 0x211   :  { %v7660_v20 = vpop.f32.mrb[12].mxu1  ;;  %v1744_v6 = vmax.f32 %v7658_v19, 0.0  ;;  %v1745_v19 = vmax.f32 %v7656_v18, 0.0  ;;  %v6460_v18 = vpack.c.bf16 %v2098_v41, %v2097_v40  ;;  %v3222_v40 = vld [vmem:[#allocation8 + $0x88] sm:$0xff] }
 0x212   :  { %v7662_v21 = vpop.f32.mrb[13].mxu1 }
 0x213   :  { %v7664_v22 = vpop.f32.mrb[14].mxu1 }
 0x214   :  { %v7666_v23 = vpop.f32.mrb[15].mxu1 }
 0x215   :  { %v7668_v24 = vpop.f32.mrb[16].mxu1 }
 0x216   :  { %v7670_v25 = vpop.f32.mrb[17].mxu1 }
 0x217   :  { %v7672_v26 = vpop.f32.mrb[18].mxu1 }
 0x218   :  { %v7674_v27 = vpop.f32.mrb[19].mxu1 }
 0x219   :  { %v7676_v28 = vpop.f32.mrb[20].mxu1 }
 0x21a   :  { %v7678_v29 = vpop.f32.mrb[21].mxu1 }
 0x21b   :  { %v7680_v30 = vpop.f32.mrb[22].mxu1  ;;  %v2614_v56 = vmax.f32 %v7678_v29, 0.0  ;;  %v2615_v29 = vmax.f32 %v7676_v28, 0.0  ;;  %v3030_v28 = vld [vmem:[#allocation6 + $0x158] sm:$0xff] }
 0x21c   :  { %v7682_v31 = vpop.f32.mrb[23].mxu1  ;;  %v2789_v61 = vmax.f32 %v7680_v30, 0.0  ;;  %v6524_v4 = vpack.c.bf16 %v3033_v2, %v3030_v28  ;;  %v3025_v2 = vld [vmem:[#allocation6 + $0x130] sm:$0xff] }
 0x2db   :  { %v5809_v32 = vpop.f32.mrb[8].mxu0 }
 0x2dc   :  { %v691_v35 = vpop.f32.mrb[9].mxu0  ;;  %v701_v38 = vmax.f32 %v5809_v32, 0.0  ;;  %v1922_v32 = vld [vmem:[#allocation3 + $0x148] sm:$0xff] }
 0x2dd   :  { %v700_v36 = vmax.f32 %v691_v35, 0.0  ;;  %v6448_v33 = vpack.c.bf16 %v1922_v32, %v1921_v7  ;;  %v1924_v35 = vld [vmem:[#allocation3 + $0x158] sm:$0xff]  ;;  %v2992_v7 = vld [vmem:[#allocation6 + $0x28] sm:$0xff] }
 0x2de   :  { %v6452_v16 = vpack.c.bf16 %v1924_v35, %v1923_v34  ;;  %v3207_v34 = vld [vmem:[#allocation8 + $0x10] sm:$0xff]  ;;  %v3210_v35 = vld [vmem:[#allocation8 + $0x28] sm:$0xff] }
 0x2df   :  { %5818 = vmatprep.mubr.msk.f32.mxu0 %vm279_vm2, %v700_v36  ;;  %v1918_v36 = vmax.f32 %v7662_v21, 0.0  ;;  %v1919_v21 = vmax.f32 %v7660_v20, 0.0 }
 0x2e0   :  { %5819 = vmatmul.mubr.msk.f32.vlgmr.msra.gmra.mrb[4].mxu0 %vm279_vm2, %v701_v38  ;;  %v2096_v38 = vld [vmem:[#allocation3 + $0x168] sm:$0xff] }
 0x2e1   :  { %6403 = vmatpush3.bf16.msra.mxu0 %v7633_v8  ;;  %5834 = vmatprep.mubr.msk.f32.mxu0 %vm279_vm2, %v874_v37  ;;  %v6416_v8 = vpack.c.bf16 %v1226_v48, %v1225_v47  ;;  %v2095_v37 = vld [vmem:[#allocation3 + $0x160] sm:$0xff]  ;;  %v2266_v47 = vmax.f32 %v7670_v25, 0.0  ;;  %v2267_v25 = vmax.f32 %v7668_v24, 0.0 }
 0x2e2   :  { %6405 = vmatprep.subr.bf16.mxu0 %v6404_v39  ;;  %v2443_v48 = vld [vmem:[#allocation3 + $0x1a0] sm:$0xff] }
 0x2e5   :  { %6407 = vmatpush3.bf16.msra.mxu0 %v6404_v39  ;;  %v6456_v39 = vpack.c.bf16 %v2096_v38, %v2095_v37  ;;  %v3216_v37 = vld [vmem:[#allocation8 + $0x58] sm:$0xff] }
 0x2e6   :  { %6409 = vmatprep.subr.bf16.mxu0 %v6408_v42 }
 0x2e8   :  { %5835 = vmatmul.mubr.msk.f32.vlgmr.msra.gmra.mrb[4].mxu0 %vm279_vm2, %v875_v9  ;;  %v2271_v9 = vld [vmem:[#allocation3 + $0x190] sm:$0xff] }
 0x2e9   :  { %6411 = vmatpush3.bf16.msra.mxu0 %v6408_v42  ;;  %5850 = vmatprep.mubr.msk.f32.mxu0 %vm279_vm2, %v1048_v45  ;;  %v2092_v42 = vmax.f32 %v7666_v23, 0.0  ;;  %v6464_v45 = vpack.c.bf16 %v2270_v44, %v2269_v43  ;;  %v2093_v23 = vmax.f32 %v7664_v22, 0.0  ;;  %v3231_v43 = vld [vmem:[#allocation8 + $0xd0] sm:$0xff]  ;;  %v3234_v44 = vld [vmem:[#allocation8 + $0xe8] sm:$0xff] }
 0x2ea   :  { %6413 = vmatprep.subr.bf16.mxu0 %v6412_v46 }
 0x2ed   :  { %6415 = vmatpush3.bf16.msra.mxu0 %v6412_v46  ;;  %v2272_v46 = vld [vmem:[#allocation3 + $0x198] sm:$0xff] }
 0x2ee   :  { %6417 = vmatprep.subr.bf16.mxu0 %v6416_v8  ;;  %v6468_v20 = vpack.c.bf16 %v2272_v46, %v2271_v9  ;;  %v3237_v9 = vld [vmem:[#allocation8 + $0x100] sm:$0xff]  ;;  %v3240_v46 = vld [vmem:[#allocation8 + $0x118] sm:$0xff] }
 0x2f0   :  { %5851 = vmatmul.mubr.msk.f32.vlgmr.msra.gmra.mrb[4].mxu0 %vm279_vm2, %v1049_v11  ;;  %v2440_v11 = vmax.f32 %v7674_v27, 0.0  ;;  %v2441_v27 = vmax.f32 %v7672_v26, 0.0  ;;  %v6492_v26 = vpack.c.bf16 %v2794_v59, %v2793_v58  ;;  %v3001_v58 = vld [vmem:[#allocation6 + $0x70] sm:$0xff]  ;;  %v3004_v59 = vld [vmem:[#allocation6 + $0x88] sm:$0xff] }
 0x2f1   :  { %6419 = vmatpush3.bf16.msra.mxu0 %v6416_v8  ;;  %5866 = vmatprep.mubr.msk.f32.mxu0 %vm279_vm2, %v1222_v51  ;;  %v2444_v8 = vld [vmem:[#allocation3 + $0x1a8] sm:$0xff]  ;;  %v2446_v51 = vld [vmem:[#allocation3 + $0x1b8] sm:$0xff] }
 0x2f2   :  { %6421 = vmatprep.subr.bf16.mxu0 %v6420_v0  ;;  %v6472_v49 = vpack.c.bf16 %v2444_v8, %v2443_v48  ;;  %v6476_v22 = vpack.c.bf16 %v2446_v51, %v2445_v50  ;;  %v3249_v8 = vld [vmem:[#allocation8 + $0x160] sm:$0xff]  ;;  %v7794_v51 = vld [vmem:[%s8378_s2] sm:$0x3] }
 0x2f5   :  { %6423 = vmatpush3.bf16.msra.mxu0 %v6420_v0  ;;  %v2617_v0 = vld [vmem:[#allocation3 + $0x1c0] sm:$0xff] }
 0x2f6   :  { %6425 = vmatprep.subr.bf16.mxu0 %v6424_v54  ;;  %v6480_v53 = vpack.c.bf16 %v2618_v52, %v2617_v0 }
 0x2f8   :  { %5867 = vmatmul.mubr.msk.f32.vlgmr.msra.gmra.mrb[4].mxu0 %vm279_vm2, %v1223_v13  ;;  %v2792_v13 = vld [vmem:[#allocation3 + $0x1e8] sm:$0xff] }
 0x2f9   :  { %6427 = vmatpush3.bf16.msra.mxu0 %v6424_v54  ;;  %5882 = vmatprep.mubr.msk.f32.mxu0 %vm279_vm2, %v1396_v57  ;;  %v2619_v54 = vld [vmem:[#allocation3 + $0x1d0] sm:$0xff]  ;;  %v2791_v57 = vld [vmem:[#allocation3 + $0x1e0] sm:$0xff] }
 0x2fa   :  { %6429 = vmatprep.subr.bf16.mxu0 %v6428_v10  ;;  %v6484_v24 = vpack.c.bf16 %v2620_v55, %v2619_v54 }
 0x2fd   :  { %6431 = vmatpush3.bf16.msra.mxu0 %v6428_v10  ;;  %v6488_v10 = vpack.c.bf16 %v2792_v13, %v2791_v57 }
 0x2fe   :  { %6433 = vmatprep.subr.bf16.mxu0 %v6432_v60 }
 0x300   :  { %5883 = vmatmul.mubr.msk.f32.vlgmr.msra.gmra.mrb[4].mxu0 %vm279_vm2, %v1397_v15 }
 0x301   :  { %6435 = vmatpush3.bf16.msra.mxu0 %v6432_v60  ;;  %5898 = vmatprep.mubr.msk.f32.mxu0 %vm279_vm2, %v1570_v63  ;;  %v2788_v60 = vmax.f32 %v7682_v31, 0.0  ;;  %v3027_v63 = vld [vmem:[#allocation6 + $0x140] sm:$0xff]  ;;  %v3026_v31 = vld [vmem:[#allocation6 + $0x138] sm:$0xff] }
 0x302   :  { %6437 = vmatprep.subr.bf16.mxu0 %v6436_v12  ;;  %v6520_v15 = vpack.c.bf16 %v3027_v63, %v3024_v62  ;;  %v3013_v63 = vld [vmem:[#allocation6 + $0xd0] sm:$0xff] }
 0x304   :  { %6521 = vmatprep.subr.bf16.mxu1 %v6520_v15  ;;  %v3016_v15 = vld [vmem:[#allocation6 + $0xe8] sm:$0xff] }
 0x305   :  { %6439 = vmatpush3.bf16.msra.mxu0 %v6436_v12  ;;  %v3023_v12 = vld [vmem:[#allocation6 + $0x120] sm:$0xff] }
 0x306   :  { %6441 = vmatprep.subr.bf16.mxu0 %v6440_v3  ;;  %v6522_v1 = vpack.c.bf16 %v3026_v31, %v3023_v12  ;;  %v6544_v12 = vpack.c.bf16 %v3016_v15, %v3013_v63  ;;  %v3019_v31 = vld [vmem:[#allocation6 + $0x100] sm:$0xff]  ;;  %v3248_v63 = vld [vmem:[#allocation8 + $0x158] sm:$0xff]  ;;  %v3251_v15 = vld [vmem:[#allocation8 + $0x170] sm:$0xff] }
 0x308   :  { %5899 = vmatmul.mubr.msk.f32.vlgmr.msra.gmra.mrb[4].mxu0 %vm279_vm2, %v1571_v17  ;;  %6523 = vmatpush1.bf16.msra.mxu1 %v6522_v1  ;;  %v3022_v1 = vld [vmem:[#allocation6 + $0x118] sm:$0xff] }
 0x309   :  { %6443 = vmatpush3.bf16.msra.mxu0 %v6440_v3  ;;  %5914 = vmatprep.mubr.msk.f32.mxu0 %vm279_vm2, %v1744_v6  ;;  %v7748_v3 = vpop.f32.mrb[24].mxu1  ;;  %v3032_v6 = vld [vmem:[#allocation6 + $0x168] sm:$0xff]  ;;  %v6548_v28 = vpack.c.bf16 %v3022_v1, %v3019_v31  ;;  %v7867_v31 = vpack.c.bf16 %v3251_v15, %v3248_v63  ;;  %v3247_v1 = vld [vmem:[#allocation8 + $0x150] sm:$0xff] }
 0x30a   :  { %6445 = vmatprep.subr.bf16.mxu0 %v6444_v14  ;;  %v7750_v17 = vpop.f32.mrb[25].mxu1  ;;  %v6526_v30 = vpack.c.bf16 %v3032_v6, %v3029_v5  ;;  %6525 = vmatprep.subr.bf16.mxu1 %v6524_v4  ;;  %v3031_v5 = vld [vmem:[#allocation6 + $0x160] sm:$0xff]  ;;  %v3034_v6 = vld [vmem:[#allocation6 + $0x178] sm:$0xff] }
 0x30c   :  { %6527 = vmatpush1.bf16.msra.mxu1 %v6526_v30  ;;  %v3206_v30 = vld [vmem:[#allocation8 + $0x8] sm:$0xff] }
 0x30d   :  { %6447 = vmatpush3.bf16.msra.mxu0 %v6444_v14  ;;  %v2989_v14 = vld [vmem:[#allocation6 + $0x10] sm:$0xff] }
 0x30e   :  { %6449 = vmatprep.subr.bf16.mxu0 %v6448_v33  ;;  %v7752_v32 = vpack.c.bf16 %v2992_v7, %v2989_v14  ;;  %v3209_v14 = vld [vmem:[#allocation8 + $0x20] sm:$0xff] }
 0x30f   :  { %v7825_v7 = vpack.c.bf16 %v3209_v14, %v3206_v30  ;;  %v3035_v30 = vld [vmem:[%s8385_s9] sm:$0x7] }
 0x310   :  { %5915 = vmatmul.mubr.msk.f32.vlgmr.msra.gmra.mrb[4].mxu0 %vm279_vm2, %v1745_v19  ;;  %6529 = vmatprep.subr.bf16.mxu1 %v7752_v32  ;;  %v7757_v19 = vpack.c.bf16 %v3210_v35, %v3207_v34  ;;  %v3208_v34 = vld [vmem:[#allocation8 + $0x18] sm:$0xff] }
 0x311   :  { %6451 = vmatpush3.bf16.msra.mxu0 %v6448_v33  ;;  %5930 = vmatprep.mubr.msk.f32.mxu0 %vm279_vm2, %v1918_v36  ;;  %v7295_v33 = vmov 0.0   ;;  %v7296_v36 = vmov 0.0|0.0   ;;  %v3212_v35 = vld [vmem:[#allocation8 + $0x38] sm:$0xff] }
 0x312   :  { %6453 = vmatprep.subr.bf16.mxu0 %v6452_v16  ;;  %3116 = vmatprep.mubr.f32.mxu1 %v7295_v33 }
 0x315   :  { %6455 = vmatpush3.bf16.msra.mxu0 %v6452_v16  ;;  %v3213_v16 = vld [vmem:[#allocation8 + $0x40] sm:$0xff] }
 0x316   :  { %6457 = vmatprep.subr.bf16.mxu0 %v6456_v39  ;;  %v7761_v38 = vpack.c.bf16 %v3216_v37, %v3213_v16  ;;  %v3215_v16 = vld [vmem:[#allocation8 + $0x50] sm:$0xff] }
 0x318   :  { %5931 = vmatmul.mubr.msk.f32.vlgmr.msra.gmra.mrb[4].mxu0 %vm279_vm2, %v1919_v21  ;;  %v3228_v21 = vld [vmem:[#allocation8 + $0xb8] sm:$0xff] }
 0x319   :  { %6459 = vmatpush3.bf16.msra.mxu0 %v6456_v39  ;;  %5946 = vmatprep.mubr.msk.f32.mxu0 %vm279_vm2, %v2092_v42  ;;  %v3219_v39 = vld [vmem:[#allocation8 + $0x70] sm:$0xff]  ;;  %v3225_v42 = vld [vmem:[#allocation8 + $0xa0] sm:$0xff] }
 0x31a   :  { %6461 = vmatprep.subr.bf16.mxu0 %v6460_v18  ;;  %v7764_v41 = vpack.c.bf16 %v3222_v40, %v3219_v39  ;;  %v7830_v39 = vpack.c.bf16 %v3215_v16, %v3212_v35  ;;  %v3211_v40 = vld [vmem:[#allocation8 + $0x30] sm:$0xff] }
 0x31d   :  { %6463 = vmatpush3.bf16.msra.mxu0 %v6460_v18  ;;  %v7770_v18 = vpack.c.bf16 %v3228_v21, %v3225_v42  ;;  %v3214_v42 = vld [vmem:[#allocation8 + $0x48] sm:$0xff] }
 0x31e   :  { %6465 = vmatprep.subr.bf16.mxu0 %v6464_v45  ;;  %v3218_v21 = vld [vmem:[#allocation8 + $0x68] sm:$0xff] }
 0x320   :  { %5947 = vmatmul.mubr.msk.f32.vlgmr.msra.gmra.mrb[4].mxu0 %vm279_vm2, %v2093_v23  ;;  %v3243_v23 = vld [vmem:[#allocation8 + $0x130] sm:$0xff] }
 0x321   :  { %6467 = vmatpush3.bf16.msra.mxu0 %v6464_v45  ;;  %5962 = vmatprep.mubr.msk.f32.mxu0 %vm279_vm2, %v2266_v47  ;;  %v7774_v45 = vpack.c.bf16 %v3234_v44, %v3231_v43  ;;  %v7778_v47 = vpack.c.bf16 %v3240_v46, %v3237_v9  ;;  %v3221_v43 = vld [vmem:[#allocation8 + $0x80] sm:$0xff]  ;;  %v7833_v44 = vpack.c.bf16 %v3214_v42, %v3211_v40 }
 0x322   :  { %6469 = vmatprep.subr.bf16.mxu0 %v6468_v20  ;;  %v7837_v9 = vpack.c.bf16 %v3221_v43, %v3218_v21  ;;  %v3217_v46 = vld [vmem:[#allocation8 + $0x60] sm:$0xff] }
 0x325   :  { %6471 = vmatpush3.bf16.msra.mxu0 %v6468_v20  ;;  %v3246_v20 = vld [vmem:[#allocation8 + $0x148] sm:$0xff] }
 0x326   :  { %6473 = vmatprep.subr.bf16.mxu0 %v6472_v49  ;;  %v7782_v48 = vpack.c.bf16 %v3246_v20, %v3243_v23  ;;  %v3220_v23 = vld [vmem:[#allocation8 + $0x78] sm:$0xff] }
 0x327   :  { %v3224_v20 = vld [vmem:[#allocation8 + $0x98] sm:$0xff] }
 0x328   :  { %5963 = vmatmul.mubr.msk.f32.vlgmr.msra.gmra.mrb[4].mxu0 %vm279_vm2, %v2267_v25 }
 0x329   :  { %6475 = vmatpush3.bf16.msra.mxu0 %v6472_v49  ;;  %5978 = vmatprep.mubr.msk.f32.mxu0 %vm279_vm2, %v2440_v11  ;;  %v3252_v49 = vld [vmem:[#allocation8 + $0x178] sm:$0xff]  ;;  %v5416_v11 = vld [vmem:[%s8381_s5] ss:$0 sm:$0xff] }
 0x32a   :  { %6477 = vmatprep.subr.bf16.mxu0 %v6476_v22  ;;  %v7786_v50 = vpack.c.bf16 %v3252_v49, %v3249_v8  ;;  %v3227_v8 = vld [vmem:[#allocation8 + $0xb0] sm:$0xff]  ;;  %v7840_v49 = vpack.c.bf16 %v3220_v23, %v3217_v46 }
 0x32d   :  { %6479 = vmatpush3.bf16.msra.mxu0 %v6476_v22 }
 0x32e   :  { %6481 = vmatprep.subr.bf16.mxu0 %v6480_v53 }
 0x330   :  { %5979 = vmatmul.mubr.msk.f32.vlgmr.msra.gmra.mrb[4].mxu0 %vm279_vm2, %v2441_v27  ;;  %v2995_v27 = vld [vmem:[#allocation6 + $0x40] sm:$0xff] }
 0x331   :  { %6483 = vmatpush3.bf16.msra.mxu0 %v6480_v53  ;;  %5994 = vmatprep.mubr.msk.f32.mxu0 %vm279_vm2, %v2614_v56  ;;  %v5420_v56 = vld [vmem:[%s8383_s7] ss:$0 sm:$0xff] }
 0x332   :  { %6485 = vmatprep.subr.bf16.mxu0 %v6484_v24 }
 0x335   :  { %6487 = vmatpush3.bf16.msra.mxu0 %v6484_v24  ;;  %v2998_v24 = vld [vmem:[#allocation6 + $0x58] sm:$0xff] }
 0x336   :  { %6489 = vmatprep.subr.bf16.mxu0 %v6488_v10 }
 0x338   :  { %5995 = vmatmul.mubr.msk.f32.vlgmr.msra.gmra.mrb[4].mxu0 %vm279_vm2, %v2615_v29  ;;  %v6536_v29 = vpack.c.bf16 %v3004_v59, %v3001_v58  ;;  %v3238_v58 = vld [vmem:[#allocation8 + $0x108] sm:$0xff] }
 0x339   :  { %6491 = vmatpush3.bf16.msra.mxu0 %v6488_v10  ;;  %6010 = vmatprep.mubr.msk.f32.mxu0 %vm279_vm2, %v2788_v60  ;;  %v6532_v10 = vpack.c.bf16 %v2998_v24, %v2995_v27  ;;  %v3236_v27 = vld [vmem:[#allocation8 + $0xf8] sm:$0xff]  ;;  %v3239_v24 = vld [vmem:[#allocation8 + $0x110] sm:$0xff]  ;;  %v3242_v59 = vld [vmem:[#allocation8 + $0x128] sm:$0xff] }
 0x33a   :  { %6493 = vmatprep.subr.bf16.mxu0 %v6492_v26 }
 0x33d   :  { %6495 = vmatpush3.bf16.msra.mxu0 %v6492_v26  ;;  %v3007_v26 = vld [vmem:[#allocation6 + $0xa0] sm:$0xff] }
 0x33e   :  { %6592 = vmatprep.subr.bf16.mxu0 %v7296_v36 }
 0x340   :  { %6011 = vmatmul.mubr.msk.f32.vlgmr.msra.gmra.mrb[4].mxu0 %vm279_vm2, %v2789_v61  ;;  %v3010_v61 = vld [vmem:[#allocation6 + $0xb8] sm:$0xff] }
 0x341   :  { %6594 = vmatpush3.bf16.msra.mxu0 %v7757_v19  ;;  %6085 = vmatprep.mubr.msk.f32.mxu0 %vm7297_vm3, %v7295_v33  ;;  %v6540_v62 = vpack.c.bf16 %v3010_v61, %v3007_v26  ;;  %v3241_v61 = vld [vmem:[#allocation8 + $0x120] sm:$0xff] }
 0x342   :  { %6595 = vmatprep.subr.bf16.mxu0 %v7296_v36 }
 0x345   :  { %6597 = vmatpush3.bf16.msra.mxu0 %v7761_v38 }
 0x346   :  { %6598 = vmatprep.subr.bf16.mxu0 %v7296_v36 }
 0x349   :  { %6600 = vmatpush3.bf16.msra.mxu0 %v7764_v41 }
 0x34a   :  { %6601 = vmatprep.subr.bf16.mxu0 %v7296_v36 }
 0x34d   :  { %6603 = vmatpush3.bf16.msra.mxu0 %v7770_v18 }
 0x34e   :  { %6604 = vmatprep.subr.bf16.mxu0 %v7296_v36 }
 0x351   :  { %6606 = vmatpush3.bf16.msra.mxu0 %v7774_v45 }
 0x352   :  { %6607 = vmatprep.subr.bf16.mxu0 %v7296_v36 }
 0x355   :  { %6609 = vmatpush3.bf16.msra.mxu0 %v7778_v47 }
 0x356   :  { %6610 = vmatprep.subr.bf16.mxu0 %v7296_v36 }
 0x359   :  { %6612 = vmatpush3.bf16.msra.mxu0 %v7782_v48 }
 0x35a   :  { %6613 = vmatprep.subr.bf16.mxu0 %v7296_v36 }
 0x35d   :  { %6615 = vmatpush3.bf16.msra.mxu0 %v7786_v50 }
 0x35e   :  { %6648 = vmatprep.subr.bf16.mxu0 %v7296_v36 }
 0x360   :  { %6086 = vmatmul.mubr.f32.vlgmr.msra.gmra.mrb[10].mxu0 %v7794_v51 }
 0x361   :  { %6650 = vmatpush3.bf16.msra.mxu0 %v7757_v19  ;;  %6120 = vmatprep.mubr.msk.f32.mxu0 %vm7297_vm3, %v7295_v33 }
 0x362   :  { %6651 = vmatprep.subr.bf16.mxu0 %v7296_v36 }
 0x365   :  { %6653 = vmatpush3.bf16.msra.mxu0 %v7761_v38 }
 0x366   :  { %6654 = vmatprep.subr.bf16.mxu0 %v7296_v36 }
 0x369   :  { %6656 = vmatpush3.bf16.msra.mxu0 %v7764_v41 }
 0x36a   :  { %6657 = vmatprep.subr.bf16.mxu0 %v7296_v36 }
 0x36d   :  { %6659 = vmatpush3.bf16.msra.mxu0 %v7770_v18 }
 0x36e   :  { %6660 = vmatprep.subr.bf16.mxu0 %v7296_v36 }
 0x371   :  { %6662 = vmatpush3.bf16.msra.mxu0 %v7774_v45 }
 0x372   :  { %6663 = vmatprep.subr.bf16.mxu0 %v7296_v36 }
 0x375   :  { %6665 = vmatpush3.bf16.msra.mxu0 %v7778_v47 }
 0x376   :  { %6666 = vmatprep.subr.bf16.mxu0 %v7296_v36 }
 0x379   :  { %6668 = vmatpush3.bf16.msra.mxu0 %v7782_v48 }
 0x37a   :  { %6669 = vmatprep.subr.bf16.mxu0 %v7296_v36 }
 0x37d   :  { %6671 = vmatpush3.bf16.msra.mxu0 %v7786_v50 }
 0x37e   :  { %6704 = vmatprep.subr.bf16.mxu0 %v7296_v36 }
 0x413   :  { %v6012_v25 = vpop.f32.mrb[4].mxu0 }
 0x414   :  { %v2886_v22 = vadd.f32 %v6012_v25, %v5416_v11  ;;  %v2867_v0 = vpop.f32.mrb[5].mxu0  ;;  %v3223_v25 = vld [vmem:[#allocation8 + $0x90] sm:$0xff] }
 0x415   :  { %v2885_v52 = vadd.f32 %v5416_v11, %v2867_v0  ;;  %v7843_v11 = vpack.c.bf16 %v3227_v8, %v3224_v20  ;;  %v3230_v0 = vld [vmem:[#allocation8 + $0xc8] sm:$0xff] }
 0x416   :  { %v2888_v53 = vmax.f32 %v2886_v22, 0.0  ;;  %v3226_v22 = vld [vmem:[#allocation8 + $0xa8] sm:$0xff] }
 0x417   :  { %v2887_v54 = vmax.f32 %v2885_v52, 0.0  ;;  %v3233_v52 = vld [vmem:[#allocation8 + $0xe0] sm:$0xff] }
 0x418   :  { %v2977_v55 = vadd.f32 %v7748_v3, %v2888_v53  ;;  %v3028_v3 = vld [vmem:[#allocation6 + $0x148] sm:$0xff]  ;;  %v7846_v53 = vpack.c.bf16 %v3226_v22, %v3223_v25  ;;  %v3253_v22 = vld [vmem:[%s8387_s11] sm:$0x7] }
 0x419   :  { %v2976_v57 = vadd.f32 %v7750_v17, %v2887_v54  ;;  %v6552_v4 = vpack.c.bf16 %v3028_v3, %v3025_v2  ;;  %v6556_v17 = vpack.c.bf16 %v3034_v6, %v3031_v5  ;;  %v7849_v54 = vpack.c.bf16 %v3233_v52, %v3230_v0 }
 0x41a   :  { %v2986_v60 = vadd.f32 %v5420_v56, %v2977_v55  ;;  %v3229_v55 = vld [vmem:[#allocation8 + $0xc0] sm:$0xff]  ;;  %v3037_v5 = vlaneseq }
 0x41b   :  { %v2985_v13 = vadd.f32 %v5420_v56, %v2976_v57  ;;  %v3232_v56 = vld [vmem:[#allocation8 + $0xd8] sm:$0xff] }
 0x41c   :  { %v7852_v57 = vpack.c.bf16 %v3232_v56, %v3229_v55  ;;  %v3038_v6 = vshrl.u32 %v3037_v5, 7 }
 0x41d   :  { %3117 = vmatmul.mubr.f32.vlgmr.msra.gmra.mrb[26].mxu1 %v2985_v13 }
 0x41e   :  { %6531 = vmatpush3.bf16.msra.mxu1 %v7752_v32  ;;  %3122 = vmatprep.mubr.f32.mxu1 %v7295_v33  ;;  %v3205_v32 = vld [vmem:[#allocation8] sm:$0xff]  ;;  %v7907_v46 = vsub.s32 2, %v3038_v6 }
 0x41f   :  { %6533 = vmatprep.subr.bf16.mxu1 %v6532_v10  ;;  %v7827_v37 = vpack.c.bf16 %v3208_v34, %v3205_v32  ;;  %v7899_v32 = vsub.s32 1, %v3038_v6 }
 0x420   :  { %v3048_v23 = vrot.slane %v3035_v30, %v7907_v46 }
 0x421   :  { %3123 = vmatmul.mubr.f32.gmra.mrb[28].mxu1 %v2986_v60  ;;  %v3044_v16 = vrot.slane %v3035_v30, %v7899_v32  ;;  %v3262_v52 = vrot.slane %v3253_v22, %v7899_v32 }
 0x422   :  { %6535 = vmatpush3.bf16.msra.mxu1 %v6532_v10  ;;  %6050 = vmatprep.mubr.f32.mxu1 %v2985_v13  ;;  %v7855_v13 = vpack.c.bf16 %v3239_v24, %v3236_v27  ;;  %v3235_v10 = vld [vmem:[#allocation8 + $0xf0] sm:$0xff] }
 0x423   :  { %6537 = vmatprep.subr.bf16.mxu1 %v6536_v29 }
 0x426   :  { %6539 = vmatpush3.bf16.msra.mxu1 %v6536_v29  ;;  %v7858_v29 = vpack.c.bf16 %v3238_v58, %v3235_v10 }
 0x427   :  { %6541 = vmatprep.subr.bf16.mxu1 %v6540_v62 }
 0x42a   :  { %6543 = vmatpush3.bf16.msra.mxu1 %v6540_v62  ;;  %v3244_v62 = vld [vmem:[#allocation8 + $0x138] sm:$0xff] }
 0x42b   :  { %6545 = vmatprep.subr.bf16.mxu1 %v6544_v12 }
 0x42e   :  { %6547 = vmatpush3.bf16.msra.mxu1 %v6544_v12  ;;  %v7864_v12 = vpack.c.bf16 %v3244_v62, %v3241_v61 }
 0x42f   :  { %6549 = vmatprep.subr.bf16.mxu1 %v6548_v28 }
 0x432   :  { %6551 = vmatpush3.bf16.msra.mxu1 %v6548_v28  ;;  %v3250_v28 = vld [vmem:[#allocation8 + $0x168] sm:$0xff] }
 0x433   :  { %6553 = vmatprep.subr.bf16.mxu1 %v6552_v4  ;;  %v7870_v2 = vpack.c.bf16 %v3250_v28, %v3247_v1  ;;  %v3407_v3 = vpop.f32.mrb[10].mxu0  ;;  %v3266_v1 = vrot.slane %v3253_v22, %v7907_v46 }
 0x436   :  { %6555 = vmatpush3.bf16.msra.mxu1 %v6552_v4  ;;  %v6087_v4 = vpop.f32.mrb[11].mxu0 }
 0x437   :  { %6557 = vmatprep.subr.bf16.mxu1 %v6556_v17 }
 0x43a   :  { %6559 = vmatpush3.bf16.msra.mxu1 %v6556_v17  ;;  %v7894_v17 = vsub.s32 0, %v3038_v6  ;;  %v3408_v6 = vadd.f32 %v3407_v3, %v3266_v1 }
 0x43b   :  { %6561 = vmatprep.subr.bf16.mxu1 %v7825_v7 }
 0x43c   :  { %v3040_v35 = vrot.slane %v3035_v30, %v7894_v17  ;;  %v3258_v0 = vrot.slane %v3253_v22, %v7894_v17 }
 0x43d   :  { %6051 = vmatmul.mubr.f32.vlgmr.msra.gmra.mrb[30].mxu1 %v2986_v60  ;;  %v3245_v60 = vld [vmem:[#allocation8 + $0x140] sm:$0xff] }
 0x43e   :  { %6563 = vmatpush1.bf16.msra.mxu1 %v7827_v37  ;;  %3334 = vmatprep.mubr.f32.mxu1 %v7295_v33  ;;  %v7861_v26 = vpack.c.bf16 %v3245_v60, %v3242_v59 }
 0x43f   :  { %6565 = vmatprep.subr.bf16.mxu1 %v7830_v39 }
 0x442   :  { %6567 = vmatpush1.bf16.msra.mxu1 %v7833_v44 }
 0x443   :  { %6569 = vmatprep.subr.bf16.mxu1 %v7837_v9 }
 0x446   :  { %6571 = vmatpush1.bf16.msra.mxu1 %v7840_v49 }
 0x447   :  { %6573 = vmatprep.subr.bf16.mxu1 %v7843_v11 }
 0x44a   :  { %6575 = vmatpush1.bf16.msra.mxu1 %v7846_v53 }
 0x44b   :  { %6577 = vmatprep.subr.bf16.mxu1 %v7849_v54 }
 0x44e   :  { %6579 = vmatpush1.bf16.msra.mxu1 %v7852_v57 }
 0x44f   :  { %6581 = vmatprep.subr.bf16.mxu1 %v7855_v13 }
 0x452   :  { %6583 = vmatpush1.bf16.msra.mxu1 %v7858_v29 }
 0x453   :  { %6585 = vmatprep.subr.bf16.mxu1 %v7861_v26 }
 0x456   :  { %6587 = vmatpush1.bf16.msra.mxu1 %v7864_v12 }
 0x457   :  { %6589 = vmatprep.subr.bf16.mxu1 %v7867_v31 }
 0x45a   :  { %6591 = vmatpush1.bf16.msra.mxu1 %v7870_v2 }
 0x45b   :  { %6617 = vmatprep.subr.bf16.mxu1 %v7825_v7 }
 0x45d   :  { %3335 = vmatmul.mubr.f32.vlgmr.msra.gmra.mrb[32].mxu1 %v7794_v51 }
 0x45e   :  { %6619 = vmatpush1.bf16.msra.mxu1 %v7827_v37  ;;  %3562 = vmatprep.mubr.f32.mxu1 %v7295_v33 }
 0x45f   :  { %6621 = vmatprep.subr.bf16.mxu1 %v7830_v39 }
 0x462   :  { %6623 = vmatpush1.bf16.msra.mxu1 %v7833_v44 }
 0x463   :  { %6625 = vmatprep.subr.bf16.mxu1 %v7837_v9 }
 0x466   :  { %6627 = vmatpush1.bf16.msra.mxu1 %v7840_v49 }
 0x467   :  { %6629 = vmatprep.subr.bf16.mxu1 %v7843_v11 }
 0x46a   :  { %6631 = vmatpush1.bf16.msra.mxu1 %v7846_v53 }
 0x46b   :  { %6633 = vmatprep.subr.bf16.mxu1 %v7849_v54 }
 0x46e   :  { %6635 = vmatpush1.bf16.msra.mxu1 %v7852_v57 }
 0x46f   :  { %6637 = vmatprep.subr.bf16.mxu1 %v7855_v13 }
 0x472   :  { %6639 = vmatpush1.bf16.msra.mxu1 %v7858_v29 }
 0x473   :  { %6641 = vmatprep.subr.bf16.mxu1 %v7861_v26 }
 0x476   :  { %6643 = vmatpush1.bf16.msra.mxu1 %v7864_v12 }
 0x477   :  { %6645 = vmatprep.subr.bf16.mxu1 %v7867_v31 }
 0x47a   :  { %6647 = vmatpush1.bf16.msra.mxu1 %v7870_v2 }
 0x47b   :  { %6673 = vmatprep.subr.bf16.mxu1 %v7825_v7 }
 0x4f0   :  { %v3118_v14 = vpop.f32.mrb[26].mxu1 }
 0x4f1   :  { %v3120_v34 = vpop.f32.mrb[27].mxu1  ;;  %v7917_v56 = vadd.f32 %v3118_v14, %v3040_v35 }
 0x4f2   :  { %v7920_v59 = vadd.f32 %v3120_v34, %v3044_v16 }
 0x4f4   :  { %v3124_v40 = vpop.f32.mrb[28].mxu1 }
 0x4f5   :  { %v7903_v42 = vadd.f32 %v3124_v40, %v3040_v35  ;;  %v3126_v21 = vpop.f32.mrb[29].mxu1 }
 0x4f6   :  { %v7905_v43 = vadd.f32 %v3126_v21, %v3044_v16 }
 0x510   :  { %v6052_v20 = vpop.f32.mrb[30].mxu1 }
 0x511   :  { %v7910_v8 = vadd.f32 %v6052_v20, %v3048_v23  ;;  %v3195_v25 = vpop.f32.mrb[31].mxu1 }
 0x512   :  { %v7924_v14 = vadd.f32 %v3195_v25, %v3048_v23 }
 0x530   :  { %v3336_v55 = vpop.f32.mrb[32].mxu1 }
 0x531   :  { %v3337_v27 = vadd.f32 %v3336_v55, %v3258_v0  ;;  %v3338_v24 = vpop.f32.mrb[33].mxu1 }
 0x532   :  { %v3339_v10 = vadd.f32 %v3338_v24, %v3262_v52 }
 0x533   :  { %v3411_v58 = vadd.f32 %v3337_v27, %v7917_v56 }
 0x534   :  { %v3418_v61 = vadd.f32 %v3339_v10, %v7920_v59 }
 0x535   :  { %v5421_v60 = vmul.f32 -1.442695, %v3411_v58 }
 0x536   :  { %v5422_v62 = vmul.f32 -1.442695, %v3418_v61 }
 0x537   :  { %7082 = vpow2.f32 %v5421_v60 }
 0x538   :  { %7084 = vpow2.f32 %v5422_v62 }
 0x541   :  { %v7083_v63 = vpop.eup %7082 }
 0x542   :  { %v3415_v15 = vadd.f32 1.0, %v7083_v63  ;;  %v7085_v28 = vpop.eup %7084 }
 0x543   :  { %v3422_v4 = vadd.f32 1.0, %v7085_v28 }
 0x544   :  { %7086 = vrcp.f32 %v3415_v15 }
 0x545   :  { %7088 = vrcp.f32 %v3422_v4 }
 0x54e   :  { %v7087_v30 = vpop.eup %7086 }
 0x54f   :  { %v3425_v34 = vmul.f32 %v7087_v30, %v3408_v6  ;;  %v7089_v16 = vpop.eup %7088 }
 0x550   :  { %v3428_v40 = vsub.f32 1.0, %v7089_v16  ;;  %v3430_v0 = vmul.f32 %v7089_v16, %v7794_v51  ;;  %v3481_v51 = vld [vmem:[%s8387_s11] sm:$0x7] }
 0x551   :  { %v3426_v35 = vadd.f32 %v3425_v34, %v7924_v14  ;;  %v3486_v3 = vrot.slane %v3481_v51, %v7894_v17  ;;  %v3490_v23 = vrot.slane %v3481_v51, %v7899_v32  ;;  %v3494_v6 = vrot.slane %v3481_v51, %v7907_v46 }
 0x553   :  { %7090 = vtanh.f32 %v3426_v35 }
 0x55d   :  { %v7091_v21 = vpop.eup %7090 }
 0x55e   :  { %v3429_v20 = vmul.f32 %v7091_v21, %v3428_v40 }
 0x560   :  { %v7928_v52 = vadd.f32 %v3430_v0, %v3429_v20 }
 0x562   :  { %3432 = vst [vmem:[#allocation2] sm:$0x3] %v7928_v52  ;;  %3563 = vmatmul.mubr.f32.vlgmr.msra.gmra.mrb[34].mxu1 %v7928_v52  ;;  %6121 = vmatmul.mubr.f32.vlgmr.msra.gmra.mrb[12].mxu0 %v7928_v52  ;;  %v3668_v16 = vrot.slane %v7928_v52, 6 }
 0x563   :  { %6675 = vmatpush1.bf16.msra.mxu1 %v7827_v37  ;;  %6706 = vmatpush3.bf16.msra.mxu0 %v7757_v19 }
 0x564   :  { %6677 = vmatprep.subr.bf16.mxu1 %v7830_v39  ;;  %6707 = vmatprep.subr.bf16.mxu0 %v7296_v36 }
 0x565   :  { %3805 = vmatprep.mubr.f32.mxu1 %v7295_v33  ;;  %6155 = vmatprep.mubr.msk.f32.mxu0 %vm7297_vm3, %v7295_v33 }
 0x567   :  { %6679 = vmatpush1.bf16.msra.mxu1 %v7833_v44  ;;  %6709 = vmatpush3.bf16.msra.mxu0 %v7761_v38 }
 0x568   :  { %6681 = vmatprep.subr.bf16.mxu1 %v7837_v9  ;;  %6710 = vmatprep.subr.bf16.mxu0 %v7296_v36 }
 0x56b   :  { %6683 = vmatpush1.bf16.msra.mxu1 %v7840_v49  ;;  %6712 = vmatpush3.bf16.msra.mxu0 %v7764_v41 }
 0x56c   :  { %6685 = vmatprep.subr.bf16.mxu1 %v7843_v11  ;;  %6713 = vmatprep.subr.bf16.mxu0 %v7296_v36 }
 0x56f   :  { %6687 = vmatpush1.bf16.msra.mxu1 %v7846_v53  ;;  %6715 = vmatpush3.bf16.msra.mxu0 %v7770_v18 }
 0x570   :  { %6689 = vmatprep.subr.bf16.mxu1 %v7849_v54  ;;  %6716 = vmatprep.subr.bf16.mxu0 %v7296_v36 }
 0x573   :  { %6691 = vmatpush1.bf16.msra.mxu1 %v7852_v57  ;;  %6718 = vmatpush3.bf16.msra.mxu0 %v7774_v45 }
 0x574   :  { %6693 = vmatprep.subr.bf16.mxu1 %v7855_v13  ;;  %6719 = vmatprep.subr.bf16.mxu0 %v7296_v36 }
 0x577   :  { %6695 = vmatpush1.bf16.msra.mxu1 %v7858_v29  ;;  %6721 = vmatpush3.bf16.msra.mxu0 %v7778_v47 }
 0x578   :  { %6697 = vmatprep.subr.bf16.mxu1 %v7861_v26  ;;  %6722 = vmatprep.subr.bf16.mxu0 %v7296_v36 }
 0x57b   :  { %6699 = vmatpush1.bf16.msra.mxu1 %v7864_v12  ;;  %6724 = vmatpush3.bf16.msra.mxu0 %v7782_v48 }
 0x57c   :  { %6701 = vmatprep.subr.bf16.mxu1 %v7867_v31  ;;  %6725 = vmatprep.subr.bf16.mxu0 %v7296_v36 }
 0x57f   :  { %6703 = vmatpush1.bf16.msra.mxu1 %v7870_v2  ;;  %6727 = vmatpush3.bf16.msra.mxu0 %v7786_v50 }
 0x580   :  { %6729 = vmatprep.subr.bf16.mxu1 %v7825_v7  ;;  %6760 = vmatprep.subr.bf16.mxu0 %v7296_v36 }
 0x635   :  { %v3564_v25 = vpop.f32.mrb[34].mxu1  ;;  %v3635_v22 = vpop.f32.mrb[12].mxu0 }
 0x636   :  { %v3565_v55 = vadd.f32 %v3564_v25, %v3486_v3  ;;  %v3566_v27 = vpop.f32.mrb[35].mxu1  ;;  %v6122_v24 = vpop.f32.mrb[13].mxu0  ;;  %v3636_v30 = vadd.f32 %v3635_v22, %v3494_v6  ;;  %v4159_v6 = vld [vmem:[#allocation8 + $0x10] sm:$0xff] }
 0x637   :  { %v3567_v10 = vadd.f32 %v3566_v27, %v3490_v23 }
 0x638   :  { %v3640_v58 = vrot.slane %v3565_v55, 6  ;;  %v3660_v34 = vrot.slane %v3636_v30, 6 }
 0x639   :  { %v3650_v60 = vrot.slane %v3567_v10, 6 }
 0x63a   :  { %v3642_v7 = vadd.f32 %v3640_v58, %v7917_v56 }
 0x63b   :  { %v3652_v61 = vadd.f32 %v3650_v60, %v7920_v59 }
 0x63c   :  { %v5423_v62 = vmul.f32 -1.442695, %v3642_v7 }
 0x63d   :  { %v5424_v63 = vmul.f32 -1.442695, %v3652_v61 }
 0x63e   :  { %7092 = vpow2.f32 %v5423_v62 }
 0x63f   :  { %7094 = vpow2.f32 %v5424_v63  ;;  %v4158_v63 = vld [vmem:[#allocation8 + $0x8] sm:$0xff] }
 0x648   :  { %v7093_v15 = vpop.eup %7092 }
 0x649   :  { %v7095_v1 = vpop.eup %7094  ;;  %v3646_v28 = vadd.f32 1.0, %v7093_v15  ;;  %v4161_v15 = vld [vmem:[#allocation8 + $0x20] sm:$0xff] }
 0x64a   :  { %v3656_v4 = vadd.f32 1.0, %v7095_v1  ;;  %v8033_v1 = vpack.c.bf16 %v4161_v15, %v4158_v63  ;;  %v4192_v15 = vld [vmem:[#allocation8 + $0x118] sm:$0xff] }
 0x64b   :  { %7096 = vrcp.f32 %v3646_v28  ;;  %v4157_v28 = vld [vmem:[#allocation8] sm:$0xff] }
 0x64c   :  { %7098 = vrcp.f32 %v3656_v4  ;;  %v4160_v4 = vld [vmem:[#allocation8 + $0x18] sm:$0xff] }
 0x64d   :  { %v8035_v30 = vpack.c.bf16 %v4160_v4, %v4157_v28  ;;  %v4194_v28 = vld [vmem:[#allocation8 + $0x128] sm:$0xff]  ;;  %v4197_v4 = vld [vmem:[#allocation8 + $0x140] sm:$0xff] }
 0x655   :  { %v7097_v35 = vpop.eup %7096 }
 0x656   :  { %v7099_v40 = vpop.eup %7098  ;;  %v3662_v21 = vmul.f32 %v7097_v35, %v3660_v34  ;;  %v4162_v34 = vld [vmem:[#allocation8 + $0x28] sm:$0xff] }
 0x657   :  { %v3670_v20 = vmul.f32 %v7099_v40, %v3668_v16  ;;  %v3665_v3 = vsub.f32 1.0, %v7099_v40  ;;  %v8038_v35 = vpack.c.bf16 %v4162_v34, %v4159_v6  ;;  %v4164_v16 = vld [vmem:[#allocation8 + $0x38] sm:$0xff]  ;;  %v4167_v40 = vld [vmem:[#allocation8 + $0x50] sm:$0xff]  ;;  %v8089_v34 = vpack.c.bf16 %v4197_v4, %v4194_v28 }
 0x658   :  { %v3663_v0 = vadd.f32 %v3662_v21, %v7924_v14  ;;  %v8042_v21 = vpack.c.bf16 %v4167_v40, %v4164_v16  ;;  %v4193_v16 = vld [vmem:[#allocation8 + $0x120] sm:$0xff]  ;;  %v4196_v40 = vld [vmem:[#allocation8 + $0x138] sm:$0xff] }
 0x65a   :  { %7100 = vtanh.f32 %v3663_v0  ;;  %v4166_v0 = vld [vmem:[#allocation8 + $0x48] sm:$0xff] }
 0x664   :  { %v7101_v23 = vpop.eup %7100 }
 0x665   :  { %v3666_v25 = vmul.f32 %v7101_v23, %v3665_v3  ;;  %v4165_v3 = vld [vmem:[#allocation8 + $0x40] sm:$0xff] }
 0x667   :  { %v7978_v55 = vadd.f32 %v3670_v20, %v3666_v25  ;;  %v4163_v20 = vld [vmem:[#allocation8 + $0x30] sm:$0xff]  ;;  %v4168_v25 = vld [vmem:[#allocation8 + $0x58] sm:$0xff] }
 0x668   :  { %v8045_v23 = vpack.c.bf16 %v4166_v0, %v4163_v20  ;;  %v4195_v20 = vld [vmem:[#allocation8 + $0x130] sm:$0xff]  ;;  %v4198_v0 = vld [vmem:[#allocation8 + $0x148] sm:$0xff] }
 0x669   :  { %3672 = vst [vmem:[#allocation2] sm:$0xc] %v7978_v55  ;;  %v3739_v51 = vrot.slane %v7978_v55, 2  ;;  %v3910_v52 = vrot.slane %v7978_v55, 6  ;;  %v8048_v55 = vpack.c.bf16 %v4168_v25, %v4165_v3  ;;  %v4200_v3 = vld [vmem:[#allocation8 + $0x158] sm:$0xff]  ;;  %v4203_v25 = vld [vmem:[#allocation8 + $0x170] sm:$0xff] }
 0x66b   :  { %3806 = vmatmul.mubr.f32.vlgmr.msra.gmra.mrb[36].mxu1 %v3739_v51  ;;  %6156 = vmatmul.mubr.f32.vlgmr.msra.gmra.mrb[14].mxu0 %v3739_v51  ;;  %v4170_v51 = vld [vmem:[#allocation8 + $0x68] sm:$0xff] }
 0x66c   :  { %6731 = vmatpush1.bf16.msra.mxu1 %v7827_v37  ;;  %6762 = vmatpush3.bf16.msra.mxu0 %v7757_v19  ;;  %v3721_v19 = vld [vmem:[%s8387_s11] sm:$0x7] }
 0x66d   :  { %6733 = vmatprep.subr.bf16.mxu1 %v7830_v39  ;;  %6763 = vmatprep.subr.bf16.mxu0 %v7296_v36 }
 0x66e   :  { %4047 = vmatprep.mubr.f32.mxu1 %v7295_v33  ;;  %6190 = vmatprep.mubr.msk.f32.mxu0 %vm7297_vm3, %v7295_v33 }
 0x670   :  { %6735 = vmatpush1.bf16.msra.mxu1 %v7833_v44  ;;  %6765 = vmatpush3.bf16.msra.mxu0 %v7761_v38  ;;  %v3726_v38 = vrot.slane %v3721_v19, %v7894_v17 }
 0x671   :  { %6737 = vmatprep.subr.bf16.mxu1 %v7837_v9  ;;  %6766 = vmatprep.subr.bf16.mxu0 %v7296_v36 }
 0x674   :  { %6739 = vmatpush1.bf16.msra.mxu1 %v7840_v49  ;;  %6768 = vmatpush3.bf16.msra.mxu0 %v7764_v41  ;;  %v3730_v41 = vrot.slane %v3721_v19, %v7899_v32 }
 0x675   :  { %6741 = vmatprep.subr.bf16.mxu1 %v7843_v11  ;;  %6769 = vmatprep.subr.bf16.mxu0 %v7296_v36 }
 0x678   :  { %6743 = vmatpush1.bf16.msra.mxu1 %v7846_v53  ;;  %6771 = vmatpush3.bf16.msra.mxu0 %v7770_v18 }
 0x679   :  { %6745 = vmatprep.subr.bf16.mxu1 %v7849_v54  ;;  %6772 = vmatprep.subr.bf16.mxu0 %v7296_v36 }
 0x67c   :  { %6747 = vmatpush1.bf16.msra.mxu1 %v7852_v57  ;;  %6774 = vmatpush3.bf16.msra.mxu0 %v7774_v45 }
 0x67d   :  { %6749 = vmatprep.subr.bf16.mxu1 %v7855_v13  ;;  %6775 = vmatprep.subr.bf16.mxu0 %v7296_v36 }
 0x680   :  { %6751 = vmatpush1.bf16.msra.mxu1 %v7858_v29  ;;  %6777 = vmatpush3.bf16.msra.mxu0 %v7778_v47 }
 0x681   :  { %6753 = vmatprep.subr.bf16.mxu1 %v7861_v26  ;;  %6778 = vmatprep.subr.bf16.mxu0 %v7296_v36  ;;  %v3734_v26 = vrot.slane %v3721_v19, %v7907_v46  ;;  %v4173_v19 = vld [vmem:[#allocation8 + $0x80] sm:$0xff] }
 0x684   :  { %6755 = vmatpush1.bf16.msra.mxu1 %v7864_v12  ;;  %6780 = vmatpush3.bf16.msra.mxu0 %v7782_v48 }
 0x685   :  { %6757 = vmatprep.subr.bf16.mxu1 %v7867_v31  ;;  %6781 = vmatprep.subr.bf16.mxu0 %v7296_v36 }
 0x688   :  { %6759 = vmatpush1.bf16.msra.mxu1 %v7870_v2  ;;  %6783 = vmatpush3.bf16.msra.mxu0 %v7786_v50 }
 0x689   :  { %6816 = vmatprep.subr.bf16.mxu0 %v7296_v36  ;;  %6785 = vmatprep.subr.bf16.mxu1 %v8033_v1 }
 0x73e   :  { %v3807_v18 = vpop.f32.mrb[36].mxu1  ;;  %v3878_v45 = vpop.f32.mrb[14].mxu0 }
 0x73f   :  { %v3808_v47 = vadd.f32 %v3807_v18, %v3726_v38  ;;  %v3809_v48 = vpop.f32.mrb[37].mxu1  ;;  %v6157_v37 = vpop.f32.mrb[15].mxu0  ;;  %v3879_v12 = vadd.f32 %v3878_v45, %v3734_v26  ;;  %v8052_v38 = vpack.c.bf16 %v4173_v19, %v4170_v51  ;;  %v4172_v18 = vld [vmem:[#allocation8 + $0x78] sm:$0xff]  ;;  %v4171_v45 = vld [vmem:[#allocation8 + $0x70] sm:$0xff]  ;;  %v8093_v51 = vpack.c.bf16 %v4196_v40, %v4193_v16 }
 0x740   :  { %v3810_v39 = vadd.f32 %v3809_v48, %v3730_v41  ;;  %v4169_v41 = vld [vmem:[#allocation8 + $0x60] sm:$0xff]  ;;  %v4174_v48 = vld [vmem:[#allocation8 + $0x88] sm:$0xff]  ;;  %v8097_v19 = vpack.c.bf16 %v4198_v0, %v4195_v20 }
 0x741   :  { %v3883_v44 = vrot.slane %v3808_v47, 4  ;;  %v3903_v31 = vrot.slane %v3879_v12, 4  ;;  %v8055_v47 = vpack.c.bf16 %v4172_v18, %v4169_v41  ;;  %v8058_v37 = vpack.c.bf16 %v4174_v48, %v4171_v45  ;;  %v4181_v12 = vld [vmem:[#allocation8 + $0xc0] sm:$0xff]  ;;  %v4199_v18 = vld [vmem:[#allocation8 + $0x150] sm:$0xff]  ;;  %v4202_v45 = vld [vmem:[#allocation8 + $0x168] sm:$0xff] }
 0x742   :  { %v3893_v9 = vrot.slane %v3810_v39, 4  ;;  %v4176_v39 = vld [vmem:[#allocation8 + $0x98] sm:$0xff]  ;;  %v8099_v41 = vpack.c.bf16 %v4203_v25, %v4200_v3  ;;  %v4201_v48 = vld [vmem:[#allocation8 + $0x160] sm:$0xff] }
 0x743   :  { %v3885_v50 = vadd.f32 %v3883_v44, %v7917_v56  ;;  %v4179_v44 = vld [vmem:[#allocation8 + $0xb0] sm:$0xff] }
 0x744   :  { %v3895_v49 = vadd.f32 %v3893_v9, %v7920_v59  ;;  %v8062_v9 = vpack.c.bf16 %v4179_v44, %v4176_v39  ;;  %v4204_v39 = vld [vmem:[#allocation8 + $0x178] sm:$0xff]  ;;  %v8103_v44 = vpack.c.bf16 %v4202_v45, %v4199_v18 }
 0x745   :  { %v5425_v11 = vmul.f32 -1.442695, %v3885_v50  ;;  %v4175_v50 = vld [vmem:[#allocation8 + $0x90] sm:$0xff] }
 0x746   :  { %v5426_v53 = vmul.f32 -1.442695, %v3895_v49  ;;  %v4178_v49 = vld [vmem:[#allocation8 + $0xa8] sm:$0xff] }
 0x747   :  { %7102 = vpow2.f32 %v5425_v11  ;;  %v4177_v11 = vld [vmem:[#allocation8 + $0xa0] sm:$0xff] }
 0x748   :  { %7104 = vpow2.f32 %v5426_v53  ;;  %v8065_v53 = vpack.c.bf16 %v4178_v49, %v4175_v50  ;;  %v8107_v50 = vpack.c.bf16 %v4204_v39, %v4201_v48  ;;  %v3963_v49 = vld [vmem:[%s8387_s11] sm:$0x7] }
 0x749   :  { %v3976_v20 = vrot.slane %v3963_v49, %v7907_v46 }
 0x751   :  { %v7103_v54 = vpop.eup %7102 }
 0x752   :  { %v7105_v57 = vpop.eup %7104  ;;  %v3889_v13 = vadd.f32 1.0, %v7103_v54  ;;  %v4180_v54 = vld [vmem:[#allocation8 + $0xb8] sm:$0xff] }
 0x753   :  { %v3899_v29 = vadd.f32 1.0, %v7105_v57  ;;  %v8068_v57 = vpack.c.bf16 %v4180_v54, %v4177_v11  ;;  %v3968_v11 = vrot.slane %v3963_v49, %v7894_v17  ;;  %v3972_v54 = vrot.slane %v3963_v49, %v7899_v32 }
 0x754   :  { %7106 = vrcp.f32 %v3889_v13  ;;  %v4182_v13 = vld [vmem:[#allocation8 + $0xc8] sm:$0xff] }
 0x755   :  { %7108 = vrcp.f32 %v3899_v29  ;;  %v4185_v29 = vld [vmem:[#allocation8 + $0xe0] sm:$0xff] }
 0x756   :  { %v8072_v26 = vpack.c.bf16 %v4185_v29, %v4182_v13 }
 0x75e   :  { %v7107_v2 = vpop.eup %7106 }
 0x75f   :  { %v7109_v22 = vpop.eup %7108  ;;  %v3905_v27 = vmul.f32 %v7107_v2, %v3903_v31  ;;  %v4184_v31 = vld [vmem:[#allocation8 + $0xd8] sm:$0xff]  ;;  %v4183_v2 = vld [vmem:[#allocation8 + $0xd0] sm:$0xff] }
 0x760   :  { %v3912_v24 = vmul.f32 %v7109_v22, %v3910_v52  ;;  %v3908_v58 = vsub.f32 1.0, %v7109_v22  ;;  %v8075_v52 = vpack.c.bf16 %v4184_v31, %v4181_v12  ;;  %v4186_v22 = vld [vmem:[#allocation8 + $0xe8] sm:$0xff] }
 0x761   :  { %v3906_v10 = vadd.f32 %v3905_v27, %v7924_v14  ;;  %v4188_v27 = vld [vmem:[#allocation8 + $0xf8] sm:$0xff] }
 0x763   :  { %7110 = vtanh.f32 %v3906_v10  ;;  %v8078_v10 = vpack.c.bf16 %v4186_v22, %v4183_v2 }
 0x76d   :  { %v7111_v60 = vpop.eup %7110 }
 0x76e   :  { %v3909_v7 = vmul.f32 %v7111_v60, %v3908_v58  ;;  %v4187_v60 = vld [vmem:[#allocation8 + $0xf0] sm:$0xff] }
 0x770   :  { %v8026_v61 = vadd.f32 %v3912_v24, %v3909_v7  ;;  %v4191_v24 = vld [vmem:[#allocation8 + $0x110] sm:$0xff]  ;;  %v4190_v7 = vld [vmem:[#allocation8 + $0x108] sm:$0xff] }
 0x771   :  { %v8080_v58 = vpack.c.bf16 %v4191_v24, %v4188_v27  ;;  %v8083_v63 = vpack.c.bf16 %v4190_v7, %v4187_v60 }
 0x772   :  { %3914 = vst [vmem:[#allocation2] sm:$0x30] %v8026_v61  ;;  %v3981_v62 = vrot.slane %v8026_v61, 4  ;;  %v4152_v18 = vrot.slane %v8026_v61, 6 }
 0x774   :  { %4048 = vmatmul.mubr.f32.vlgmr.msra.gmra.mrb[38].mxu1 %v3981_v62  ;;  %6191 = vmatmul.mubr.f32.vlgmr.msra.gmra.mrb[16].mxu0 %v3981_v62  ;;  %v4189_v62 = vld [vmem:[#allocation8 + $0x100] sm:$0xff] }
 0x775   :  { %4289 = vmatprep.mubr.f32.mxu1 %v7295_v33  ;;  %6225 = vmatprep.mubr.msk.f32.mxu0 %vm7297_vm3, %v7295_v33  ;;  %v8087_v6 = vpack.c.bf16 %v4192_v15, %v4189_v62 }
 0x776   :  { %6787 = vmatpush1.bf16.msra.mxu1 %v8035_v30  ;;  %6818 = vmatpush3.bf16.msra.mxu0 %v8038_v35 }
 0x777   :  { %6819 = vmatprep.subr.bf16.mxu0 %v7296_v36  ;;  %6789 = vmatprep.subr.bf16.mxu1 %v8042_v21 }
 0x77a   :  { %6791 = vmatpush1.bf16.msra.mxu1 %v8045_v23  ;;  %6821 = vmatpush3.bf16.msra.mxu0 %v8048_v55 }
 0x77b   :  { %6822 = vmatprep.subr.bf16.mxu0 %v7296_v36  ;;  %6793 = vmatprep.subr.bf16.mxu1 %v8052_v38 }
 0x77e   :  { %6795 = vmatpush1.bf16.msra.mxu1 %v8055_v47  ;;  %6824 = vmatpush3.bf16.msra.mxu0 %v8058_v37 }
 0x77f   :  { %6825 = vmatprep.subr.bf16.mxu0 %v7296_v36  ;;  %6797 = vmatprep.subr.bf16.mxu1 %v8062_v9 }
 0x782   :  { %6799 = vmatpush1.bf16.msra.mxu1 %v8065_v53  ;;  %6827 = vmatpush3.bf16.msra.mxu0 %v8068_v57 }
 0x783   :  { %6828 = vmatprep.subr.bf16.mxu0 %v7296_v36  ;;  %6801 = vmatprep.subr.bf16.mxu1 %v8072_v26 }
 0x786   :  { %6803 = vmatpush1.bf16.msra.mxu1 %v8075_v52  ;;  %6830 = vmatpush3.bf16.msra.mxu0 %v8078_v10 }
 0x787   :  { %6805 = vmatprep.subr.bf16.mxu1 %v8080_v58  ;;  %6831 = vmatprep.subr.bf16.mxu0 %v7296_v36 }
 0x78a   :  { %6807 = vmatpush1.bf16.msra.mxu1 %v8083_v63  ;;  %6833 = vmatpush3.bf16.msra.mxu0 %v8087_v6 }
 0x78b   :  { %6809 = vmatprep.subr.bf16.mxu1 %v8089_v34  ;;  %6834 = vmatprep.subr.bf16.mxu0 %v7296_v36 }
 0x78e   :  { %6811 = vmatpush1.bf16.msra.mxu1 %v8093_v51  ;;  %6836 = vmatpush3.bf16.msra.mxu0 %v8097_v19 }
 0x78f   :  { %6813 = vmatprep.subr.bf16.mxu1 %v8099_v41  ;;  %6837 = vmatprep.subr.bf16.mxu0 %v7296_v36 }
 0x792   :  { %6815 = vmatpush1.bf16.msra.mxu1 %v8103_v44  ;;  %6839 = vmatpush3.bf16.msra.mxu0 %v8107_v50 }
 0x793   :  { %6841 = vmatprep.subr.bf16.mxu1 %v8033_v1  ;;  %6872 = vmatprep.subr.bf16.mxu0 %v7296_v36 }
 0x847   :  { %v4049_v13 = vpop.f32.mrb[38].mxu1  ;;  %v4120_v29 = vpop.f32.mrb[16].mxu0 }
 0x848   :  { %v4050_v12 = vadd.f32 %v4049_v13, %v3968_v11  ;;  %v4051_v31 = vpop.f32.mrb[39].mxu1  ;;  %v6192_v2 = vpop.f32.mrb[17].mxu0  ;;  %v4121_v0 = vadd.f32 %v4120_v29, %v3976_v20 }
 0x849   :  { %v4052_v22 = vadd.f32 %v4051_v31, %v3972_v54 }
 0x84a   :  { %v4125_v27 = vrot.slane %v4050_v12, 2  ;;  %v4145_v3 = vrot.slane %v4121_v0, 2 }
 0x84b   :  { %v4135_v24 = vrot.slane %v4052_v22, 2 }
 0x84c   :  { %v4127_v60 = vadd.f32 %v4125_v27, %v7917_v56 }
 0x84d   :  { %v4137_v7 = vadd.f32 %v4135_v24, %v7920_v59 }
 0x84e   :  { %v5427_v62 = vmul.f32 -1.442695, %v4127_v60 }
 0x84f   :  { %v5428_v15 = vmul.f32 -1.442695, %v4137_v7 }
 0x850   :  { %7112 = vpow2.f32 %v5427_v62 }
 0x851   :  { %7114 = vpow2.f32 %v5428_v15 }
 0x85a   :  { %v7113_v28 = vpop.eup %7112 }
 0x85b   :  { %v7115_v4 = vpop.eup %7114  ;;  %v4131_v16 = vadd.f32 1.0, %v7113_v28 }
 0x85c   :  { %v4141_v40 = vadd.f32 1.0, %v7115_v4 }
 0x85d   :  { %7116 = vrcp.f32 %v4131_v16 }
 0x85e   :  { %7118 = vrcp.f32 %v4141_v40 }
 0x867   :  { %v7117_v25 = vpop.eup %7116 }
 0x868   :  { %v7119_v56 = vpop.eup %7118  ;;  %v4147_v45 = vmul.f32 %v7117_v25, %v4145_v3 }
 0x869   :  { %v4154_v59 = vmul.f32 %v7119_v56, %v4152_v18  ;;  %v4150_v39 = vsub.f32 1.0, %v7119_v56 }
 0x86a   :  { %v4148_v48 = vadd.f32 %v4147_v45, %v7924_v14  ;;  %v4205_v14 = vld [vmem:[%s8387_s11] sm:$0x7] }
 0x86b   :  { %v4210_v61 = vrot.slane %v4205_v14, %v7894_v17  ;;  %v4214_v49 = vrot.slane %v4205_v14, %v7899_v32  ;;  %v4218_v40 = vrot.slane %v4205_v14, %v7907_v46 }
 0x86c   :  { %7120 = vtanh.f32 %v4148_v48 }
 0x876   :  { %v7121_v11 = vpop.eup %7120 }
 0x877   :  { %v4151_v54 = vmul.f32 %v7121_v11, %v4150_v39 }
 0x879   :  { %v4155_v13 = vadd.f32 %v4154_v59, %v4151_v54  ;;  %v4436_v54 = vld [vmem:[%s8387_s11] sm:$0x7] }
 0x87b   :  { %4156 = vst [vmem:[#allocation2] sm:$0xc0] %v4155_v13  ;;  %v8124_v12 = vrot.slane %v4155_v13, 6  ;;  %v4441_v13 = vrot.slane %v4436_v54, %v7894_v17 }
 0x87d   :  { %4290 = vmatmul.mubr.f32.vlgmr.msra.gmra.mrb[40].mxu1 %v8124_v12  ;;  %6226 = vmatmul.mubr.f32.vlgmr.msra.gmra.mrb[18].mxu0 %v8124_v12 }
 0x87e   :  { %6843 = vmatpush1.bf16.msra.mxu1 %v8035_v30  ;;  %6874 = vmatpush3.bf16.msra.mxu0 %v8038_v35 }
 0x87f   :  { %6845 = vmatprep.subr.bf16.mxu1 %v8042_v21  ;;  %6875 = vmatprep.subr.bf16.mxu0 %v7296_v36 }
 0x880   :  { %4517 = vmatprep.mubr.f32.mxu1 %v7295_v33  ;;  %6260 = vmatprep.mubr.msk.f32.mxu0 %vm7297_vm3, %v7295_v33 }
 0x882   :  { %6847 = vmatpush1.bf16.msra.mxu1 %v8045_v23  ;;  %6877 = vmatpush3.bf16.msra.mxu0 %v8048_v55 }
 0x883   :  { %6849 = vmatprep.subr.bf16.mxu1 %v8052_v38  ;;  %6878 = vmatprep.subr.bf16.mxu0 %v7296_v36 }
 0x886   :  { %6851 = vmatpush1.bf16.msra.mxu1 %v8055_v47  ;;  %6880 = vmatpush3.bf16.msra.mxu0 %v8058_v37 }
 0x887   :  { %6853 = vmatprep.subr.bf16.mxu1 %v8062_v9  ;;  %6881 = vmatprep.subr.bf16.mxu0 %v7296_v36 }
 0x88a   :  { %6855 = vmatpush1.bf16.msra.mxu1 %v8065_v53  ;;  %6883 = vmatpush3.bf16.msra.mxu0 %v8068_v57 }
 0x88b   :  { %6857 = vmatprep.subr.bf16.mxu1 %v8072_v26  ;;  %6884 = vmatprep.subr.bf16.mxu0 %v7296_v36 }
 0x88e   :  { %6859 = vmatpush1.bf16.msra.mxu1 %v8075_v52  ;;  %6886 = vmatpush3.bf16.msra.mxu0 %v8078_v10 }
 0x88f   :  { %6861 = vmatprep.subr.bf16.mxu1 %v8080_v58  ;;  %6887 = vmatprep.subr.bf16.mxu0 %v7296_v36 }
 0x892   :  { %6863 = vmatpush1.bf16.msra.mxu1 %v8083_v63  ;;  %6889 = vmatpush3.bf16.msra.mxu0 %v8087_v6 }
 0x893   :  { %6865 = vmatprep.subr.bf16.mxu1 %v8089_v34  ;;  %6890 = vmatprep.subr.bf16.mxu0 %v7296_v36 }
 0x896   :  { %6867 = vmatpush1.bf16.msra.mxu1 %v8093_v51  ;;  %6892 = vmatpush3.bf16.msra.mxu0 %v8097_v19 }
 0x897   :  { %6869 = vmatprep.subr.bf16.mxu1 %v8099_v41  ;;  %6893 = vmatprep.subr.bf16.mxu0 %v7296_v36 }
 0x89a   :  { %6871 = vmatpush1.bf16.msra.mxu1 %v8103_v44  ;;  %6895 = vmatpush3.bf16.msra.mxu0 %v8107_v50 }
 0x89b   :  { %6897 = vmatprep.subr.bf16.mxu1 %v8033_v1  ;;  %6928 = vmatprep.subr.bf16.mxu0 %v7296_v36 }
 0x950   :  { %v4291_v29 = vpop.f32.mrb[40].mxu1  ;;  %v4362_v31 = vpop.f32.mrb[18].mxu0 }
 0x951   :  { %v4292_v2 = vadd.f32 %v4291_v29, %v4210_v61  ;;  %v4293_v22 = vpop.f32.mrb[41].mxu1  ;;  %v6227_v27 = vpop.f32.mrb[19].mxu0  ;;  %v4363_v0 = vadd.f32 %v4362_v31, %v4218_v40 }
 0x952   :  { %v4294_v24 = vadd.f32 %v4293_v22, %v4214_v49 }
 0x953   :  { %v4366_v60 = vadd.f32 %v4292_v2, %v7903_v42 }
 0x954   :  { %v4373_v62 = vadd.f32 %v4294_v24, %v7905_v43 }
 0x955   :  { %v5429_v7 = vmul.f32 -1.442695, %v4366_v60 }
 0x956   :  { %v5430_v15 = vmul.f32 -1.442695, %v4373_v62 }
 0x957   :  { %7122 = vpow2.f32 %v5429_v7 }
 0x958   :  { %7124 = vpow2.f32 %v5430_v15 }
 0x961   :  { %v7123_v28 = vpop.eup %7122 }
 0x962   :  { %v4370_v4 = vadd.f32 1.0, %v7123_v28  ;;  %v7125_v16 = vpop.eup %7124 }
 0x963   :  { %v4377_v20 = vadd.f32 1.0, %v7125_v16  ;;  %v4449_v16 = vrot.slane %v4436_v54, %v7907_v46 }
 0x964   :  { %7126 = vrcp.f32 %v4370_v4 }
 0x965   :  { %7128 = vrcp.f32 %v4377_v20 }
 0x96e   :  { %v7127_v3 = vpop.eup %7126 }
 0x96f   :  { %v4380_v25 = vmul.f32 %v7127_v3, %v4363_v0  ;;  %v7129_v56 = vpop.eup %7128 }
 0x970   :  { %v4383_v45 = vsub.f32 1.0, %v7129_v56  ;;  %v4385_v39 = vmul.f32 %v7129_v56, %v8124_v12  ;;  %v4445_v12 = vrot.slane %v4436_v54, %v7899_v32 }
 0x971   :  { %v4381_v18 = vadd.f32 %v4380_v25, %v7910_v8 }
 0x973   :  { %7130 = vtanh.f32 %v4381_v18 }
 0x97d   :  { %v7131_v59 = vpop.eup %7130 }
 0x97e   :  { %v4384_v48 = vmul.f32 %v7131_v59, %v4383_v45 }
 0x980   :  { %v8173_v11 = vadd.f32 %v4385_v39, %v4384_v48 }
 0x982   :  { %4387 = vst [vmem:[#allocation2 + $0x8] sm:$0x3] %v8173_v11  ;;  %4518 = vmatmul.mubr.f32.vlgmr.msra.gmra.mrb[42].mxu1 %v8173_v11  ;;  %6261 = vmatmul.mubr.f32.vlgmr.msra.gmra.mrb[20].mxu0 %v8173_v11  ;;  %v4623_v3 = vrot.slane %v8173_v11, 6 }
 0x983   :  { %6899 = vmatpush1.bf16.msra.mxu1 %v8035_v30  ;;  %6930 = vmatpush3.bf16.msra.mxu0 %v8038_v35 }
 0x984   :  { %6901 = vmatprep.subr.bf16.mxu1 %v8042_v21  ;;  %6931 = vmatprep.subr.bf16.mxu0 %v7296_v36 }
 0x985   :  { %4760 = vmatprep.mubr.f32.mxu1 %v7295_v33  ;;  %6295 = vmatprep.mubr.msk.f32.mxu0 %vm7297_vm3, %v7295_v33 }
 0x987   :  { %6903 = vmatpush1.bf16.msra.mxu1 %v8045_v23  ;;  %6933 = vmatpush3.bf16.msra.mxu0 %v8048_v55 }
 0x988   :  { %6905 = vmatprep.subr.bf16.mxu1 %v8052_v38  ;;  %6934 = vmatprep.subr.bf16.mxu0 %v7296_v36 }
 0x98b   :  { %6907 = vmatpush1.bf16.msra.mxu1 %v8055_v47  ;;  %6936 = vmatpush3.bf16.msra.mxu0 %v8058_v37 }
 0x98c   :  { %6909 = vmatprep.subr.bf16.mxu1 %v8062_v9  ;;  %6937 = vmatprep.subr.bf16.mxu0 %v7296_v36 }
 0x98f   :  { %6911 = vmatpush1.bf16.msra.mxu1 %v8065_v53  ;;  %6939 = vmatpush3.bf16.msra.mxu0 %v8068_v57 }
 0x990   :  { %6913 = vmatprep.subr.bf16.mxu1 %v8072_v26  ;;  %6940 = vmatprep.subr.bf16.mxu0 %v7296_v36 }
 0x993   :  { %6915 = vmatpush1.bf16.msra.mxu1 %v8075_v52  ;;  %6942 = vmatpush3.bf16.msra.mxu0 %v8078_v10 }
 0x994   :  { %6917 = vmatprep.subr.bf16.mxu1 %v8080_v58  ;;  %6943 = vmatprep.subr.bf16.mxu0 %v7296_v36 }
 0x997   :  { %6919 = vmatpush1.bf16.msra.mxu1 %v8083_v63  ;;  %6945 = vmatpush3.bf16.msra.mxu0 %v8087_v6 }
 0x998   :  { %6921 = vmatprep.subr.bf16.mxu1 %v8089_v34  ;;  %6946 = vmatprep.subr.bf16.mxu0 %v7296_v36 }
 0x99b   :  { %6923 = vmatpush1.bf16.msra.mxu1 %v8093_v51  ;;  %6948 = vmatpush3.bf16.msra.mxu0 %v8097_v19 }
 0x99c   :  { %6925 = vmatprep.subr.bf16.mxu1 %v8099_v41  ;;  %6949 = vmatprep.subr.bf16.mxu0 %v7296_v36 }
 0x99f   :  { %6927 = vmatpush1.bf16.msra.mxu1 %v8103_v44  ;;  %6951 = vmatpush3.bf16.msra.mxu0 %v8107_v50 }
 0x9a0   :  { %6953 = vmatprep.subr.bf16.mxu1 %v8033_v1  ;;  %6984 = vmatprep.subr.bf16.mxu0 %v7296_v36 }
 0xa55   :  { %v4519_v14 = vpop.f32.mrb[42].mxu1  ;;  %v4590_v61 = vpop.f32.mrb[20].mxu0 }
 0xa56   :  { %v4520_v49 = vadd.f32 %v4519_v14, %v4441_v13  ;;  %v4521_v29 = vpop.f32.mrb[43].mxu1  ;;  %v6262_v31 = vpop.f32.mrb[21].mxu0  ;;  %v4591_v40 = vadd.f32 %v4590_v61, %v4449_v16  ;;  %v5121_v16 = vld [vmem:[%s8388_s12 + $0x30] sm:$0xff] }
 0xa57   :  { %v4522_v2 = vadd.f32 %v4521_v29, %v4445_v12 }
 0xa58   :  { %v4595_v22 = vrot.slane %v4520_v49, 6  ;;  %v4615_v20 = vrot.slane %v4591_v40, 6  ;;  %v5122_v40 = vld [vmem:[%s8388_s12 + $0x38] sm:$0xff] }
 0xa59   :  { %v4605_v27 = vrot.slane %v4522_v2, 6 }
 0xa5a   :  { %v4597_v1 = vadd.f32 %v4595_v22, %v7903_v42  ;;  %v5113_v22 = vld [vmem:[#allocation2] sm:$0xff] }
 0xa5b   :  { %v4607_v24 = vadd.f32 %v4605_v27, %v7905_v43  ;;  %v5115_v27 = vld [vmem:[%s8388_s12] sm:$0xff] }
 0xa5c   :  { %v5431_v60 = vmul.f32 -1.442695, %v4597_v1  ;;  %v5116_v1 = vld [vmem:[%s8388_s12 + $0x8] sm:$0xff] }
 0xa5d   :  { %v5432_v7 = vmul.f32 -1.442695, %v4607_v24  ;;  %v7008_v24 = vpack.c.bf16 %v5116_v1, %v5115_v27 }
 0xa5e   :  { %7132 = vpow2.f32 %v5431_v60  ;;  %v5117_v60 = vld [vmem:[%s8388_s12 + $0x10] sm:$0xff] }
 0xa5f   :  { %7134 = vpow2.f32 %v5432_v7  ;;  %v5118_v7 = vld [vmem:[%s8388_s12 + $0x18] sm:$0xff] }
 0xa68   :  { %v7133_v62 = vpop.eup %7132 }
 0xa69   :  { %v7135_v15 = vpop.eup %7134  ;;  %v4601_v28 = vadd.f32 1.0, %v7133_v62  ;;  %v7012_v62 = vpack.c.bf16 %v5118_v7, %v5117_v60 }
 0xa6a   :  { %v4611_v4 = vadd.f32 1.0, %v7135_v15  ;;  %v5119_v15 = vld [vmem:[%s8388_s12 + $0x20] sm:$0xff] }
 0xa6b   :  { %7136 = vrcp.f32 %v4601_v28  ;;  %v5120_v28 = vld [vmem:[%s8388_s12 + $0x28] sm:$0xff] }
 0xa6c   :  { %7138 = vrcp.f32 %v4611_v4  ;;  %v7016_v4 = vpack.c.bf16 %v5120_v28, %v5119_v15 }
 0xa75   :  { %v7137_v0 = vpop.eup %7136 }
 0xa76   :  { %v7139_v25 = vpop.eup %7138  ;;  %v4617_v18 = vmul.f32 %v7137_v0, %v4615_v20  ;;  %v7020_v20 = vpack.c.bf16 %v5122_v40, %v5121_v16  ;;  %v5123_v0 = vld [vmem:[%s8388_s12 + $0x40] sm:$0xff] }
 0xa77   :  { %v4625_v56 = vmul.f32 %v7139_v25, %v4623_v3  ;;  %v4620_v59 = vsub.f32 1.0, %v7139_v25  ;;  %v5124_v3 = vld [vmem:[%s8388_s12 + $0x48] sm:$0xff] }
 0xa78   :  { %v4618_v45 = vadd.f32 %v4617_v18, %v7910_v8  ;;  %v7024_v25 = vpack.c.bf16 %v5124_v3, %v5123_v0  ;;  %v5125_v18 = vld [vmem:[%s8388_s12 + $0x50] sm:$0xff] }
 0xa7a   :  { %7140 = vtanh.f32 %v4618_v45 }
 0xa84   :  { %v7141_v48 = vpop.eup %7140 }
 0xa85   :  { %v4621_v39 = vmul.f32 %v7141_v48, %v4620_v59  ;;  %v5127_v59 = vld [vmem:[%s8388_s12 + $0x60] sm:$0xff]  ;;  %v5128_v48 = vld [vmem:[%s8388_s12 + $0x68] sm:$0xff] }
 0xa87   :  { %v8223_v13 = vadd.f32 %v4625_v56, %v4621_v39  ;;  %v5126_v56 = vld [vmem:[%s8388_s12 + $0x58] sm:$0xff]  ;;  %v7032_v39 = vpack.c.bf16 %v5128_v48, %v5127_v59 }
 0xa88   :  { %v7028_v45 = vpack.c.bf16 %v5126_v56, %v5125_v18 }
 0xa89   :  { %4627 = vst [vmem:[#allocation2 + $0x8] sm:$0xc] %v8223_v13  ;;  %v4694_v54 = vrot.slane %v8223_v13, 2 }
 0xa8b   :  { %4761 = vmatmul.mubr.f32.vlgmr.msra.gmra.mrb[44].mxu1 %v4694_v54  ;;  %6296 = vmatmul.mubr.f32.vlgmr.msra.gmra.mrb[22].mxu0 %v4694_v54  ;;  %v5130_v54 = vld [vmem:[%s8388_s12 + $0x78] sm:$0xff] }
 0xa8c   :  { %6955 = vmatpush1.bf16.msra.mxu1 %v8035_v30  ;;  %6986 = vmatpush3.bf16.msra.mxu0 %v8038_v35 }
 0xa8d   :  { %6957 = vmatprep.subr.bf16.mxu1 %v8042_v21  ;;  %6987 = vmatprep.subr.bf16.mxu0 %v7296_v36 }
 0xa8e   :  { %5002 = vmatprep.mubr.f32.mxu1 %v7295_v33  ;;  %6330 = vmatprep.mubr.msk.f32.mxu0 %vm7297_vm3, %v7295_v33  ;;  %v4676_v33 = vld [vmem:[%s8387_s11] sm:$0x7] }
 0xa8f   :  { %v4681_v30 = vrot.slane %v4676_v33, %v7894_v17  ;;  %v4685_v35 = vrot.slane %v4676_v33, %v7899_v32 }
 0xa90   :  { %6959 = vmatpush1.bf16.msra.mxu1 %v8045_v23  ;;  %6989 = vmatpush3.bf16.msra.mxu0 %v8048_v55 }
 0xa91   :  { %6961 = vmatprep.subr.bf16.mxu1 %v8052_v38  ;;  %6990 = vmatprep.subr.bf16.mxu0 %v7296_v36 }
 0xa94   :  { %6963 = vmatpush1.bf16.msra.mxu1 %v8055_v47  ;;  %6992 = vmatpush3.bf16.msra.mxu0 %v8058_v37 }
 0xa95   :  { %6965 = vmatprep.subr.bf16.mxu1 %v8062_v9  ;;  %6993 = vmatprep.subr.bf16.mxu0 %v7296_v36 }
 0xa98   :  { %6967 = vmatpush1.bf16.msra.mxu1 %v8065_v53  ;;  %6995 = vmatpush3.bf16.msra.mxu0 %v8068_v57 }
 0xa99   :  { %6969 = vmatprep.subr.bf16.mxu1 %v8072_v26  ;;  %6996 = vmatprep.subr.bf16.mxu0 %v7296_v36 }
 0xa9c   :  { %6971 = vmatpush1.bf16.msra.mxu1 %v8075_v52  ;;  %6998 = vmatpush3.bf16.msra.mxu0 %v8078_v10 }
 0xa9d   :  { %6973 = vmatprep.subr.bf16.mxu1 %v8080_v58  ;;  %6999 = vmatprep.subr.bf16.mxu0 %v7296_v36 }
 0xaa0   :  { %6975 = vmatpush1.bf16.msra.mxu1 %v8083_v63  ;;  %7001 = vmatpush3.bf16.msra.mxu0 %v8087_v6 }
 0xaa1   :  { %6977 = vmatprep.subr.bf16.mxu1 %v8089_v34  ;;  %7002 = vmatprep.subr.bf16.mxu0 %v7296_v36  ;;  %v4689_v34 = vrot.slane %v4676_v33, %v7907_v46 }
 0xaa4   :  { %6979 = vmatpush1.bf16.msra.mxu1 %v8093_v51  ;;  %7004 = vmatpush3.bf16.msra.mxu0 %v8097_v19 }
 0xaa5   :  { %6981 = vmatprep.subr.bf16.mxu1 %v8099_v41  ;;  %7005 = vmatprep.subr.bf16.mxu0 %v7296_v36 }
 0xaa8   :  { %6983 = vmatpush1.bf16.msra.mxu1 %v8103_v44  ;;  %7007 = vmatpush3.bf16.msra.mxu0 %v8107_v50  ;;  %v4865_v44 = vrot.slane %v8223_v13, 6  ;;  %v5129_v13 = vld [vmem:[%s8388_s12 + $0x70] sm:$0xff] }
 0xaa9   :  { %7009 = vmatprep.subr.bf16.mxu1 %v7008_v24  ;;  %v7036_v33 = vpack.c.bf16 %v5130_v54, %v5129_v13 }
 0xb5e   :  { %v4762_v21 = vpop.f32.mrb[44].mxu1  ;;  %v4833_v23 = vpop.f32.mrb[22].mxu0 }
 0xb5f   :  { %v4763_v55 = vadd.f32 %v4762_v21, %v4681_v30  ;;  %v4764_v38 = vpop.f32.mrb[45].mxu1  ;;  %v6297_v47 = vpop.f32.mrb[23].mxu0  ;;  %v4834_v51 = vadd.f32 %v4833_v23, %v4689_v34  ;;  %v4918_v30 = vld [vmem:[%s8387_s11] sm:$0x7] }
 0xb60   :  { %v4765_v37 = vadd.f32 %v4764_v38, %v4685_v35  ;;  %v4923_v35 = vrot.slane %v4918_v30, %v7894_v17  ;;  %v4927_v21 = vrot.slane %v4918_v30, %v7899_v32 }
 0xb61   :  { %v4838_v9 = vrot.slane %v4763_v55, 4  ;;  %v4858_v19 = vrot.slane %v4834_v51, 4 }
 0xb62   :  { %v4848_v36 = vrot.slane %v4765_v37, 4 }
 0xb63   :  { %v4840_v53 = vadd.f32 %v4838_v9, %v7903_v42 }
 0xb64   :  { %v4850_v57 = vadd.f32 %v4848_v36, %v7905_v43 }
 0xb65   :  { %v5433_v26 = vmul.f32 -1.442695, %v4840_v53 }
 0xb66   :  { %v5434_v52 = vmul.f32 -1.442695, %v4850_v57 }
 0xb67   :  { %7142 = vpow2.f32 %v5433_v26 }
 0xb68   :  { %7144 = vpow2.f32 %v5434_v52 }
 0xb71   :  { %v7143_v10 = vpop.eup %7142 }
 0xb72   :  { %v7145_v58 = vpop.eup %7144  ;;  %v4844_v63 = vadd.f32 1.0, %v7143_v10 }
 0xb73   :  { %v4854_v6 = vadd.f32 1.0, %v7145_v58 }
 0xb74   :  { %7146 = vrcp.f32 %v4844_v63 }
 0xb75   :  { %7148 = vrcp.f32 %v4854_v6  ;;  %v4931_v6 = vrot.slane %v4918_v30, %v7907_v46  ;;  %v5437_v46 = vld [vmem:[%s8389_s13] ss:$0 sm:$0xff]  ;;  %s7298_s13 = smov [#allocation9]  }
 0xb76   :  { %s5275_s29 = sshll.u32 %s7298_s13, 4  ;;  %s8336_s29 = int_to_ptr.vmem [resolvable:$true] %s5275_s29 }
 0xb7e   :  { %v7147_v41 = vpop.eup %7146 }
 0xb7f   :  { %v7149_v50 = vpop.eup %7148  ;;  %v4860_v11 = vmul.f32 %v7147_v41, %v4858_v19 }
 0xb80   :  { %v4867_v12 = vmul.f32 %v7149_v50, %v4865_v44  ;;  %v4863_v61 = vsub.f32 1.0, %v7149_v50 }
 0xb81   :  { %v4861_v14 = vadd.f32 %v4860_v11, %v7910_v8 }
 0xb83   :  { %7150 = vtanh.f32 %v4861_v14 }
 0xb8d   :  { %v7151_v49 = vpop.eup %7150 }
 0xb8e   :  { %v4864_v29 = vmul.f32 %v7151_v49, %v4863_v61 }
 0xb90   :  { %v8270_v31 = vadd.f32 %v4867_v12, %v4864_v29 }
 0xb92   :  { %4869 = vst [vmem:[#allocation2 + $0x8] sm:$0x30] %v8270_v31  ;;  %v4936_v2 = vrot.slane %v8270_v31, 4  ;;  %v5107_v41 = vrot.slane %v8270_v31, 6 }
 0xb94   :  { %5003 = vmatmul.mubr.f32.vlgmr.msra.gmra.mrb[46].mxu1 %v4936_v2  ;;  %6331 = vmatmul.mubr.f32.vlgmr.msra.gmra.mrb[24].mxu0 %v4936_v2 }
 0xb95   :  { %6365 = vmatprep.mubr.f32.mxu1 %v5113_v22  ;;  %7011 = vmatpush3.bf16.msra.mxu1 %v7008_v24 }
 0xb96   :  { %7013 = vmatprep.subr.bf16.mxu1 %v7012_v62 }
 0xb99   :  { %7015 = vmatpush3.bf16.msra.mxu1 %v7012_v62 }
 0xb9a   :  { %7017 = vmatprep.subr.bf16.mxu1 %v7016_v4 }
 0xb9d   :  { %7019 = vmatpush3.bf16.msra.mxu1 %v7016_v4 }
 0xb9e   :  { %7021 = vmatprep.subr.bf16.mxu1 %v7020_v20 }
 0xba1   :  { %7023 = vmatpush3.bf16.msra.mxu1 %v7020_v20 }
 0xba2   :  { %7025 = vmatprep.subr.bf16.mxu1 %v7024_v25 }
 0xba5   :  { %7027 = vmatpush3.bf16.msra.mxu1 %v7024_v25 }
 0xba6   :  { %7029 = vmatprep.subr.bf16.mxu1 %v7028_v45 }
 0xba9   :  { %7031 = vmatpush3.bf16.msra.mxu1 %v7028_v45 }
 0xbaa   :  { %7033 = vmatprep.subr.bf16.mxu1 %v7032_v39 }
 0xbad   :  { %7035 = vmatpush3.bf16.msra.mxu1 %v7032_v39 }
 0xbae   :  { %7037 = vmatprep.subr.bf16.mxu1 %v7036_v33 }
 0xbb1   :  { %7039 = vmatpush3.bf16.msra.mxu1 %v7036_v33 }
 0xc67   :  { %v5004_v23 = vpop.f32.mrb[46].mxu1  ;;  %v5075_v55 = vpop.f32.mrb[24].mxu0 }
 0xc68   :  { %v5005_v38 = vadd.f32 %v5004_v23, %v4923_v35  ;;  %v5006_v47 = vpop.f32.mrb[47].mxu1  ;;  %v6332_v37 = vpop.f32.mrb[25].mxu0  ;;  %v5076_v34 = vadd.f32 %v5075_v55, %v4931_v6 }
 0xc69   :  { %v5007_v9 = vadd.f32 %v5006_v47, %v4927_v21 }
 0xc6a   :  { %v5080_v36 = vrot.slane %v5005_v38, 2  ;;  %v5100_v51 = vrot.slane %v5076_v34, 2 }
 0xc6b   :  { %v5090_v53 = vrot.slane %v5007_v9, 2 }
 0xc6c   :  { %v5082_v57 = vadd.f32 %v5080_v36, %v7903_v42 }
 0xc6d   :  { %v5092_v26 = vadd.f32 %v5090_v53, %v7905_v43 }
 0xc6e   :  { %v5435_v52 = vmul.f32 -1.442695, %v5082_v57 }
 0xc6f   :  { %v5436_v10 = vmul.f32 -1.442695, %v5092_v26 }
 0xc70   :  { %7152 = vpow2.f32 %v5435_v52 }
 0xc71   :  { %7154 = vpow2.f32 %v5436_v10 }
 0xc7a   :  { %v7153_v58 = vpop.eup %7152 }
 0xc7b   :  { %v7155_v17 = vpop.eup %7154  ;;  %v5086_v63 = vadd.f32 1.0, %v7153_v58 }
 0xc7c   :  { %v5096_v32 = vadd.f32 1.0, %v7155_v17 }
 0xc7d   :  { %7156 = vrcp.f32 %v5086_v63 }
 0xc7e   :  { %7158 = vrcp.f32 %v5096_v32 }
 0xc87   :  { %v7157_v19 = vpop.eup %7156 }
 0xc88   :  { %v7159_v42 = vpop.eup %7158  ;;  %v5102_v44 = vmul.f32 %v7157_v19, %v5100_v51 }
 0xc89   :  { %v5109_v43 = vmul.f32 %v7159_v42, %v5107_v41  ;;  %v5105_v11 = vsub.f32 1.0, %v7159_v42 }
 0xc8a   :  { %v5103_v50 = vadd.f32 %v5102_v44, %v7910_v8  ;;  %v5234_v8 = vand.u32 127, %v3037_v5 }
 0xc8c   :  { %7160 = vtanh.f32 %v5103_v50 }
 0xc96   :  { %v7161_v12 = vpop.eup %7160 }
 0xc97   :  { %v5106_v14 = vmul.f32 %v7161_v12, %v5105_v11 }
 0xc99   :  { %v5110_v61 = vadd.f32 %v5109_v43, %v5106_v14 }
 0xc9b   :  { %5111 = vst [vmem:[#allocation2 + $0x8] sm:$0xc0] %v5110_v61  ;;  %5112 = vst [vmem:[#allocation10 - $0x6] sm:$0xc0] %v5110_v61 }
 0xca2   :  { %v5114_v49 = vld [vmem:[#allocation2 + $0x8] sm:$0xff] }
 0xca3   :  { %6366 = vmatmul.mubr.f32.vlgmr.msra.gmra.mrb[48].mxu1 %v5114_v49 }
 0xd76   :  { %v6367_v29 = vpop.f32.mrb[48].mxu1 }
 0xd77   :  { %v5204_v31 = vpop.f32.mrb[49].mxu1  ;;  %v5210_v22 = vadd.f32 %v6367_v29, %v5437_v46 }
 0xd78   :  { %v5205_v2 = vadd.f32 %v5437_v46, %v5204_v31 }
 0xd7a   :  { %5213 = vmax.xlane.f32.xlu0 %v5205_v2 }
 0xd7e   :  { %5215 = vmax.xlane.f32.xlu0 %v5210_v22 }
 0xe07   :  { %v5214_v27 = vpop.xlane.xlu0 %5213 }
 0xe08   :  { %v5217_v1 = vsub.f32 %v5205_v2, %v5214_v27  ;;  %vm5235_vm4 = vcmp.eq.f32.partialorder %v5205_v2, %v5214_v27 }
 0xe09   :  { %v5237_v24 = vsel %vm5235_vm4, %v5234_v8, 128 }
 0xe0a   :  { %v5219_v60 = vmul.f32 1.442695, %v5217_v1  ;;  %v5240_v7 = vshra.s32 %v5237_v24, 16  ;;  %v5239_v3 = vand.u32 65535, %v5237_v24 }
 0xe0b   :  { %v5216_v62 = vpop.xlane.xlu0 %5215 }
 0xe0c   :  { %7162 = vpow2.f32 %v5219_v60  ;;  %v5218_v15 = vsub.f32 %v5210_v22, %v5216_v62  ;;  %vm5236_vm5 = vcmp.eq.f32.partialorder %v5210_v22, %v5216_v62  ;;  %v5242_v28 = vcvt.s32.f32 %v5240_v7 }
 0xe0d   :  { %v5238_v4 = vsel %vm5236_vm5, %v5234_v8, 128  ;;  %v5241_v18 = vcvt.s32.f32 %v5239_v3 }
 0xe0e   :  { %v5221_v16 = vmul.f32 1.442695, %v5218_v15  ;;  %5243 = vmin.xlane.f32.xlu1 %v5242_v28  ;;  %v5254_v40 = vshra.s32 %v5238_v4, 16  ;;  %v5253_v56 = vand.u32 65535, %v5238_v4 }
 0xe10   :  { %7164 = vpow2.f32 %v5221_v16  ;;  %v5256_v20 = vcvt.s32.f32 %v5254_v40  ;;  %v5255_v48 = vcvt.s32.f32 %v5253_v56 }
 0xe12   :  { %5257 = vmin.xlane.f32.xlu1 %v5256_v20 }
 0xe16   :  { %v7163_v0 = vpop.eup %7162 }
 0xe17   :  { %5223 = vadd.xlane.f32.xlu0 %v7163_v0 }
 0xe1a   :  { %v7165_v5 = vpop.eup %7164 }
 0xe1b   :  { %5225 = vadd.xlane.f32.xlu1 %v7165_v5 }
 0xe9b   :  { %v5244_v25 = vpop.xlane.xlu1 %5243 }
 0xe9c   :  { %vm5245_vm6 = vcmp.eq.f32.partialorder %v5242_v28, %v5244_v25 }
 0xe9d   :  { %v5246_v45 = vsel %vm5245_vm6, %v5241_v18, inf }
 0xe9e   :  { %5247 = vmin.xlane.f32.xlu0 %v5246_v45 }
 0xe9f   :  { %v5258_v59 = vpop.xlane.xlu1 %5257 }
 0xea0   :  { %vm5259_vm7 = vcmp.eq.f32.partialorder %v5256_v20, %v5258_v59 }
 0xea1   :  { %v5260_v39 = vsel %vm5259_vm7, %v5255_v48, inf }
 0xea2   :  { %5261 = vmin.xlane.f32.xlu1 %v5260_v39 }
 0xea4   :  { %v5224_v13 = vpop.xlane.xlu0 %5223 }
 0xea5   :  { %7166 = vrcp.f32 %v5224_v13 }
 0xea8   :  { %v5226_v54 = vpop.xlane.xlu1 %5225 }
 0xea9   :  { %7168 = vrcp.f32 %v5226_v54 }
 0xeaf   :  { %v7167_v33 = vpop.eup %7166 }
 0xeb0   :  { %v5228_v30 = vmul.f32 %v7167_v33, %v7163_v0 }
 0xeb2   :  { %5231 = vst [vmem:[#allocation9] sm:$0xff] %v5228_v30 }
 0xeb3   :  { %v7169_v35 = vpop.eup %7168 }
 0xeb4   :  { %v5230_v21 = vmul.f32 %v7169_v35, %v7165_v5 }
 0xeb5   :  { %7247 = shalt.err (!%p7244_p0)
}
 0xeb6   :  { %s7248_s20 = scalar_lea.hbm %s8392_s16, 32 }
 0xeb7   :  { %p7249_p1 = scmp.ne.s32.totalorder %s8392_s16, %s7248_s20  ;;  %p7252_p2 = scmp.lt.u32.totalorder %s7248_s20, %s8392_s16 }
 0xeb9   :  { %p7254_p3 = pnand %p7252_p2, %p7249_p1 }
 0xebb   :  { %7257 = shalt.err (!%p7254_p3)
}
 0xebc   :  { %5293 = dma.vmem_to_hbm [thread:$0]  %s5291_s4, 32, %s8392_s16, [#allocation11]   ;;  %5232 = vst [vmem:[#allocation9 + $0x8] sm:$0xff] %v5230_v21 }
 0xebd   :  { %s7258_s1 = scalar_lea.vmem %s8336_s29, 256  ;;  %p7263_p5 = scmp.lt.s32.totalorder %s8336_s29, %s8336_s29 }
 0xebe   :  { %p7259_p4 = scmp.ne.s32.totalorder %s8336_s29, %s7258_s1  ;;  %p7264_p6 = scmp.lt.s32.totalorder %s7258_s1, %s7258_s1 }
 0xec0   :  { %p7265_p7 = por %p7264_p6, %p7263_p5 }
 0xec2   :  { %p7266_p8 = pnand %p7265_p7, %p7259_p4 }
 0xec4   :  { %7269 = shalt.err (!%p7266_p8)
}
 0xec5   :  { %s7270_s17 = scalar_lea.hbm %s8390_s14, 256 }
 0xec6   :  { %p7271_p9 = scmp.ne.s32.totalorder %s8390_s14, %s7270_s17  ;;  %p7274_p10 = scmp.lt.u32.totalorder %s7270_s17, %s8390_s14 }
 0xec8   :  { %p7276_p11 = pnand %p7274_p10, %p7271_p9 }
 0xeca   :  { %7279 = shalt.err (!%p7276_p11)
}
 0xecb   :  { %5281 = dma.vmem_to_hbm [thread:$0]  %s8336_s29, 256, %s8390_s14, [#allocation5], %s7292_s8, %s7292_s8, %s7293_s22   ;;  %v5250_v23 = vcvt.f32.s32 %v5244_v25  ;;  %v5264_v47 = vcvt.f32.s32 %v5258_v59  ;;  %vm5267_vm8 = vcmask 7168  }
 0xecd   :  { %v5251_v38 = vshll.u32 %v5250_v23, 16  ;;  %v5265_v53 = vshll.u32 %v5264_v47, 16 }
 0xf2b   :  { %v5248_v55 = vpop.xlane.xlu0 %5247 }
 0xf2c   :  { %v5249_v37 = vcvt.f32.s32 %v5248_v55 }
 0xf2e   :  { %v5252_v9 = vadd.s32 %v5251_v38, %v5249_v37 }
 0xf2f   :  { %v5262_v36 = vpop.xlane.xlu1 %5261 }
 0xf30   :  { %5268 = vst.msk [vmem:[%s8391_s15] sm:$0xff] %vm5267_vm8, %v5252_v9  ;;  %v5263_v57 = vcvt.f32.s32 %v5262_v36 }
 0xf32   :  { %v5266_v26 = vadd.s32 %v5265_v53, %v5263_v57 }
 0xf34   :  { %5269 = vst.msk [vmem:[%s8391_s15 + $0x8] sm:$0xff] %vm5267_vm8, %v5266_v26 }
 0xf35   :  { %7284 = dma.done.wait [#allocation5], 256  }
 0xf36   :  { %7285 = vsyncadd [#allocation5], 4294967040 }
 0xf37   :  { %7286 = dma.done.wait [#allocation11], 32  }
 0xf38   :  { %7287 = vsyncadd [#allocation11], 4294967264 }
 0xf39   :  { %5302 = vsyncpa [#allocation4], 1 }
 0xf3a   :  { %5303 = vsyncpa [#allocation7], 1 }
 0xf3b   :  { %5304 = vsyncpa [#allocation5], 1 }
 0xf3c   :  { %5305 = vsyncpa [#allocation11], 1 }

</bundles_post_ra>
